<compile_context>
chip_gen: v7x
topology: tpu7x:2x2x1
jax: 0.10.0
libtpu: 0.0.40
codegen_flags: <defaults>
</compile_context>

<pallas_src>
import functools

import jax
import jax.numpy as jnp
from jax.experimental import pallas as pl
from jax.experimental.pallas import tpu as pltpu


# GEMM tile preferences.  tm prefers multiples of 256 (full MXU pass on
# v6e/v7x), falling back to 128 (v5e's 4x128 MXU) then 16/8.  tn stays 256
# (lane-dense output stores).
TM_PREF = 512
TN_PREF = 256

OUTPUT_SIZE = 64  # scaled stand-in for the real 512 (= C_final / 4, like 2048/4)


def _vmem_limit_bytes():
    """Generation-aware scoped-VMEM budget: ~3/4 of physical VMEM, capped at
    96 MiB.  -> ~48 MiB on v7x (64 MiB phys), ~96 MiB on v5e/v6e (128 MiB)."""
    cap = 128 * 1024 * 1024
    try:
        cap = int(getattr(pltpu.get_tpu_info(), "vmem_capacity_bytes", cap))
    except Exception:
        pass
    return min((cap * 3) // 4, 96 * 1024 * 1024)


VMEM_LIMIT_BYTES = _vmem_limit_bytes()


def _pick_tile(dim, pref, aligns=(256, 128, 16, 8)):
    """Largest tile <= pref dividing `dim`, preferring the coarsest alignment
    in `aligns` (256-multiples first for full v6e/v7x MXU passes).  Falls back
    to the full dim, which always satisfies the (8,128) rule.
    # TODO(synk): switch to cdiv grids + masked edge tiles for non-dividing M."""
    if dim <= pref:
        return dim
    for a in aligns:
        t = (pref // a) * a
        while t >= a:
            if dim % t == 0:
                return t
            t -= a
    return dim


# ----------------------------------------------------------------------------
# Pallas kernels
# ----------------------------------------------------------------------------
def _gemm_bias_act_kernel(x_ref, w_ref, bias_ref, o_ref, *, relu):
    # (tm, K) @ (K, tn) on the MXU (bf16 in, f32 accumulate); BN scale is
    # pre-folded into w, so the epilogue is just bias (+ ReLU) in f32.
    acc = jnp.dot(x_ref[...], w_ref[...], preferred_element_type=jnp.float32)
    acc = acc + bias_ref[...]
    if relu:
        acc = jnp.maximum(acc, 0.0)
    o_ref[...] = acc.astype(o_ref.dtype)
    # TODO(synk): add a K grid axis + f32 VMEM accumulator (pl.when init /
    # finalize, K axis "arbitrary") once K reaches real widths (512-2048).


def _gemm_dual_bias_relu_kernel(x_ref, w_ref, x2_ref, w2_ref, bias_ref, o_ref):
    # Fused 1x1-expand GEMM + downsample-shortcut GEMM + combined bias + ReLU.
    # The shortcut dot rides on the already-resident xi tile, so the (M, C_out)
    # identity tensor never round-trips through HBM.
    acc = jnp.dot(x_ref[...], w_ref[...], preferred_element_type=jnp.float32)
    acc = acc + jnp.dot(x2_ref[...], w2_ref[...],
                        preferred_element_type=jnp.float32)
    acc = acc + bias_ref[...]
    o_ref[...] = jnp.maximum(acc, 0.0).astype(o_ref.dtype)


def _conv3x3_bias_relu_kernel(xs_ref, w_ref, bias_ref, o_ref, acc_ref, *, Wp, W):
    # Fused grouped 3x3 / stride-1 / pad-1 conv (block-diagonal dense weight,
    # BN scale folded in) + bias + ReLU for one image.
    #
    # Shift trick: the padded image is passed pre-flattened as a
    # ((H+3)*Wp, Cw) slab (1 top / 2 bottom / 1 left / 1 right zero pad rows),
    # so each of the 9 taps is ONE big matmul with M = H*Wp (e.g. 3248 at real
    # 56x56) instead of 9*H tiny per-row dots.  Junk columns (the 2 pad
    # columns per flat row) are computed but never stored.
    L = acc_ref.shape[0]                        # H * Wp
    acc_ref[...] = jnp.dot(xs_ref[0, 0:L, :], w_ref[0, 0],
                           preferred_element_type=jnp.float32)
    for di in range(3):
        for dj in range(3):
            if di == 0 and dj == 0:
                continue
            off = di * Wp + dj
            acc_ref[...] += jnp.dot(xs_ref[0, off:off + L, :], w_ref[di, dj],
                                    preferred_element_type=jnp.float32)

    bias = bias_ref[...]                        # (1, Cw) f32
    H = o_ref.shape[1]

    def store_row(h, carry):
        row = acc_ref[pl.ds(h * Wp, W), :]      # valid columns of output row h
        o_ref[0, h] = jnp.maximum(row + bias, 0.0).astype(o_ref.dtype)
        return carry

    jax.lax.fori_loop(0, H, store_row, 0)
    # TODO(synk): add a haloed row-tile grid axis (pl.Element-indexed blocks)
    # so v7x's two TensorCores get multiple pipelined steps per image.


def _maxpool3x3s2_kernel(xg_ref, o_ref, *, C):
    # MaxPool2d(kernel=3, stride=2, pad=1): only the stride-2 outputs are
    # computed and stored.  The wrapper folds H-parity into an extra dim and
    # W-parity into the lane dim (free bitcast reshapes), so every one of the
    # 9 taps is a contiguous slice -- no strided loads, no stride-1 HBM map.
    _, Ho, Wo, _ = o_ref.shape

    def tap(di, dj):
        ro, rp = di // 2, di % 2                # padded row 2*oh+di
        co, cp = dj // 2, dj % 2                # padded col 2*ow+dj
        return xg_ref[0, ro:ro + Ho, rp, co:co + Wo, cp * C:(cp + 1) * C]

    out = tap(0, 0)
    for di in range(3):
        for dj in range(3):
            if di == 0 and dj == 0:
                continue
            out = jnp.maximum(out, tap(di, dj))
    o_ref[0] = out
    # TODO(synk): haloed row-tile grid axis for v7x (same as the 3x3 conv).


def _avgpool_channelpool_kernel(x_ref, pool_ref, o_ref):
    # Fused AdaptiveAvgPool2d((1,1)) + ChannelPoolAdaptiveAvg1d over a whole
    # batch tile: spatial mean, then a single (tb, C) @ (C, out) averaging
    # matmul on the MXU (no per-sample M=1 matmuls).
    x = x_ref[...].astype(jnp.float32)          # (tb, S, C)
    mean_c = jnp.mean(x, axis=1)                # (tb, C)
    o_ref[...] = jnp.dot(mean_c, pool_ref[...],
                         preferred_element_type=jnp.float32)


# ----------------------------------------------------------------------------
# Pallas wrappers
# ----------------------------------------------------------------------------
def gemm_bias_act(x2d, w2d, bias, *, relu, out_dtype, shortcut=None):
    """Tiled (M, K) @ (K, C) GEMM + bias (+ReLU).  With `shortcut=(x2, w2)`
    a second dot (the downsample 1x1 conv) is fused into the same kernel and
    added before the ReLU (bias must already be the combined bias)."""
    M, K = x2d.shape
    Kw, C = w2d.shape
    assert K == Kw
    tm = _pick_tile(M, TM_PREF)
    tn = _pick_tile(C, TN_PREF, aligns=(256, 128))
    grid = (M // tm, C // tn)

    in_specs = [
        pl.BlockSpec((tm, K), lambda i, j: (i, 0)),
        pl.BlockSpec((K, tn), lambda i, j: (0, j)),
    ]
    args = [x2d, w2d]
    if shortcut is None:
        kernel = functools.partial(_gemm_bias_act_kernel, relu=relu)
    else:
        x2, w2 = shortcut
        K2 = x2.shape[1]
        assert x2.shape[0] == M and w2.shape == (K2, C)
        kernel = _gemm_dual_bias_relu_kernel
        in_specs += [pl.BlockSpec((tm, K2), lambda i, j: (i, 0)),
                     pl.BlockSpec((K2, tn), lambda i, j: (0, j))]
        args += [x2, w2]
    in_specs.append(pl.BlockSpec((1, tn), lambda i, j: (0, j)))
    args.append(jnp.asarray(bias, jnp.float32).reshape(1, C))

    return pl.pallas_call(
        kernel,
        out_shape=jax.ShapeDtypeStruct((M, C), out_dtype),
        grid=grid,
        in_specs=in_specs,
        out_specs=pl.BlockSpec((tm, tn), lambda i, j: (i, j)),
        compiler_params=pltpu.CompilerParams(
            dimension_semantics=("parallel", "parallel"),
            vmem_limit_bytes=VMEM_LIMIT_BYTES),
    )(*args)


def conv3x3_bias_relu(x, w, bias, *, out_dtype=jnp.bfloat16):
    """Fused grouped 3x3 / stride-1 / pad-1 conv + bias + ReLU.

    x: (N, H, W, Cw) bf16; w: (3, 3, Cw, Cw) block-diagonal (== grouped) bf16
    with BN scale already folded in.
    """
    N, H, W, Cw = x.shape
    Wp = W + 2
    # 1 top / 2 bottom pad rows: the extra bottom row keeps all 9 flat tap
    # slices of length H*Wp in-bounds; it never reaches a stored output.
    xp = jnp.pad(x, ((0, 0), (1, 2), (1, 1), (0, 0)))
    xs = xp.reshape(N, (H + 3) * Wp, Cw)        # free row-major flatten
    L = H * Wp
    kernel = functools.partial(_conv3x3_bias_relu_kernel, Wp=Wp, W=W)
    return pl.pallas_call(
        kernel,
        out_shape=jax.ShapeDtypeStruct((N, H, W, Cw), out_dtype),
        grid=(N,),
        in_specs=[
            pl.BlockSpec((1, (H + 3) * Wp, Cw), lambda n: (n, 0, 0)),
            pl.BlockSpec((3, 3, Cw, Cw), lambda n: (0, 0, 0, 0)),
            pl.BlockSpec((1, Cw), lambda n: (0, 0)),
        ],
        out_specs=pl.BlockSpec((1, H, W, Cw), lambda n: (n, 0, 0, 0)),
        scratch_shapes=[pltpu.VMEM((L, Cw), jnp.float32)],
        compiler_params=pltpu.CompilerParams(
            dimension_semantics=("parallel",),
            vmem_limit_bytes=VMEM_LIMIT_BYTES),
    )(xs, w, jnp.asarray(bias, jnp.float32).reshape(1, Cw))


def maxpool2d_3x3s2(x):
    """MaxPool2d(kernel=3, stride=2, padding=1) on NHWC -> (N, H//2, W//2, C).

    Stride-2 outputs are computed directly in-kernel; the wrapper only does
    free bitcast reshapes (H pairs -> extra dim, W pairs folded into lanes).
    """
    N, H, W, C = x.shape
    assert H % 2 == 0 and W % 2 == 0
    Ho, Wo = H // 2, W // 2
    xp = jnp.pad(x, ((0, 0), (1, 1), (1, 1), (0, 0)),
                 constant_values=-jnp.inf)
    Hg, Wg = (H + 2) // 2, (W + 2) // 2
    xg = xp.reshape(N, Hg, 2, Wg, 2 * C)        # free parity regroup
    kernel = functools.partial(_maxpool3x3s2_kernel, C=C)
    return pl.pallas_call(
        kernel,
        out_shape=jax.ShapeDtypeStruct((N, Ho, Wo, C), x.dtype),
        grid=(N,),
        in_specs=[pl.BlockSpec((1, Hg, 2, Wg, 2 * C),
                               lambda n: (n, 0, 0, 0, 0))],
        out_specs=pl.BlockSpec((1, Ho, Wo, C), lambda n: (n, 0, 0, 0)),
        compiler_params=pltpu.CompilerParams(
            dimension_semantics=("parallel",),
            vmem_limit_bytes=VMEM_LIMIT_BYTES),
    )(xg)


def avgpool_channelpool(x, output_size):
    """Fused AdaptiveAvgPool2d((1,1)) + ChannelPoolAdaptiveAvg1d(output_size).

    x: (N, H, W, C) -> (N, output_size) f32.  Exact when C % output_size == 0
    (true for the real model: 2048 % 512 == 0).
    # TODO(synk): overlapping adaptive-pool bins for C % output_size != 0.
    """
    N, H, W, C = x.shape
    assert C % output_size == 0
    g = C // output_size
    S = H * W
    xr = x.reshape(N, S, C)
    pool = jax.nn.one_hot(jnp.arange(C) // g, output_size,
                          dtype=jnp.float32) / g
    tb = N if (N <= 8 or N % 8 != 0) else 8
    return pl.pallas_call(
        _avgpool_channelpool_kernel,
        out_shape=jax.ShapeDtypeStruct((N, output_size), jnp.float32),
        grid=(N // tb,),
        in_specs=[
            pl.BlockSpec((tb, S, C), lambda n: (n, 0, 0)),
            pl.BlockSpec((C, output_size), lambda n: (0, 0)),
        ],
        out_specs=pl.BlockSpec((tb, output_size), lambda n: (n, 0)),
        compiler_params=pltpu.CompilerParams(
            dimension_semantics=("parallel",),
            vmem_limit_bytes=VMEM_LIMIT_BYTES),
    )(xr, pool)


def im2col(x, kh, kw, stride, pad):
    """Plain-JAX patch extraction (stem only; cheap because Cin=3).

    TODO(synk): at real resolutions fuse the stem taps into the GEMM like the
    3x3 path to avoid the 49x patch materialization.
    """
    N, H, W, C = x.shape
    xp = jnp.pad(x, ((0, 0), (pad, pad), (pad, pad), (0, 0)))
    Ho = (H + 2 * pad - kh) // stride + 1
    Wo = (W + 2 * pad - kw) // stride + 1
    pats = []
    for i in range(kh):
        for j in range(kw):
            pats.append(xp[:, i:i + Ho * stride:stride, j:j + Wo * stride:stride, :])
    p = jnp.stack(pats, axis=3)  # (N, Ho, Wo, kh*kw, C); tap-major, C inner
    return p, Ho, Wo


# ----------------------------------------------------------------------------
# Parameters (deterministic synthetic init; eval-mode BN folded into weights)
# ----------------------------------------------------------------------------
def _fold_bn(key, c, eps=1e-5):
    kg, kb, km, kv = jax.random.split(key, 4)
    gamma = 1.0 + 0.1 * jax.random.normal(kg, (c,), jnp.float32)
    beta = 0.1 * jax.random.normal(kb, (c,), jnp.float32)
    mean = 0.05 * jax.random.normal(km, (c,), jnp.float32)
    var = 1.0 + 0.1 * jax.random.uniform(kv, (c,), jnp.float32)
    scale = gamma * jax.lax.rsqrt(var + eps)
    bias = beta - mean * scale
    return scale, bias


def _conv_w(key, kh, kw, cin, cout):
    # (kh, kw, cin)-flattened input layout; pretrained PyTorch (cout,cin,kh,kw)
    # weights would need permutation to (kh,kw,cin)->flat before use here.
    fan_in = kh * kw * cin
    return jax.random.normal(key, (kh * kw * cin, cout), jnp.float32) * (2.0 / fan_in) ** 0.5


def init_params(key, cin=3, c_stem=64, width=128, groups=32, c_out=256):
    ks = jax.random.split(key, 10)
    cg = width // groups
    p = {}

    # stem: 7x7/2 conv + BN (scale folded into the weight, K = 7*7*3 = 147
    # left unpadded -- Mosaic pads lanes in VMEM for free).
    w1 = _conv_w(ks[0], 7, 7, cin, c_stem)
    s1, b1 = _fold_bn(ks[1], c_stem)
    p["conv1_w"] = (w1 * s1[None, :]).astype(jnp.bfloat16)
    p["conv1_b"] = b1

    # ResNeXt bottleneck (32 groups x 4 channels, real first-stage widths)
    wr = _conv_w(ks[2], 1, 1, c_stem, width)
    s2, b2 = _fold_bn(ks[3], width)
    p["b_conv1_w"] = (wr * s2[None, :]).astype(jnp.bfloat16)
    p["b_conv1_b"] = b2

    # grouped 3x3 weight stored as an equivalent block-diagonal dense matrix
    # (off-diagonal zeros == no cross-group mixing); trades G-fold extra MXU
    # FLOPs for fully lane-dense loads/stores -- a clear win at cg=4.
    # TODO(synk): at deeper stages (cg=32) pack groups into 128-lane chunks or
    # map groups onto M instead; the dense trick's 32x FLOPs stop being free.
    wg = (jax.random.normal(ks[4], (groups, 3, 3, cg, cg), jnp.float32)
          * (2.0 / (9 * cg)) ** 0.5)
    wd = jnp.zeros((3, 3, width, width), jnp.float32)
    for g in range(groups):
        wd = wd.at[:, :, g * cg:(g + 1) * cg, g * cg:(g + 1) * cg].set(wg[g])
    s3, b3 = _fold_bn(ks[5], width)
    p["b_conv2_w"] = (wd * s3[None, None, None, :]).astype(jnp.bfloat16)
    p["b_conv2_b"] = b3

    we = _conv_w(ks[6], 1, 1, width, c_out)
    s4, b4 = _fold_bn(ks[7], c_out)
    p["b_conv3_w"] = (we * s4[None, :]).astype(jnp.bfloat16)

    wdn = _conv_w(ks[8], 1, 1, c_stem, c_out)
    s5, b5 = _fold_bn(ks[9], c_out)
    p["b_down_w"] = (wdn * s5[None, :]).astype(jnp.bfloat16)
    # combined bias for the fused expand + downsample + ReLU kernel
    p["b_conv3_down_b"] = b4 + b5
    return p


# ----------------------------------------------------------------------------
# Img2Vec forward
# ----------------------------------------------------------------------------
def bottleneck(params, x):
    """ResNeXt bottleneck. x: (N, H, W, Cin) bf16 -> (N, H, W, Cout) bf16."""
    N, H, W, Cin = x.shape
    M = N * H * W
    xi = x.reshape(M, Cin)

    # 1x1 reduce + BN + ReLU
    y = gemm_bias_act(xi, params["b_conv1_w"], params["b_conv1_b"],
                      relu=True, out_dtype=jnp.bfloat16)
    width = y.shape[-1]

    # grouped 3x3 conv + BN + ReLU (shift-trick tap matmuls, lane-dense output)
    y = conv3x3_bias_relu(y.reshape(N, H, W, width), params["b_conv2_w"],
                          params["b_conv2_b"])

    # 1x1 expand + downsample shortcut + residual add + ReLU, all in one GEMM
    # kernel (the identity path never touches HBM).
    out = gemm_bias_act(y.reshape(M, width), params["b_conv3_w"],
                        params["b_conv3_down_b"], relu=True,
                        out_dtype=jnp.bfloat16,
                        shortcut=(xi, params["b_down_w"]))
    return out.reshape(N, H, W, out.shape[-1])


def img2vec_forward(params, image_nchw, output_size=OUTPUT_SIZE, batch=True):
    """image_nchw: (N, 3, H, W) float32 (PyTorch NCHW convention)."""
    # NCHW -> NHWC, bf16 activations at the kernel boundary (f32 accumulation
    # and bias/ReLU epilogues happen inside the kernels).
    x = jnp.transpose(image_nchw, (0, 2, 3, 1)).astype(jnp.bfloat16)
    N = x.shape[0]

    # stem: conv 7x7 / stride 2 / pad 3 + BN + ReLU (im2col + tiled GEMM,
    # K = 147 passed as a full block -- no HBM zero-pad copy)
    p, Ho, Wo = im2col(x, 7, 7, 2, 3)
    p2 = p.reshape(N * Ho * Wo, -1)
    y = gemm_bias_act(p2, params["conv1_w"], params["conv1_b"],
                      relu=True, out_dtype=jnp.bfloat16)
    y = y.reshape(N, Ho, Wo, -1)

    # maxpool 3x3 / stride 2 / pad 1 (stride-2 outputs computed in-kernel)
    y = maxpool2d_3x3s2(y)

    # ResNeXt bottleneck stage (scaled down to a single block)
    y = bottleneck(params, y)

    # fused AdaptiveAvgPool2d((1,1)) + ChannelPoolAdaptiveAvg1d(output_size)
    emb = avgpool_channelpool(y, output_size)

    if batch:
        return emb
    return emb[0, :]


if __name__ == "__main__":
    key = jax.random.PRNGKey(0)
    kx, kp = jax.random.split(key)

    # Small synthetic RGB batch, PyTorch NCHW convention.
    x = jax.random.normal(kx, (2, 3, 16, 16), jnp.float32)
    params = init_params(kp)

    fwd = jax.jit(img2vec_forward, static_argnames=("output_size", "batch"))

    emb = jax.block_until_ready(fwd(params, x, output_size=OUTPUT_SIZE, batch=True))
    assert emb.shape == (2, OUTPUT_SIZE), emb.shape
    assert emb.dtype == jnp.float32

    # non-batch path (returns embedding[0, :])
    emb0 = jax.block_until_ready(fwd(params, x, output_size=OUTPUT_SIZE, batch=False))
    assert emb0.shape == (OUTPUT_SIZE,)

    print("KERNEL_OK")
</pallas_src>

<mosaic_0001>
module attributes {stable_mosaic.version = 11 : i64} {
  func.func @_gemm_bias_act_kernel(%arg0: i32, %arg1: i32, %arg2: memref<128x147xbf16, #tpu.memory_space<vmem>>, %arg3: memref<147x64xbf16, #tpu.memory_space<vmem>>, %arg4: memref<1x64xf32, #tpu.memory_space<vmem>>, %arg5: memref<128x64xbf16, #tpu.memory_space<vmem>>) attributes {dimension_semantics = [#tpu.dimension_semantics<parallel>, #tpu.dimension_semantics<parallel>], iteration_bounds = array<i64: 1, 1>, scalar_prefetch = 0 : i64, scratch_operands = 0 : i64, tpu.core_type = #tpu.core_type<tc>, window_params = [{transform_indices = @transform_0, window_bounds = array<i64: 128, 147>}, {transform_indices = @transform_1, window_bounds = array<i64: 147, 64>}, {transform_indices = @transform_2, window_bounds = array<i64: 1, 64>}, {transform_indices = @transform_3, window_bounds = array<i64: 128, 64>}]} {
    %c0 = arith.constant 0 : index
    %c0_0 = arith.constant 0 : index
    %0 = vector.load %arg2[%c0, %c0_0] : memref<128x147xbf16, #tpu.memory_space<vmem>>, vector<128x147xbf16>
    %c0_1 = arith.constant 0 : index
    %c0_2 = arith.constant 0 : index
    %1 = vector.load %arg3[%c0_1, %c0_2] : memref<147x64xbf16, #tpu.memory_space<vmem>>, vector<147x64xbf16>
    %cst = arith.constant dense<0.000000e+00> : vector<128x64xf32>
    %2 = tpu.matmul %0, %1, %cst {dimension_numbers = #tpu.dot_dimension_numbers<[1], [0], [0], [1], [0, 0, 1, 1], [], []>} : vector<128x147xbf16>, vector<147x64xbf16>, vector<128x64xf32> -> vector<128x64xf32>
    %c0_3 = arith.constant 0 : index
    %c0_4 = arith.constant 0 : index
    %3 = vector.load %arg4[%c0_3, %c0_4] : memref<1x64xf32, #tpu.memory_space<vmem>>, vector<1x64xf32>
    %4 = vector.broadcast %3 : vector<1x64xf32> to vector<128x64xf32>
    %5 = arith.addf %2, %4 : vector<128x64xf32>
    %cst_5 = arith.constant 0.000000e+00 : f32
    %6 = vector.broadcast %cst_5 : f32 to vector<128x64xf32>
    %7 = arith.maximumf %5, %6 : vector<128x64xf32>
    %8 = arith.truncf %7 : vector<128x64xf32> to vector<128x64xbf16>
    %c0_6 = arith.constant 0 : index
    %c0_7 = arith.constant 0 : index
    %9 = vector.load %arg5[%c0_6, %c0_7] : memref<128x64xbf16, #tpu.memory_space<vmem>>, vector<128x64xbf16>
    tpu.vector_store %arg5[%c0_6, %c0_7], %8 {strides = array<i32>} : memref<128x64xbf16, #tpu.memory_space<vmem>>, vector<128x64xbf16>,
    return
  }
  func.func @transform_0(%arg0: i32, %arg1: i32) -> (i32, i32) {
    %c0_i32 = arith.constant 0 : i32
    %c0_i32_0 = arith.constant 0 : i32
    return %arg0, %c0_i32 : i32, i32
  }
  func.func @transform_1(%arg0: i32, %arg1: i32) -> (i32, i32) {
    %c0_i32 = arith.constant 0 : i32
    %c0_i32_0 = arith.constant 0 : i32
    return %c0_i32, %arg1 : i32, i32
  }
  func.func @transform_2(%arg0: i32, %arg1: i32) -> (i32, i32) {
    %c0_i32 = arith.constant 0 : i32
    %c0_i32_0 = arith.constant 0 : i32
    return %c0_i32, %arg1 : i32, i32
  }
  func.func @transform_3(%arg0: i32, %arg1: i32) -> (i32, i32) {
    %c0_i32 = arith.constant 0 : i32
    return %arg0, %arg1 : i32, i32
  }
}

module attributes {stable_mosaic.version = 11 : i64} {
  func.func @_maxpool3x3s2_kernel(%arg0: i32, %arg1: memref<1x5x2x5x128xbf16, #tpu.memory_space<vmem>>, %arg2: memref<1x4x4x64xbf16, #tpu.memory_space<vmem>>) attributes {dimension_semantics = [#tpu.dimension_semantics<parallel>], iteration_bounds = array<i64: 2>, scalar_prefetch = 0 : i64, scratch_operands = 0 : i64, tpu.core_type = #tpu.core_type<tc>, window_params = [{transform_indices = @transform_0, window_bounds = array<i64: 1, 5, 2, 5, 128>}, {transform_indices = @transform_1, window_bounds = array<i64: 1, 4, 4, 64>}]} {
    %c0 = arith.constant 0 : index
    %c0_0 = arith.constant 0 : index
    %c0_1 = arith.constant 0 : index
    %c0_2 = arith.constant 0 : index
    %c0_3 = arith.constant 0 : index
    %0 = vector.load %arg1[%c0, %c0_0, %c0_1, %c0_2, %c0_3] : memref<1x5x2x5x128xbf16, #tpu.memory_space<vmem>>, vector<1x4x1x4x64xbf16>
    %1 = vector.shape_cast %0 : vector<1x4x1x4x64xbf16> to vector<4x4x64xbf16>
    %c0_4 = arith.constant 0 : index
    %c0_5 = arith.constant 0 : index
    %c0_6 = arith.constant 0 : index
    %c0_7 = arith.constant 0 : index
    %c64 = arith.constant 64 : index
    %2 = vector.load %arg1[%c0_4, %c0_5, %c0_6, %c0_7, %c64] : memref<1x5x2x5x128xbf16, #tpu.memory_space<vmem>>, vector<1x4x1x4x64xbf16>
    %3 = vector.shape_cast %2 : vector<1x4x1x4x64xbf16> to vector<4x4x64xbf16>
    %4 = arith.maximumf %1, %3 : vector<4x4x64xbf16>
    %c0_8 = arith.constant 0 : index
    %c0_9 = arith.constant 0 : index
    %c0_10 = arith.constant 0 : index
    %c1 = arith.constant 1 : index
    %c0_11 = arith.constant 0 : index
    %5 = vector.load %arg1[%c0_8, %c0_9, %c0_10, %c1, %c0_11] : memref<1x5x2x5x128xbf16, #tpu.memory_space<vmem>>, vector<1x4x1x4x64xbf16>
    %6 = vector.shape_cast %5 : vector<1x4x1x4x64xbf16> to vector<4x4x64xbf16>
    %7 = arith.maximumf %4, %6 : vector<4x4x64xbf16>
    %c0_12 = arith.constant 0 : index
    %c0_13 = arith.constant 0 : index
    %c1_14 = arith.constant 1 : index
    %c0_15 = arith.constant 0 : index
    %c0_16 = arith.constant 0 : index
    %8 = vector.load %arg1[%c0_12, %c0_13, %c1_14, %c0_15, %c0_16] : memref<1x5x2x5x128xbf16, #tpu.memory_space<vmem>>, vector<1x4x1x4x64xbf16>
    %9 = vector.shape_cast %8 : vector<1x4x1x4x64xbf16> to vector<4x4x64xbf16>
    %10 = arith.maximumf %7, %9 : vector<4x4x64xbf16>
    %c0_17 = arith.constant 0 : index
    %c0_18 = arith.constant 0 : index
    %c1_19 = arith.constant 1 : index
    %c0_20 = arith.constant 0 : index
    %c64_21 = arith.constant 64 : index
    %11 = vector.load %arg1[%c0_17, %c0_18, %c1_19, %c0_20, %c64_21] : memref<1x5x2x5x128xbf16, #tpu.memory_space<vmem>>, vector<1x4x1x4x64xbf16>
    %12 = vector.shape_cast %11 : vector<1x4x1x4x64xbf16> to vector<4x4x64xbf16>
    %13 = arith.maximumf %10, %12 : vector<4x4x64xbf16>
    %c0_22 = arith.constant 0 : index
    %c0_23 = arith.constant 0 : index
    %c1_24 = arith.constant 1 : index
    %c1_25 = arith.constant 1 : index
    %c0_26 = arith.constant 0 : index
    %14 = vector.load %arg1[%c0_22, %c0_23, %c1_24, %c1_25, %c0_26] : memref<1x5x2x5x128xbf16, #tpu.memory_space<vmem>>, vector<1x4x1x4x64xbf16>
    %15 = vector.shape_cast %14 : vector<1x4x1x4x64xbf16> to vector<4x4x64xbf16>
    %16 = arith.maximumf %13, %15 : vector<4x4x64xbf16>
    %c0_27 = arith.constant 0 : index
    %c1_28 = arith.constant 1 : index
    %c0_29 = arith.constant 0 : index
    %c0_30 = arith.constant 0 : index
    %c0_31 = arith.constant 0 : index
    %17 = vector.load %arg1[%c0_27, %c1_28, %c0_29, %c0_30, %c0_31] : memref<1x5x2x5x128xbf16, #tpu.memory_space<vmem>>, vector<1x4x1x4x64xbf16>
    %18 = vector.shape_cast %17 : vector<1x4x1x4x64xbf16> to vector<4x4x64xbf16>
    %19 = arith.maximumf %16, %18 : vector<4x4x64xbf16>
    %c0_32 = arith.constant 0 : index
    %c1_33 = arith.constant 1 : index
    %c0_34 = arith.constant 0 : index
    %c0_35 = arith.constant 0 : index
    %c64_36 = arith.constant 64 : index
    %20 = vector.load %arg1[%c0_32, %c1_33, %c0_34, %c0_35, %c64_36] : memref<1x5x2x5x128xbf16, #tpu.memory_space<vmem>>, vector<1x4x1x4x64xbf16>
    %21 = vector.shape_cast %20 : vector<1x4x1x4x64xbf16> to vector<4x4x64xbf16>
    %22 = arith.maximumf %19, %21 : vector<4x4x64xbf16>
    %c0_37 = arith.constant 0 : index
    %c1_38 = arith.constant 1 : index
    %c0_39 = arith.constant 0 : index
    %c1_40 = arith.constant 1 : index
    %c0_41 = arith.constant 0 : index
    %23 = vector.load %arg1[%c0_37, %c1_38, %c0_39, %c1_40, %c0_41] : memref<1x5x2x5x128xbf16, #tpu.memory_space<vmem>>, vector<1x4x1x4x64xbf16>
    %24 = vector.shape_cast %23 : vector<1x4x1x4x64xbf16> to vector<4x4x64xbf16>
    %25 = arith.maximumf %22, %24 : vector<4x4x64xbf16>
    %c0_42 = arith.constant 0 : index
    %c0_43 = arith.constant 0 : index
    %c0_44 = arith.constant 0 : index
    %c0_45 = arith.constant 0 : index
    %26 = vector.load %arg2[%c0_42, %c0_43, %c0_44, %c0_45] : memref<1x4x4x64xbf16, #tpu.memory_space<vmem>>, vector<1x4x4x64xbf16>
    %27 = vector.shape_cast %26 : vector<1x4x4x64xbf16> to vector<4x4x64xbf16>
    %28 = vector.shape_cast %25 : vector<4x4x64xbf16> to vector<1x4x4x64xbf16>
    tpu.vector_store %arg2[%c0_42, %c0_43, %c0_44, %c0_45], %28 {strides = array<i32>} : memref<1x4x4x64xbf16, #tpu.memory_space<vmem>>, vector<1x4x4x64xbf16>,
    return
  }
  func.func @transform_0(%arg0: i32) -> (i32, i32, i32, i32, i32) {
    %c0_i32 = arith.constant 0 : i32
    %c0_i32_0 = arith.constant 0 : i32
    %c0_i32_1 = arith.constant 0 : i32
    %c0_i32_2 = arith.constant 0 : i32
    %c0_i32_3 = arith.constant 0 : i32
    return %arg0, %c0_i32, %c0_i32_0, %c0_i32_1, %c0_i32_2 : i32, i32, i32, i32, i32
  }
  func.func @transform_1(%arg0: i32) -> (i32, i32, i32, i32) {
    %c0_i32 = arith.constant 0 : i32
    %c0_i32_0 = arith.constant 0 : i32
    %c0_i32_1 = arith.constant 0 : i32
    %c0_i32_2 = arith.constant 0 : i32
    return %arg0, %c0_i32, %c0_i32_0, %c0_i32_1 : i32, i32, i32, i32
  }
}

module attributes {stable_mosaic.version = 11 : i64} {
  func.func @_gemm_bias_act_kernel(%arg0: i32, %arg1: i32, %arg2: memref<32x64xbf16, #tpu.memory_space<vmem>>, %arg3: memref<64x128xbf16, #tpu.memory_space<vmem>>, %arg4: memref<1x128xf32, #tpu.memory_space<vmem>>, %arg5: memref<32x128xbf16, #tpu.memory_space<vmem>>) attributes {dimension_semantics = [#tpu.dimension_semantics<parallel>, #tpu.dimension_semantics<parallel>], iteration_bounds = array<i64: 1, 1>, scalar_prefetch = 0 : i64, scratch_operands = 0 : i64, tpu.core_type = #tpu.core_type<tc>, window_params = [{transform_indices = @transform_0, window_bounds = array<i64: 32, 64>}, {transform_indices = @transform_1, window_bounds = array<i64: 64, 128>}, {transform_indices = @transform_2, window_bounds = array<i64: 1, 128>}, {transform_indices = @transform_3, window_bounds = array<i64: 32, 128>}]} {
    %c0 = arith.constant 0 : index
    %c0_0 = arith.constant 0 : index
    %0 = vector.load %arg2[%c0, %c0_0] : memref<32x64xbf16, #tpu.memory_space<vmem>>, vector<32x64xbf16>
    %c0_1 = arith.constant 0 : index
    %c0_2 = arith.constant 0 : index
    %1 = vector.load %arg3[%c0_1, %c0_2] : memref<64x128xbf16, #tpu.memory_space<vmem>>, vector<64x128xbf16>
    %cst = arith.constant dense<0.000000e+00> : vector<32x128xf32>
    %2 = tpu.matmul %0, %1, %cst {dimension_numbers = #tpu.dot_dimension_numbers<[1], [0], [0], [1], [0, 0, 1, 1], [], []>} : vector<32x64xbf16>, vector<64x128xbf16>, vector<32x128xf32> -> vector<32x128xf32>
    %c0_3 = arith.constant 0 : index
    %c0_4 = arith.constant 0 : index
    %3 = vector.load %arg4[%c0_3, %c0_4] : memref<1x128xf32, #tpu.memory_space<vmem>>, vector<1x128xf32>
    %4 = vector.broadcast %3 : vector<1x128xf32> to vector<32x128xf32>
    %5 = arith.addf %2, %4 : vector<32x128xf32>
    %cst_5 = arith.constant 0.000000e+00 : f32
    %6 = vector.broadcast %cst_5 : f32 to vector<32x128xf32>
    %7 = arith.maximumf %5, %6 : vector<32x128xf32>
    %8 = arith.truncf %7 : vector<32x128xf32> to vector<32x128xbf16>
    %c0_6 = arith.constant 0 : index
    %c0_7 = arith.constant 0 : index
    %9 = vector.load %arg5[%c0_6, %c0_7] : memref<32x128xbf16, #tpu.memory_space<vmem>>, vector<32x128xbf16>
    tpu.vector_store %arg5[%c0_6, %c0_7], %8 {strides = array<i32>} : memref<32x128xbf16, #tpu.memory_space<vmem>>, vector<32x128xbf16>,
    return
  }
  func.func @transform_0(%arg0: i32, %arg1: i32) -> (i32, i32) {
    %c0_i32 = arith.constant 0 : i32
    %c0_i32_0 = arith.constant 0 : i32
    return %arg0, %c0_i32 : i32, i32
  }
  func.func @transform_1(%arg0: i32, %arg1: i32) -> (i32, i32) {
    %c0_i32 = arith.constant 0 : i32
    %c0_i32_0 = arith.constant 0 : i32
    return %c0_i32, %arg1 : i32, i32
  }
  func.func @transform_2(%arg0: i32, %arg1: i32) -> (i32, i32) {
    %c0_i32 = arith.constant 0 : i32
    %c0_i32_0 = arith.constant 0 : i32
    return %c0_i32, %arg1 : i32, i32
  }
  func.func @transform_3(%arg0: i32, %arg1: i32) -> (i32, i32) {
    %c0_i32 = arith.constant 0 : i32
    return %arg0, %arg1 : i32, i32
  }
}

module attributes {stable_mosaic.version = 11 : i64} {
  func.func @_gemm_dual_bias_relu_kernel(%arg0: i32, %arg1: i32, %arg2: memref<32x128xbf16, #tpu.memory_space<vmem>>, %arg3: memref<128x256xbf16, #tpu.memory_space<vmem>>, %arg4: memref<32x64xbf16, #tpu.memory_space<vmem>>, %arg5: memref<64x256xbf16, #tpu.memory_space<vmem>>, %arg6: memref<1x256xf32, #tpu.memory_space<vmem>>, %arg7: memref<32x256xbf16, #tpu.memory_space<vmem>>) attributes {dimension_semantics = [#tpu.dimension_semantics<parallel>, #tpu.dimension_semantics<parallel>], iteration_bounds = array<i64: 1, 1>, scalar_prefetch = 0 : i64, scratch_operands = 0 : i64, tpu.core_type = #tpu.core_type<tc>, window_params = [{transform_indices = @transform_0, window_bounds = array<i64: 32, 128>}, {transform_indices = @transform_1, window_bounds = array<i64: 128, 256>}, {transform_indices = @transform_2, window_bounds = array<i64: 32, 64>}, {transform_indices = @transform_3, window_bounds = array<i64: 64, 256>}, {transform_indices = @transform_4, window_bounds = array<i64: 1, 256>}, {transform_indices = @transform_5, window_bounds = array<i64: 32, 256>}]} {
    %c0 = arith.constant 0 : index
    %c0_0 = arith.constant 0 : index
    %0 = vector.load %arg2[%c0, %c0_0] : memref<32x128xbf16, #tpu.memory_space<vmem>>, vector<32x128xbf16>
    %c0_1 = arith.constant 0 : index
    %c0_2 = arith.constant 0 : index
    %1 = vector.load %arg3[%c0_1, %c0_2] : memref<128x256xbf16, #tpu.memory_space<vmem>>, vector<128x256xbf16>
    %cst = arith.constant dense<0.000000e+00> : vector<32x256xf32>
    %2 = tpu.matmul %0, %1, %cst {dimension_numbers = #tpu.dot_dimension_numbers<[1], [0], [0], [1], [0, 0, 1, 1], [], []>} : vector<32x128xbf16>, vector<128x256xbf16>, vector<32x256xf32> -> vector<32x256xf32>
    %c0_3 = arith.constant 0 : index
    %c0_4 = arith.constant 0 : index
    %3 = vector.load %arg4[%c0_3, %c0_4] : memref<32x64xbf16, #tpu.memory_space<vmem>>, vector<32x64xbf16>
    %c0_5 = arith.constant 0 : index
    %c0_6 = arith.constant 0 : index
    %4 = vector.load %arg5[%c0_5, %c0_6] : memref<64x256xbf16, #tpu.memory_space<vmem>>, vector<64x256xbf16>
    %cst_7 = arith.constant dense<0.000000e+00> : vector<32x256xf32>
    %5 = tpu.matmul %3, %4, %cst_7 {dimension_numbers = #tpu.dot_dimension_numbers<[1], [0], [0], [1], [0, 0, 1, 1], [], []>} : vector<32x64xbf16>, vector<64x256xbf16>, vector<32x256xf32> -> vector<32x256xf32>
    %6 = arith.addf %2, %5 : vector<32x256xf32>
    %c0_8 = arith.constant 0 : index
    %c0_9 = arith.constant 0 : index
    %7 = vector.load %arg6[%c0_8, %c0_9] : memref<1x256xf32, #tpu.memory_space<vmem>>, vector<1x256xf32>
    %8 = vector.broadcast %7 : vector<1x256xf32> to vector<32x256xf32>
    %9 = arith.addf %6, %8 : vector<32x256xf32>
    %cst_10 = arith.constant 0.000000e+00 : f32
    %10 = vector.broadcast %cst_10 : f32 to vector<32x256xf32>
    %11 = arith.maximumf %9, %10 : vector<32x256xf32>
    %12 = arith.truncf %11 : vector<32x256xf32> to vector<32x256xbf16>
    %c0_11 = arith.constant 0 : index
    %c0_12 = arith.constant 0 : index
    %13 = vector.load %arg7[%c0_11, %c0_12] : memref<32x256xbf16, #tpu.memory_space<vmem>>, vector<32x256xbf16>
    tpu.vector_store %arg7[%c0_11, %c0_12], %12 {strides = array<i32>} : memref<32x256xbf16, #tpu.memory_space<vmem>>, vector<32x256xbf16>,
    return
  }
  func.func @transform_0(%arg0: i32, %arg1: i32) -> (i32, i32) {
    %c0_i32 = arith.constant 0 : i32
    %c0_i32_0 = arith.constant 0 : i32
    return %arg0, %c0_i32 : i32, i32
  }
  func.func @transform_1(%arg0: i32, %arg1: i32) -> (i32, i32) {
    %c0_i32 = arith.constant 0 : i32
    %c0_i32_0 = arith.constant 0 : i32
    return %c0_i32, %arg1 : i32, i32
  }
  func.func @transform_2(%arg0: i32, %arg1: i32) -> (i32, i32) {
    %c0_i32 = arith.constant 0 : i32
    %c0_i32_0 = arith.constant 0 : i32
    return %arg0, %c0_i32 : i32, i32
  }
  func.func @transform_3(%arg0: i32, %arg1: i32) -> (i32, i32) {
    %c0_i32 = arith.constant 0 : i32
    %c0_i32_0 = arith.constant 0 : i32
    return %c0_i32, %arg1 : i32, i32
  }
  func.func @transform_4(%arg0: i32, %arg1: i32) -> (i32, i32) {
    %c0_i32 = arith.constant 0 : i32
    %c0_i32_0 = arith.constant 0 : i32
    return %c0_i32, %arg1 : i32, i32
  }
  func.func @transform_5(%arg0: i32, %arg1: i32) -> (i32, i32) {
    %c0_i32 = arith.constant 0 : i32
    return %arg0, %arg1 : i32, i32
  }
}

module attributes {stable_mosaic.version = 11 : i64} {
  func.func @_conv3x3_bias_relu_kernel(%arg0: i32, %arg1: memref<1x42x128xbf16, #tpu.memory_space<vmem>>, %arg2: memref<3x3x128x128xbf16, #tpu.memory_space<vmem>>, %arg3: memref<1x128xf32, #tpu.memory_space<vmem>>, %arg4: memref<1x4x4x128xbf16, #tpu.memory_space<vmem>>, %arg5: memref<24x128xf32, #tpu.memory_space<vmem>>) attributes {dimension_semantics = [#tpu.dimension_semantics<parallel>], iteration_bounds = array<i64: 2>, scalar_prefetch = 0 : i64, scratch_operands = 1 : i64, tpu.core_type = #tpu.core_type<tc>, window_params = [{transform_indices = @transform_0, window_bounds = array<i64: 1, 42, 128>}, {pipeline_mode = #tpu.pipeline_mode<synchronous>, transform_indices = @transform_1, window_bounds = array<i64: 3, 3, 128, 128>}, {pipeline_mode = #tpu.pipeline_mode<synchronous>, transform_indices = @transform_2, window_bounds = array<i64: 1, 128>}, {transform_indices = @transform_3, window_bounds = array<i64: 1, 4, 4, 128>}]} {
    %c0 = arith.constant 0 : index
    %c0_0 = arith.constant 0 : index
    %c0_1 = arith.constant 0 : index
    %0 = vector.load %arg1[%c0, %c0_0, %c0_1] : memref<1x42x128xbf16, #tpu.memory_space<vmem>>, vector<1x24x128xbf16>
    %1 = vector.shape_cast %0 : vector<1x24x128xbf16> to vector<24x128xbf16>
    %c0_2 = arith.constant 0 : index
    %c0_3 = arith.constant 0 : index
    %c0_4 = arith.constant 0 : index
    %c0_5 = arith.constant 0 : index
    %2 = vector.load %arg2[%c0_2, %c0_3, %c0_4, %c0_5] : memref<3x3x128x128xbf16, #tpu.memory_space<vmem>>, vector<1x1x128x128xbf16>
    %3 = vector.shape_cast %2 : vector<1x1x128x128xbf16> to vector<128x128xbf16>
    %cst = arith.constant dense<0.000000e+00> : vector<24x128xf32>
    %4 = tpu.matmul %1, %3, %cst {dimension_numbers = #tpu.dot_dimension_numbers<[1], [0], [0], [1], [0, 0, 1, 1], [], []>} : vector<24x128xbf16>, vector<128x128xbf16>, vector<24x128xf32> -> vector<24x128xf32>
    %c0_6 = arith.constant 0 : index
    %c0_7 = arith.constant 0 : index
    %5 = vector.load %arg5[%c0_6, %c0_7] : memref<24x128xf32, #tpu.memory_space<vmem>>, vector<24x128xf32>
    tpu.vector_store %arg5[%c0_6, %c0_7], %4 {strides = array<i32>} : memref<24x128xf32, #tpu.memory_space<vmem>>, vector<24x128xf32>,
    %c0_8 = arith.constant 0 : index
    %c0_9 = arith.constant 0 : index
    %6 = vector.load %arg5[%c0_8, %c0_9] : memref<24x128xf32, #tpu.memory_space<vmem>>, vector<24x128xf32>
    %c0_10 = arith.constant 0 : index
    %c1 = arith.constant 1 : index
    %c0_11 = arith.constant 0 : index
    %7 = vector.load %arg1[%c0_10, %c1, %c0_11] : memref<1x42x128xbf16, #tpu.memory_space<vmem>>, vector<1x24x128xbf16>
    %8 = vector.shape_cast %7 : vector<1x24x128xbf16> to vector<24x128xbf16>
    %c0_12 = arith.constant 0 : index
    %c1_13 = arith.constant 1 : index
    %c0_14 = arith.constant 0 : index
    %c0_15 = arith.constant 0 : index
    %9 = vector.load %arg2[%c0_12, %c1_13, %c0_14, %c0_15] : memref<3x3x128x128xbf16, #tpu.memory_space<vmem>>, vector<1x1x128x128xbf16>
    %10 = vector.shape_cast %9 : vector<1x1x128x128xbf16> to vector<128x128xbf16>
    %cst_16 = arith.constant dense<0.000000e+00> : vector<24x128xf32>
    %11 = tpu.matmul %8, %10, %cst_16 {dimension_numbers = #tpu.dot_dimension_numbers<[1], [0], [0], [1], [0, 0, 1, 1], [], []>} : vector<24x128xbf16>, vector<128x128xbf16>, vector<24x128xf32> -> vector<24x128xf32>
    %12 = arith.addf %6, %11 : vector<24x128xf32>
    %c0_17 = arith.constant 0 : index
    %c0_18 = arith.constant 0 : index
    %13 = vector.load %arg5[%c0_17, %c0_18] : memref<24x128xf32, #tpu.memory_space<vmem>>, vector<24x128xf32>
    tpu.vector_store %arg5[%c0_17, %c0_18], %12 {strides = array<i32>} : memref<24x128xf32, #tpu.memory_space<vmem>>, vector<24x128xf32>,
    %c0_19 = arith.constant 0 : index
    %c0_20 = arith.constant 0 : index
    %14 = vector.load %arg5[%c0_19, %c0_20] : memref<24x128xf32, #tpu.memory_space<vmem>>, vector<24x128xf32>
    %c0_21 = arith.constant 0 : index
    %c2 = arith.constant 2 : index
    %c0_22 = arith.constant 0 : index
    %15 = vector.load %arg1[%c0_21, %c2, %c0_22] : memref<1x42x128xbf16, #tpu.memory_space<vmem>>, vector<1x24x128xbf16>
    %16 = vector.shape_cast %15 : vector<1x24x128xbf16> to vector<24x128xbf16>
    %c0_23 = arith.constant 0 : index
    %c2_24 = arith.constant 2 : index
    %c0_25 = arith.constant 0 : index
    %c0_26 = arith.constant 0 : index
    %17 = vector.load %arg2[%c0_23, %c2_24, %c0_25, %c0_26] : memref<3x3x128x128xbf16, #tpu.memory_space<vmem>>, vector<1x1x128x128xbf16>
    %18 = vector.shape_cast %17 : vector<1x1x128x128xbf16> to vector<128x128xbf16>
    %cst_27 = arith.constant dense<0.000000e+00> : vector<24x128xf32>
    %19 = tpu.matmul %16, %18, %cst_27 {dimension_numbers = #tpu.dot_dimension_numbers<[1], [0], [0], [1], [0, 0, 1, 1], [], []>} : vector<24x128xbf16>, vector<128x128xbf16>, vector<24x128xf32> -> vector<24x128xf32>
    %20 = arith.addf %14, %19 : vector<24x128xf32>
    %c0_28 = arith.constant 0 : index
    %c0_29 = arith.constant 0 : index
    %21 = vector.load %arg5[%c0_28, %c0_29] : memref<24x128xf32, #tpu.memory_space<vmem>>, vector<24x128xf32>
    tpu.vector_store %arg5[%c0_28, %c0_29], %20 {strides = array<i32>} : memref<24x128xf32, #tpu.memory_space<vmem>>, vector<24x128xf32>,
    %c0_30 = arith.constant 0 : index
    %c0_31 = arith.constant 0 : index
    %22 = vector.load %arg5[%c0_30, %c0_31] : memref<24x128xf32, #tpu.memory_space<vmem>>, vector<24x128xf32>
    %c0_32 = arith.constant 0 : index
    %c6 = arith.constant 6 : index
    %c0_33 = arith.constant 0 : index
    %23 = vector.load %arg1[%c0_32, %c6, %c0_33] : memref<1x42x128xbf16, #tpu.memory_space<vmem>>, vector<1x24x128xbf16>
    %24 = vector.shape_cast %23 : vector<1x24x128xbf16> to vector<24x128xbf16>
    %c1_34 = arith.constant 1 : index
    %c0_35 = arith.constant 0 : index
    %c0_36 = arith.constant 0 : index
    %c0_37 = arith.constant 0 : index
    %25 = vector.load %arg2[%c1_34, %c0_35, %c0_36, %c0_37] : memref<3x3x128x128xbf16, #tpu.memory_space<vmem>>, vector<1x1x128x128xbf16>
    %26 = vector.shape_cast %25 : vector<1x1x128x128xbf16> to vector<128x128xbf16>
    %cst_38 = arith.constant dense<0.000000e+00> : vector<24x128xf32>
    %27 = tpu.matmul %24, %26, %cst_38 {dimension_numbers = #tpu.dot_dimension_numbers<[1], [0], [0], [1], [0, 0, 1, 1], [], []>} : vector<24x128xbf16>, vector<128x128xbf16>, vector<24x128xf32> -> vector<24x128xf32>
    %28 = arith.addf %22, %27 : vector<24x128xf32>
    %c0_39 = arith.constant 0 : index
    %c0_40 = arith.constant 0 : index
    %29 = vector.load %arg5[%c0_39, %c0_40] : memref<24x128xf32, #tpu.memory_space<vmem>>, vector<24x128xf32>
    tpu.vector_store %arg5[%c0_39, %c0_40], %28 {strides = array<i32>} : memref<24x128xf32, #tpu.memory_space<vmem>>, vector<24x128xf32>,
    %c0_41 = arith.constant 0 : index
    %c0_42 = arith.constant 0 : index
    %30 = vector.load %arg5[%c0_41, %c0_42] : memref<24x128xf32, #tpu.memory_space<vmem>>, vector<24x128xf32>
    %c0_43 = arith.constant 0 : index
    %c7 = arith.constant 7 : index
    %c0_44 = arith.constant 0 : index
    %31 = vector.load %arg1[%c0_43, %c7, %c0_44] : memref<1x42x128xbf16, #tpu.memory_space<vmem>>, vector<1x24x128xbf16>
    %32 = vector.shape_cast %31 : vector<1x24x128xbf16> to vector<24x128xbf16>
    %c1_45 = arith.constant 1 : index
    %c1_46 = arith.constant 1 : index
    %c0_47 = arith.constant 0 : index
    %c0_48 = arith.constant 0 : index
    %33 = vector.load %arg2[%c1_45, %c1_46, %c0_47, %c0_48] : memref<3x3x128x128xbf16, #tpu.memory_space<vmem>>, vector<1x1x128x128xbf16>
    %34 = vector.shape_cast %33 : vector<1x1x128x128xbf16> to vector<128x128xbf16>
    %cst_49 = arith.constant dense<0.000000e+00> : vector<24x128xf32>
    %35 = tpu.matmul %32, %34, %cst_49 {dimension_numbers = #tpu.dot_dimension_numbers<[1], [0], [0], [1], [0, 0, 1, 1], [], []>} : vector<24x128xbf16>, vector<128x128xbf16>, vector<24x128xf32> -> vector<24x128xf32>
    %36 = arith.addf %30, %35 : vector<24x128xf32>
    %c0_50 = arith.constant 0 : index
    %c0_51 = arith.constant 0 : index
    %37 = vector.load %arg5[%c0_50, %c0_51] : memref<24x128xf32, #tpu.memory_space<vmem>>, vector<24x128xf32>
    tpu.vector_store %arg5[%c0_50, %c0_51], %36 {strides = array<i32>} : memref<24x128xf32, #tpu.memory_space<vmem>>, vector<24x128xf32>,
    %c0_52 = arith.constant 0 : index
    %c0_53 = arith.constant 0 : index
    %38 = vector.load %arg5[%c0_52, %c0_53] : memref<24x128xf32, #tpu.memory_space<vmem>>, vector<24x128xf32>
    %c0_54 = arith.constant 0 : index
    %c8 = arith.constant 8 : index
    %c0_55 = arith.constant 0 : index
    %39 = vector.load %arg1[%c0_54, %c8, %c0_55] : memref<1x42x128xbf16, #tpu.memory_space<vmem>>, vector<1x24x128xbf16>
    %40 = vector.shape_cast %39 : vector<1x24x128xbf16> to vector<24x128xbf16>
    %c1_56 = arith.constant 1 : index
    %c2_57 = arith.constant 2 : index
    %c0_58 = arith.constant 0 : index
    %c0_59 = arith.constant 0 : index
    %41 = vector.load %arg2[%c1_56, %c2_57, %c0_58, %c0_59] : memref<3x3x128x128xbf16, #tpu.memory_space<vmem>>, vector<1x1x128x128xbf16>
    %42 = vector.shape_cast %41 : vector<1x1x128x128xbf16> to vector<128x128xbf16>
    %cst_60 = arith.constant dense<0.000000e+00> : vector<24x128xf32>
    %43 = tpu.matmul %40, %42, %cst_60 {dimension_numbers = #tpu.dot_dimension_numbers<[1], [0], [0], [1], [0, 0, 1, 1], [], []>} : vector<24x128xbf16>, vector<128x128xbf16>, vector<24x128xf32> -> vector<24x128xf32>
    %44 = arith.addf %38, %43 : vector<24x128xf32>
    %c0_61 = arith.constant 0 : index
    %c0_62 = arith.constant 0 : index
    %45 = vector.load %arg5[%c0_61, %c0_62] : memref<24x128xf32, #tpu.memory_space<vmem>>, vector<24x128xf32>
    tpu.vector_store %arg5[%c0_61, %c0_62], %44 {strides = array<i32>} : memref<24x128xf32, #tpu.memory_space<vmem>>, vector<24x128xf32>,
    %c0_63 = arith.constant 0 : index
    %c0_64 = arith.constant 0 : index
    %46 = vector.load %arg5[%c0_63, %c0_64] : memref<24x128xf32, #tpu.memory_space<vmem>>, vector<24x128xf32>
    %c0_65 = arith.constant 0 : index
    %c12 = arith.constant 12 : index
    %c0_66 = arith.constant 0 : index
    %47 = vector.load %arg1[%c0_65, %c12, %c0_66] : memref<1x42x128xbf16, #tpu.memory_space<vmem>>, vector<1x24x128xbf16>
    %48 = vector.shape_cast %47 : vector<1x24x128xbf16> to vector<24x128xbf16>
    %c2_67 = arith.constant 2 : index
    %c0_68 = arith.constant 0 : index
    %c0_69 = arith.constant 0 : index
    %c0_70 = arith.constant 0 : index
    %49 = vector.load %arg2[%c2_67, %c0_68, %c0_69, %c0_70] : memref<3x3x128x128xbf16, #tpu.memory_space<vmem>>, vector<1x1x128x128xbf16>
    %50 = vector.shape_cast %49 : vector<1x1x128x128xbf16> to vector<128x128xbf16>
    %cst_71 = arith.constant dense<0.000000e+00> : vector<24x128xf32>
    %51 = tpu.matmul %48, %50, %cst_71 {dimension_numbers = #tpu.dot_dimension_numbers<[1], [0], [0], [1], [0, 0, 1, 1], [], []>} : vector<24x128xbf16>, vector<128x128xbf16>, vector<24x128xf32> -> vector<24x128xf32>
    %52 = arith.addf %46, %51 : vector<24x128xf32>
    %c0_72 = arith.constant 0 : index
    %c0_73 = arith.constant 0 : index
    %53 = vector.load %arg5[%c0_72, %c0_73] : memref<24x128xf32, #tpu.memory_space<vmem>>, vector<24x128xf32>
    tpu.vector_store %arg5[%c0_72, %c0_73], %52 {strides = array<i32>} : memref<24x128xf32, #tpu.memory_space<vmem>>, vector<24x128xf32>,
    %c0_74 = arith.constant 0 : index
    %c0_75 = arith.constant 0 : index
    %54 = vector.load %arg5[%c0_74, %c0_75] : memref<24x128xf32, #tpu.memory_space<vmem>>, vector<24x128xf32>
    %c0_76 = arith.constant 0 : index
    %c13 = arith.constant 13 : index
    %c0_77 = arith.constant 0 : index
    %55 = vector.load %arg1[%c0_76, %c13, %c0_77] : memref<1x42x128xbf16, #tpu.memory_space<vmem>>, vector<1x24x128xbf16>
    %56 = vector.shape_cast %55 : vector<1x24x128xbf16> to vector<24x128xbf16>
    %c2_78 = arith.constant 2 : index
    %c1_79 = arith.constant 1 : index
    %c0_80 = arith.constant 0 : index
    %c0_81 = arith.constant 0 : index
    %57 = vector.load %arg2[%c2_78, %c1_79, %c0_80, %c0_81] : memref<3x3x128x128xbf16, #tpu.memory_space<vmem>>, vector<1x1x128x128xbf16>
    %58 = vector.shape_cast %57 : vector<1x1x128x128xbf16> to vector<128x128xbf16>
    %cst_82 = arith.constant dense<0.000000e+00> : vector<24x128xf32>
    %59 = tpu.matmul %56, %58, %cst_82 {dimension_numbers = #tpu.dot_dimension_numbers<[1], [0], [0], [1], [0, 0, 1, 1], [], []>} : vector<24x128xbf16>, vector<128x128xbf16>, vector<24x128xf32> -> vector<24x128xf32>
    %60 = arith.addf %54, %59 : vector<24x128xf32>
    %c0_83 = arith.constant 0 : index
    %c0_84 = arith.constant 0 : index
    %61 = vector.load %arg5[%c0_83, %c0_84] : memref<24x128xf32, #tpu.memory_space<vmem>>, vector<24x128xf32>
    tpu.vector_store %arg5[%c0_83, %c0_84], %60 {strides = array<i32>} : memref<24x128xf32, #tpu.memory_space<vmem>>, vector<24x128xf32>,
    %c0_85 = arith.constant 0 : index
    %c0_86 = arith.constant 0 : index
    %62 = vector.load %arg5[%c0_85, %c0_86] : memref<24x128xf32, #tpu.memory_space<vmem>>, vector<24x128xf32>
    %c0_87 = arith.constant 0 : index
    %c14 = arith.constant 14 : index
    %c0_88 = arith.constant 0 : index
    %63 = vector.load %arg1[%c0_87, %c14, %c0_88] : memref<1x42x128xbf16, #tpu.memory_space<vmem>>, vector<1x24x128xbf16>
    %64 = vector.shape_cast %63 : vector<1x24x128xbf16> to vector<24x128xbf16>
    %c2_89 = arith.constant 2 : index
    %c2_90 = arith.constant 2 : index
    %c0_91 = arith.constant 0 : index
    %c0_92 = arith.constant 0 : index
    %65 = vector.load %arg2[%c2_89, %c2_90, %c0_91, %c0_92] : memref<3x3x128x128xbf16, #tpu.memory_space<vmem>>, vector<1x1x128x128xbf16>
    %66 = vector.shape_cast %65 : vector<1x1x128x128xbf16> to vector<128x128xbf16>
    %cst_93 = arith.constant dense<0.000000e+00> : vector<24x128xf32>
    %67 = tpu.matmul %64, %66, %cst_93 {dimension_numbers = #tpu.dot_dimension_numbers<[1], [0], [0], [1], [0, 0, 1, 1], [], []>} : vector<24x128xbf16>, vector<128x128xbf16>, vector<24x128xf32> -> vector<24x128xf32>
    %68 = arith.addf %62, %67 : vector<24x128xf32>
    %c0_94 = arith.constant 0 : index
    %c0_95 = arith.constant 0 : index
    %69 = vector.load %arg5[%c0_94, %c0_95] : memref<24x128xf32, #tpu.memory_space<vmem>>, vector<24x128xf32>
    tpu.vector_store %arg5[%c0_94, %c0_95], %68 {strides = array<i32>} : memref<24x128xf32, #tpu.memory_space<vmem>>, vector<24x128xf32>,
    %c0_96 = arith.constant 0 : index
    %c0_97 = arith.constant 0 : index
    %70 = vector.load %arg3[%c0_96, %c0_97] : memref<1x128xf32, #tpu.memory_space<vmem>>, vector<1x128xf32>
    %c0_i32 = arith.constant 0 : i32
    %c4_i32 = arith.constant 4 : i32
    %71 = arith.addi %c0_i32, %c4_i32 : i32
    %c1_i32 = arith.constant 1 : i32
    scf.for %arg6 = %c0_i32 to %71 step %c1_i32  : i32 {
      %c6_i32 = arith.constant 6 : i32
      %72 = arith.muli %arg6, %c6_i32 : i32
      %73 = arith.index_cast %72 : i32 to index
      %c0_99 = arith.constant 0 : index
      %74 = vector.load %arg5[%73, %c0_99] : memref<24x128xf32, #tpu.memory_space<vmem>>, vector<4x128xf32>
      %75 = vector.broadcast %70 : vector<1x128xf32> to vector<4x128xf32>
      %76 = arith.addf %74, %75 : vector<4x128xf32>
      %cst_100 = arith.constant 0.000000e+00 : f32
      %77 = vector.broadcast %cst_100 : f32 to vector<4x128xf32>
      %78 = arith.maximumf %76, %77 : vector<4x128xf32>
      %79 = arith.truncf %78 : vector<4x128xf32> to vector<4x128xbf16>
      %c0_101 = arith.constant 0 : index
      %80 = arith.index_cast %arg6 : i32 to index
      %c0_102 = arith.constant 0 : index
      %c0_103 = arith.constant 0 : index
      %81 = vector.load %arg4[%c0_101, %80, %c0_102, %c0_103] : memref<1x4x4x128xbf16, #tpu.memory_space<vmem>>, vector<1x1x4x128xbf16>
      %82 = vector.shape_cast %81 : vector<1x1x4x128xbf16> to vector<4x128xbf16>
      %83 = vector.shape_cast %79 : vector<4x128xbf16> to vector<1x1x4x128xbf16>
      tpu.vector_store %arg4[%c0_101, %80, %c0_102, %c0_103], %83 {strides = array<i32>} : memref<1x4x4x128xbf16, #tpu.memory_space<vmem>>, vector<1x1x4x128xbf16>,
    }
    %c4_i32_98 = arith.constant 4 : i32
    return
  }
  func.func @transform_0(%arg0: i32) -> (i32, i32, i32) {
    %c0_i32 = arith.constant 0 : i32
    %c0_i32_0 = arith.constant 0 : i32
    %c0_i32_1 = arith.constant 0 : i32
    return %arg0, %c0_i32, %c0_i32_0 : i32, i32, i32
  }
  func.func @transform_1(%arg0: i32) -> (i32, i32, i32, i32) {
    %c0_i32 = arith.constant 0 : i32
    %c0_i32_0 = arith.constant 0 : i32
    %c0_i32_1 = arith.constant 0 : i32
    %c0_i32_2 = arith.constant 0 : i32
    %c0_i32_3 = arith.constant 0 : i32
    return %c0_i32, %c0_i32_0, %c0_i32_1, %c0_i32_2 : i32, i32, i32, i32
  }
  func.func @transform_2(%arg0: i32) -> (i32, i32) {
    %c0_i32 = arith.constant 0 : i32
    %c0_i32_0 = arith.constant 0 : i32
    %c0_i32_1 = arith.constant 0 : i32
    return %c0_i32, %c0_i32_0 : i32, i32
  }
  func.func @transform_3(%arg0: i32) -> (i32, i32, i32, i32) {
    %c0_i32 = arith.constant 0 : i32
    %c0_i32_0 = arith.constant 0 : i32
    %c0_i32_1 = arith.constant 0 : i32
    %c0_i32_2 = arith.constant 0 : i32
    return %arg0, %c0_i32, %c0_i32_0, %c0_i32_1 : i32, i32, i32, i32
  }
}

module attributes {stable_mosaic.version = 11 : i64} {
  func.func @_avgpool_channelpool_kernel(%arg0: i32, %arg1: memref<2x16x256xbf16, #tpu.memory_space<vmem>>, %arg2: memref<256x64xf32, #tpu.memory_space<vmem>>, %arg3: memref<2x64xf32, #tpu.memory_space<vmem>>) attributes {dimension_semantics = [#tpu.dimension_semantics<parallel>], iteration_bounds = array<i64: 1>, scalar_prefetch = 0 : i64, scratch_operands = 0 : i64, tpu.core_type = #tpu.core_type<tc>, window_params = [{transform_indices = @transform_0, window_bounds = array<i64: 2, 16, 256>}, {pipeline_mode = #tpu.pipeline_mode<synchronous>, transform_indices = @transform_1, window_bounds = array<i64: 256, 64>}, {transform_indices = @transform_2, window_bounds = array<i64: 2, 64>}]} {
    %c0 = arith.constant 0 : index
    %c0_0 = arith.constant 0 : index
    %c0_1 = arith.constant 0 : index
    %0 = vector.load %arg1[%c0, %c0_0, %c0_1] : memref<2x16x256xbf16, #tpu.memory_space<vmem>>, vector<2x16x256xbf16>
    %1 = arith.extf %0 : vector<2x16x256xbf16> to vector<2x16x256xf32>
    %cst = arith.constant dense<0.000000e+00> : vector<2x256xf32>
    %2 = vector.multi_reduction <add>, %1, %cst [1] : vector<2x16x256xf32> to vector<2x256xf32>
    %cst_2 = arith.constant 1.600000e+01 : f32
    %3 = vector.broadcast %cst_2 : f32 to vector<2x256xf32>
    %4 = arith.divf %2, %3 : vector<2x256xf32>
    %c0_3 = arith.constant 0 : index
    %c0_4 = arith.constant 0 : index
    %5 = vector.load %arg2[%c0_3, %c0_4] : memref<256x64xf32, #tpu.memory_space<vmem>>, vector<256x64xf32>
    %cst_5 = arith.constant dense<0.000000e+00> : vector<2x64xf32>
    %6 = tpu.matmul %4, %5, %cst_5 {dimension_numbers = #tpu.dot_dimension_numbers<[1], [0], [0], [1], [0, 0, 1, 1], [], []>} : vector<2x256xf32>, vector<256x64xf32>, vector<2x64xf32> -> vector<2x64xf32>
    %c0_6 = arith.constant 0 : index
    %c0_7 = arith.constant 0 : index
    %7 = vector.load %arg3[%c0_6, %c0_7] : memref<2x64xf32, #tpu.memory_space<vmem>>, vector<2x64xf32>
    tpu.vector_store %arg3[%c0_6, %c0_7], %6 {strides = array<i32>} : memref<2x64xf32, #tpu.memory_space<vmem>>, vector<2x64xf32>,
    return
  }
  func.func @transform_0(%arg0: i32) -> (i32, i32, i32) {
    %c0_i32 = arith.constant 0 : i32
    %c0_i32_0 = arith.constant 0 : i32
    %c0_i32_1 = arith.constant 0 : i32
    return %arg0, %c0_i32, %c0_i32_0 : i32, i32, i32
  }
  func.func @transform_1(%arg0: i32) -> (i32, i32) {
    %c0_i32 = arith.constant 0 : i32
    %c0_i32_0 = arith.constant 0 : i32
    %c0_i32_1 = arith.constant 0 : i32
    return %c0_i32, %c0_i32_0 : i32, i32
  }
  func.func @transform_2(%arg0: i32) -> (i32, i32) {
    %c0_i32 = arith.constant 0 : i32
    %c0_i32_0 = arith.constant 0 : i32
    return %arg0, %c0_i32 : i32, i32
  }
}

</mosaic_0001>

<bundles_post_ra>
// kernel: img2vec_forward.7
= control target key start
LH: loop header
LB: loop body
LE: loop exit
PB: predicated region body
PF: predicated region fallthrough
CT: control target
= control target key end

     0   :  { %6 = vsyncpa [#allocation3], 0  ;;  %s885_s0 = inlined_call_operand.hbm [shape: bf16[2,5,2,5,128], index: 0, kind: input, shape index: {}]   ;;  %s886_s1 = inlined_call_operand.hbm [shape: bf16[2,4,4,64], index: 1, kind: output, shape index: {}]  }
   0x1   :  { %8 = vsyncpa [#allocation3 + $0x1], 0 }
   0x2   :  { %9 = vsyncpa [#allocation4], 0 }
   0x3   :  { %11 = vsyncpa [#allocation4 + $0x1], 0  ;;  %s650_s6 = smov 0   ;;  %s652_s7 = smov 0  }
   0x4   :  { %s654_s8 = smov 0   ;;  %s656_s9 = smov 0  }
   0x5 LB: > { %s671_s10 = sadd.s32 4294967295, %s631_s9   ;;  %s453_s11 = sadd.s32 4294967294, %s631_s9   ;;  %s631_s9 = sphi %s656_s9, %s898_s9   ;;  %s627_s8 = sphi %s654_s8, %s897_s8   ;;  %s623_s7 = sphi %s652_s7, %s896_s7   ;;  %s619_s6 = sphi %s650_s6, %s895_s6  }
   0x6   : > { %s675_s12 = sadd.s32 1, %s631_s9   ;;  %s24_s13 = sadd.s32 1, %s627_s8 }
   0x7   : > { %s21_s14 = ssub.s32 %s631_s9, %s675_s12  ;;  %p31_p0 = scmp.ne.s32.totalorder %s627_s8, %s623_s7 }
   0x8   : > { %p22_p1 = scmp.eq.s32.totalorder %s21_s14, 0  ;;  %p32_p2 = scmp.eq.s32.totalorder %s631_s9, 0 }
   0x9   : > { %p37_p3 = scmp.ne.s32.totalorder %s623_s7, %s619_s6  ;;  %p38_p4 = scmp.eq.s32.totalorder %s671_s10, 0 }
   0xa   : > { %s687_s15 = scalar_select %p22_p1, %s627_s8, %s24_s13  }
   0xb   : > { %p33_p5 = por %p32_p2, %p31_p0  ;;  %p689_p6 = por %p38_p4, %p37_p3 }
   0xc   : > { %p61_p7 = scmp.eq.s32.totalorder %s671_s10, 1  ;;  %p67_p8 = scmp.eq.s32.totalorder %s453_s11, 1 }
   0xd   : > { %p496_p10 = scmp.lt.s32.totalorder %s631_s9, 2  ;;  %s87_s19 = sand.u32 1, %s627_s8  }
   0xe   : > { %p696_p11 = por %p61_p7, %p31_p0  ;;  %p700_p12 = por %p67_p8, %p37_p3 }
   0xf   : > { %s482_s20 = smul.u32 640, %s631_s9  ;;  %p711_p13 = pnand %p496_p10, %p33_p5 }
  0x10   : > { %s889_s17 = scalar_select %p696_p11, 1, 0 }
  0x11   : > { %s890_s18 = scalar_select %p700_p12, 1, 0 }
  0x12   : > { %s481_s21 = smul.u32 40, %s87_s19  ;;  %s709_s24 = scalar_lea.hbm %s885_s0, %s482_s20 }
  0x13   : > { %s717_s28 = scalar_lea.sflag [#allocation3], %s87_s19  ;;  %s535_s29 = scalar_lea.hbm %s709_s24, 640 }
  0x14   : > { %s91_s26 = scalar_lea.vmem [#allocation2], %s481_s21  ;;  %p536_p0 = scmp.ne.s32.totalorder %s709_s24, %s535_s29 }
  0x15   : > { %s98_s27 = sshll.u32 %s91_s26, 4  ;;  %p537_p1 = pneg %p711_p13  ;;  %s715_s27 = int_to_ptr.vmem [resolvable:$true] %s98_s27 }
  0x16   : > { %s540_s3 = scalar_lea.hbm %s885_s0, 1280  ;;  %p541_p4 = scmp.lt.u32.totalorder %s709_s24, %s885_s0 }
  0x17   : > { %p538_p2 = pnand %p537_p1, %p536_p0  ;;  %p542_p5 = scmp.lt.u32.totalorder %s540_s3, %s535_s29 }
  0x18   : > { %p544_p8 = scmp.lt.u32.totalorder %s535_s29, %s709_s24 }
  0x19   : > { %p539_p3 = pneg %p538_p2  ;;  %p543_p7 = por %p542_p5, %p541_p4 }
  0x1b   : > { %p545_p10 = por %p544_p8, %p543_p7 }
  0x1d   : > { %p546_p9 = pnand %p545_p10, %p539_p3 }
  0x1f   : > { %549 = shalt.err (!%p546_p9)
}
  0x20   : > { %s550_s11 = scalar_lea.vmem %s715_s27, 640  ;;  %s633_s13 = smov [#allocation2]  }
  0x21   : > { %p551_p0 = scmp.ne.s32.totalorder %s715_s27, %s550_s11  ;;  %s555_s14 = sshll.u32 %s633_s13, 4  ;;  %s556_s14 = int_to_ptr.vmem [resolvable:$false] %s555_s14 }
  0x22   : > { %s557_s19 = scalar_lea.vmem %s556_s14, 1280  ;;  %p558_p11 = scmp.lt.s32.totalorder %s715_s27, %s556_s14 }
  0x23   : > { %p553_p2 = pnand %p551_p0, %p537_p1  ;;  %p559_p4 = scmp.lt.s32.totalorder %s557_s19, %s550_s11 }
  0x25   : > { %p554_p12 = pneg %p553_p2  ;;  %p560_p5 = por %p559_p4, %p558_p11 }
  0x27   : > { %p561_p7 = pnand %p560_p5, %p554_p12 }
  0x29   : > { %564 = shalt.err (!%p561_p7)
}
  0x2a   : > { %s634_s20 = smov 64   ;;  %s635_s21 = smov 4  }
  0x2b   : > { %491 = dma.hbm_to_vmem [thread:$0]  (!%p711_p13), %s709_s24, 640, %s715_s27, %s717_s28, %s634_s20, %s634_s20, %s635_s21  }
  0x2c   : > { %p457_p9 = scmp.ge.s32.totalorder %s631_s9, 1  ;;  %p106_p1 = scmp.lt.s32.totalorder %s631_s9, 3 }
  0x2e   : > { %p107_p3 = pnand %p457_p9, %p106_p1 }
  0x2f   : > { %s748_s22 = sand.u32 (!%p107_p3), 1, %s623_s7  }
  0x30   : > { %110 = sbr.rel (%p107_p3) target bundleno = 211 (0xd3), region = 24  ;;  %s113_s26 = scalar_lea.sflag (!%p107_p3), [#allocation3], %s748_s22 }
  0x31   : > { %s483_s23 = smul.u32 (!%p107_p3), 40, %s748_s22 }
  0x33   : > { %s752_s29 = scalar_lea.vmem (!%p107_p3), [#allocation2], %s483_s23 }
  0x37   : > { %610 = dma.done.wait (%p689_p6), %s113_s26, 640  }
  0x38   : > { %612 = vsyncadd (%p689_p6), %s113_s26, 4294966656  ;;  %v759_v0 = vld [vmem:[%s752_s29 + $0x10] sm:$0x3]  ;;  %v762_v1 = vld [vmem:[%s752_s29] sm:$0x3]  ;;  %s636_s24 = smov 64  }
  0x39   : > { %147 = vrot.lane.b32.xlu1 %v759_v0, %s636_s24  ;;  %143 = vrot.lane.b32.xlu0 %v762_v1, %s636_s24  ;;  %v767_v2 = vld [vmem:[%s752_s29 + $0x18] sm:$0x3]  ;;  %v770_v3 = vld [vmem:[%s752_s29 + $0x8] sm:$0x3]  ;;  %s458_s16 = sshll.u32 %s748_s22, 3  ;;  %vm361_vm0 = vcmask 517120  }
  0x3a   : > { %v775_v4 = vld [vmem:[%s752_s29 + $0xc] sm:$0x3]  ;;  %v778_v5 = vld [vmem:[%s752_s29 + $0x4] sm:$0x3]  ;;  %v783_v6 = vld [vmem:[%s752_s29 + $0x1c] sm:$0x3] }
  0x3b   : > { %v786_v7 = vld [vmem:[%s752_s29 + $0x14] sm:$0x3]  ;;  %v791_v8 = vld [vmem:[%s752_s29 + $0x10] sm:$0x3]  ;;  %v794_v9 = vld [vmem:[%s752_s29 + $0x8] sm:$0x3] }
  0x3c   : > { %v799_v10 = vld [vmem:[%s752_s29 + $0x20] sm:$0x3]  ;;  %v802_v11 = vld [vmem:[%s752_s29 + $0x18] sm:$0x3]  ;;  %v161_v13 = vld [vmem:[%s752_s29 + $0x10] sm:$0x7] }
  0x3d   : > { %149 = vrot.lane.b32.xlu1 %v767_v2, %s636_s24  ;;  %145 = vrot.lane.b32.xlu0 %v770_v3, %s636_s24  ;;  %v159_v12 = vld [vmem:[%s752_s29] sm:$0x7]  ;;  %v162_v16 = vld [vmem:[%s752_s29 + $0x18] sm:$0x7]  ;;  %v182_v18 = vshrl.u32 %v161_v13, 16  ;;  %v185_v19 = vshll.u32 %v161_v13, 16 }
  0x3e   : > { %v164_v14 = vshrl.u32 %v159_v12, 16  ;;  %v167_v15 = vshll.u32 %v159_v12, 16  ;;  %v160_v17 = vld [vmem:[%s752_s29 + $0x8] sm:$0x7]  ;;  %v191_v20 = vshrl.u32 %v162_v16, 16  ;;  %v194_v24 = vshll.u32 %v162_v16, 16 }
  0x3f   : > { %v463_v21 = vld [vmem:[%s752_s29 + $0x4] sm:$0x7]  ;;  %v173_v25 = vshrl.u32 %v160_v17, 16  ;;  %v176_v26 = vshll.u32 %v160_v17, 16  ;;  %v464_v27 = vld [vmem:[%s752_s29 + $0xc] sm:$0x7] }
  0x40   : > { %v166_v22 = vrot.slane %v164_v14, 4  ;;  %v169_v23 = vrot.slane %v167_v15, 5  ;;  %v241_v28 = vshrl.u32 %v463_v21, 16  ;;  %v244_v29 = vshll.u32 %v463_v21, 16  ;;  %v466_v30 = vld [vmem:[%s752_s29 + $0x1c] sm:$0x7] }
  0x41   : > { %222 = vrot.lane.b32.xlu1 %v775_v4, %s636_s24  ;;  %220 = vrot.lane.b32.xlu0 %v778_v5, %s636_s24  ;;  %v184_v31 = vrot.slane %v182_v18, 4  ;;  %v187_v32 = vrot.slane %v185_v19, 5  ;;  %v193_v33 = vrot.slane %v191_v20, 4  ;;  %v465_v34 = vld [vmem:[%s752_s29 + $0x14] sm:$0x7]  ;;  %v196_v36 = vrot.slane %v194_v24, 5 }
  0x42   : > { %v170_v35 = vor.u32 %v169_v23, %v166_v22  ;;  %v250_v37 = vshrl.u32 %v464_v27, 16  ;;  %v253_v38 = vshll.u32 %v464_v27, 16  ;;  %v175_v39 = vrot.slane %v173_v25, 4  ;;  %v472_v47 = vld [vmem:[%s752_s29 + $0x10] sm:$0x7]  ;;  %s134_s25 = scalar_lea.vmem [#allocation5], %s458_s16 }
  0x43   : > { %v178_v40 = vrot.slane %v176_v26, 5  ;;  %v268_v41 = vshrl.u32 %v466_v30, 16  ;;  %v271_v42 = vshll.u32 %v466_v30, 16  ;;  %v243_v43 = vrot.slane %v241_v28, 4  ;;  %v471_v53 = vld [vmem:[%s752_s29 + $0x8] sm:$0x7] }
  0x44   : > { %v246_v44 = vrot.slane %v244_v29, 5  ;;  %v259_v45 = vshrl.u32 %v465_v34, 16  ;;  %v262_v46 = vshll.u32 %v465_v34, 16  ;;  %v188_v48 = vor.u32 %v187_v32, %v184_v31  ;;  %v474_v18 = vld [vmem:[%s752_s29 + $0x20] sm:$0x7]  ;;  %s380_s27 = sshll.u32 %s134_s25, 4  ;;  %s832_s27 = int_to_ptr.vmem [resolvable:$true] %s380_s27 }
  0x45   : > { %226 = vrot.lane.b32.xlu1 %v783_v6, %s636_s24  ;;  %224 = vrot.lane.b32.xlu0 %v786_v7, %s636_s24  ;;  %v171_v49 = vrot.slane %v170_v35, 4  ;;  %v197_v50 = vor.u32 %v196_v36, %v193_v33  ;;  %v252_v51 = vrot.slane %v250_v37, 4  ;;  %v255_v52 = vrot.slane %v253_v38, 5  ;;  %v473_v23 = vld [vmem:[%s752_s29 + $0x18] sm:$0x7]  ;;  %s480_s28 = sshll.u32 %s671_s10, 7 }
  0x46   : > { %v179_v54 = vor.u32 %v178_v40, %v175_v39  ;;  %v270_v55 = vrot.slane %v268_v41, 4  ;;  %v273_v56 = vrot.slane %v271_v42, 5  ;;  %v327_v57 = vshrl.u32 %v472_v47, 16  ;;  %s839_s3 = scalar_lea.hbm %s886_s1, %s480_s28  ;;  %s367_s10 = scalar_lea.sflag [#allocation4], %s748_s22 }
  0x47   : > { %v247_v60 = vor.u32 %v246_v44, %v243_v43  ;;  %v261_v61 = vrot.slane %v259_v45, 4  ;;  %v264_v62 = vrot.slane %v262_v46, 5  ;;  %v330_v63 = vshll.u32 %v472_v47, 16  ;;  %s565_s4 = scalar_lea.vmem %s832_s27, 128  ;;  %p892_p11 = scmp.ne.s32.totalorder %s889_s17, 0 }
  0x48   : > { %v318_v13 = vshrl.u32 %v471_v53, 16  ;;  %v189_v14 = vrot.slane %v188_v48, 4  ;;  %v198_v15 = vrot.slane %v197_v50, 4  ;;  %v256_v16 = vor.u32 %v255_v52, %v252_v51  ;;  %p566_p6 = scmp.ne.s32.totalorder %s832_s27, %s565_s4  ;;  %s637_s5 = smov [#allocation5]  }
  0x49   : > { %299 = vrot.lane.b32.xlu1 %v791_v8, %s636_s24  ;;  %297 = vrot.lane.b32.xlu0 %v794_v9, %s636_s24  ;;  %v321_v17 = vshll.u32 %v471_v53, 16  ;;  %v180_v21 = vrot.slane %v179_v54, 4  ;;  %v329_v22 = vrot.slane %v327_v57, 4  ;;  %v248_v26 = vrot.slane %v247_v60, 4  ;;  %s569_s11 = sshll.u32 %s637_s5, 4  ;;  %s570_s11 = int_to_ptr.vmem [resolvable:$false] %s569_s11 }
  0x4a   : > { %v274_v27 = vor.u32 %v273_v56, %v270_v55  ;;  %v265_v28 = vor.u32 %v264_v62, %v261_v61  ;;  %v332_v29 = vrot.slane %v330_v63, 5  ;;  %v320_v31 = vrot.slane %v318_v13, 4  ;;  %p567_p12 = pnand %p566_p6, %p892_p11  ;;  %s571_s13 = scalar_lea.vmem %s570_s11, 256 }
  0x4b   : > { %v345_v32 = vshrl.u32 %v474_v18, 16  ;;  %v323_v33 = vrot.slane %v321_v17, 5  ;;  %v348_v34 = vshll.u32 %v474_v18, 16  ;;  %v336_v35 = vshrl.u32 %v473_v23, 16  ;;  %p572_p8 = scmp.lt.s32.totalorder %s832_s27, %s570_s11  ;;  %p573_p10 = scmp.lt.s32.totalorder %s571_s13, %s565_s4 }
  0x4c   : > { %v257_v40 = vrot.slane %v256_v16, 4  ;;  %v275_v43 = vrot.slane %v274_v27, 4  ;;  %v266_v44 = vrot.slane %v265_v28, 4  ;;  %p568_p13 = pneg %p567_p12 }
  0x4d   : > { %303 = vrot.lane.b32.xlu1 %v799_v10, %s636_s24  ;;  %301 = vrot.lane.b32.xlu0 %v802_v11, %s636_s24  ;;  %v347_v46 = vrot.slane %v345_v32, 4  ;;  %v324_v47 = vor.u32 %v323_v33, %v320_v31  ;;  %v350_v48 = vrot.slane %v348_v34, 5  ;;  %p574_p0 = por %p573_p10, %p572_p8 }
  0x4f   : > { %v351_v60 = vor.u32 %v350_v48, %v347_v46  ;;  %p575_p2 = pnand %p574_p0, %p568_p13 }
  0x51   : > { %v352_v16 = vrot.slane %v351_v60, 4 }
  0xab   : > { %v148_v58 = vpop.permute.xlu1 %147  ;;  %v144_v59 = vpop.permute.xlu0 %143 }
  0xac   : > { %v155_v12 = vmax.bf16 %v144_v59, %v762_v1  ;;  %v157_v19 = vmax.bf16 %v148_v58, %v759_v0  ;;  %v339_v0 = vshll.u32 %v473_v23, 16  ;;  %v325_v59 = vrot.slane %v324_v47, 4 }
  0xae   : > { %v203_v20 = vmax.bf16 %v171_v49, %v155_v12  ;;  %v205_v36 = vmax.bf16 %v189_v14, %v157_v19  ;;  %v338_v49 = vrot.slane %v336_v35, 4  ;;  %v341_v50 = vrot.slane %v339_v0, 5 }
  0xaf   : > { %v150_v24 = vpop.permute.xlu1 %149  ;;  %v146_v25 = vpop.permute.xlu0 %145 }
  0xb0   : > { %v158_v1 = vmax.bf16 %v150_v24, %v767_v2  ;;  %v156_v30 = vmax.bf16 %v146_v25, %v770_v3  ;;  %v212_v39 = vmax.bf16 %v778_v5, %v203_v20  ;;  %v333_v3 = vor.u32 %v332_v29, %v329_v22 }
  0xb1   : > { %v214_v5 = vmax.bf16 %v786_v7, %v205_v36  ;;  %v342_v61 = vor.u32 %v341_v50, %v338_v49 }
  0xb2   : > { %v206_v37 = vmax.bf16 %v198_v15, %v158_v1  ;;  %v204_v38 = vmax.bf16 %v180_v21, %v156_v30 }
  0xb3   : > { %v223_v41 = vpop.permute.xlu1 %222  ;;  %v221_v42 = vpop.permute.xlu0 %220  ;;  %v343_v17 = vrot.slane %v342_v61, 4 }
  0xb4   : > { %v213_v2 = vmax.bf16 %v775_v4, %v204_v38  ;;  %v232_v45 = vmax.bf16 %v221_v42, %v212_v39  ;;  %v215_v53 = vmax.bf16 %v783_v6, %v206_v37  ;;  %v334_v4 = vrot.slane %v333_v3, 4 }
  0xb6   : > { %v233_v51 = vmax.bf16 %v223_v41, %v213_v2  ;;  %v280_v52 = vmax.bf16 %v248_v26, %v232_v45 }
  0xb7   : > { %v227_v54 = vpop.permute.xlu1 %226  ;;  %v225_v55 = vpop.permute.xlu0 %224 }
  0xb8   : > { %v281_v56 = vmax.bf16 %v257_v40, %v233_v51  ;;  %v235_v57 = vmax.bf16 %v227_v54, %v215_v53  ;;  %v234_v58 = vmax.bf16 %v225_v55, %v214_v5  ;;  %v289_v13 = vmax.bf16 %v794_v9, %v280_v52 }
  0xba   : > { %v283_v62 = vmax.bf16 %v275_v43, %v235_v57  ;;  %v282_v63 = vmax.bf16 %v266_v44, %v234_v58  ;;  %v290_v12 = vmax.bf16 %v791_v8, %v281_v56 }
  0xbb   : > { %v300_v6 = vpop.permute.xlu1 %299  ;;  %v298_v14 = vpop.permute.xlu0 %297 }
  0xbc   : > { %v310_v7 = vmax.bf16 %v300_v6, %v290_v12  ;;  %v309_v15 = vmax.bf16 %v298_v14, %v289_v13  ;;  %v292_v20 = vmax.bf16 %v799_v10, %v283_v62  ;;  %v291_v21 = vmax.bf16 %v802_v11, %v282_v63 }
  0xbe   : > { %v358_v18 = vmax.bf16 %v334_v4, %v310_v7  ;;  %v357_v19 = vmax.bf16 %v325_v59, %v309_v15 }
  0xbf   : > { %v304_v8 = vpop.permute.xlu1 %303  ;;  %v302_v9 = vpop.permute.xlu0 %301 }
  0xc0   : > { %363 = vst.msk [vmem:[%s134_s25 + $0x2] sm:$0x3] %vm361_vm0, %v358_v18  ;;  %362 = vst.msk [vmem:[%s134_s25] sm:$0x3] %vm361_vm0, %v357_v19  ;;  %v312_v22 = vmax.bf16 %v304_v8, %v292_v20  ;;  %v311_v23 = vmax.bf16 %v302_v9, %v291_v21 }
  0xc2   : > { %v360_v10 = vmax.bf16 %v352_v16, %v312_v22  ;;  %v359_v11 = vmax.bf16 %v343_v17, %v311_v23 }
  0xc4   : > { %365 = vst.msk [vmem:[%s134_s25 + $0x6] sm:$0x3] %vm361_vm0, %v360_v10  ;;  %364 = vst.msk [vmem:[%s134_s25 + $0x4] sm:$0x3] %vm361_vm0, %v359_v11 }
  0xc5   : > { %578 = shalt.err (!%p575_p2)
}
  0xc6   : > { %s579_s14 = scalar_lea.hbm %s839_s3, 128  ;;  %s583_s21 = scalar_lea.hbm %s886_s1, 256 }
  0xc7   : > { %p580_p4 = scmp.ne.s32.totalorder %s839_s3, %s579_s14  ;;  %p584_p9 = scmp.lt.u32.totalorder %s839_s3, %s886_s1 }
  0xc8   : > { %p585_p1 = scmp.lt.u32.totalorder %s583_s21, %s579_s14  ;;  %p587_p6 = scmp.lt.u32.totalorder %s579_s14, %s839_s3 }
  0xc9   : > { %p581_p5 = pnand %p580_p4, %p892_p11 }
  0xca   : > { %p586_p3 = por %p585_p1, %p584_p9 }
  0xcb   : > { %p582_p7 = pneg %p581_p5 }
  0xcc   : > { %p588_p12 = por %p587_p6, %p586_p3 }
  0xce   : > { %p589_p13 = pnand %p588_p12, %p582_p7 }
  0xd0   : > { %592 = shalt.err (!%p589_p13)
}
  0xd1   : > { %s638_s29 = smov 32   ;;  %s639_s24 = smov 2  }
  0xd2   : > { %486 = dma.vmem_to_hbm [thread:$0]  (%p892_p11), %s832_s27, 128, %s839_s3, %s367_s10, %s638_s29, %s638_s29, %s639_s24  }
  0xd3 PF: > { %s395_s16 = sand.u32 1, %s619_s6   ;;  %p893_p8 = scmp.ne.s32.totalorder %s890_s18, 0 }
  0xd4   : > { %p894_p10 = scmp.ge.s32.totalorder %s631_s9, 2  ;;  %s396_s25 = scalar_lea.sflag [#allocation4], %s395_s16 }
  0xd6   : > { %p493_p0 = pnand %p894_p10, %p893_p8 }
  0xd8   : > { %614 = dma.done.wait (!%p493_p0), %s396_s25, 128  }
  0xd9   : > { %616 = vsyncadd (!%p493_p0), %s396_s25, 4294967168  ;;  %p14_p2 = scmp.ge.s32.totalorder %s675_s12, 4   ;;  %s895_s6 = smov %s623_s7 }
  0xda   : > { %s896_s7 = smov %s627_s8  ;;  %s897_s8 = smov %s687_s15 }
  0xdb   : > { %s898_s9 = smov %s675_s12  ;;  %16 = sbr.rel (!%p14_p2) target bundleno = 5 (0x5), region = 71 }
  0xe2   :  { %401 = vsyncpa [#allocation3], 1 }
  0xe3   :  { %403 = vsyncpa [#allocation3 + $0x1], 1 }
  0xe4   :  { %404 = vsyncpa [#allocation4], 1 }
  0xe5   :  { %406 = vsyncpa [#allocation4 + $0x1], 1 }

// kernel: img2vec_forward.8
= control target key start
LH: loop header
LB: loop body
LE: loop exit
PB: predicated region body
PF: predicated region fallthrough
CT: control target
= control target key end

     0   :  { %8 = vsyncpa [#allocation3], 0  ;;  %s448_s0 = inlined_call_operand.hbm [shape: bf16[32,64], index: 0, kind: input, shape index: {}]   ;;  %s449_s1 = inlined_call_operand.hbm [shape: bf16[64,128], index: 1, kind: input, shape index: {}]   ;;  %s450_s2 = inlined_call_operand.hbm [shape: f32[1,128], index: 2, kind: input, shape index: {}]   ;;  %s451_s3 = inlined_call_operand.hbm [shape: bf16[32,128], index: 3, kind: output, shape index: {}]  }
   0x1   :  { %9 = vsyncpa [#allocation6], 0 }
   0x2   :  { %10 = vsyncpa [#allocation4], 0  ;;  %s358_s12 = smov [#allocation5]   ;;  %s359_s14 = smov [#allocation2]  }
   0x3   :  { %s28_s13 = sshll.u32 %s358_s12, 4  ;;  %s16_s15 = sshll.u32 %s359_s14, 4  ;;  %s29_s13 = int_to_ptr.vmem [resolvable:$true] %s28_s13  ;;  %s384_s15 = int_to_ptr.vmem [resolvable:$true] %s16_s15 }
   0x4   :  { %s264_s18 = scalar_lea.hbm %s449_s1, 512 }
   0x5   :  { %p265_p0 = scmp.ne.s32.totalorder %s449_s1, %s264_s18  ;;  %p268_p1 = scmp.lt.u32.totalorder %s264_s18, %s449_s1 }
   0x7   :  { %p270_p2 = pnand %p268_p1, %p265_p0 }
   0x9   :  { %273 = shalt.err (!%p270_p2)
}
   0xa   :  { %s274_s23 = scalar_lea.vmem %s29_s13, 512  ;;  %p279_p4 = scmp.lt.s32.totalorder %s29_s13, %s29_s13 }
   0xb   :  { %p275_p3 = scmp.ne.s32.totalorder %s29_s13, %s274_s23  ;;  %p280_p5 = scmp.lt.s32.totalorder %s274_s23, %s274_s23 }
   0xd   :  { %p281_p6 = por %p280_p5, %p279_p4 }
   0xf   :  { %p282_p7 = pnand %p281_p6, %p275_p3 }
  0x11   :  { %285 = shalt.err (!%p282_p7)
}
  0x12   :  { %s360_s24 = smov 64   ;;  %s361_s25 = smov 4  }
  0x13   :  { %34 = dma.hbm_to_vmem [thread:$0]  %s449_s1, 512, %s29_s13, [#allocation6], %s360_s24, %s360_s24, %s361_s25  }
  0x14   :  { %s286_s30 = scalar_lea.hbm %s448_s0, 256 }
  0x15   :  { %p287_p8 = scmp.ne.s32.totalorder %s448_s0, %s286_s30  ;;  %p290_p9 = scmp.lt.u32.totalorder %s286_s30, %s448_s0 }
  0x17   :  { %p292_p10 = pnand %p290_p9, %p287_p8 }
  0x19   :  { %295 = shalt.err (!%p292_p10)
}
  0x1a   :  { %s296_s8 = scalar_lea.vmem %s384_s15, 256  ;;  %p301_p12 = scmp.lt.s32.totalorder %s384_s15, %s384_s15 }
  0x1b   :  { %p297_p11 = scmp.ne.s32.totalorder %s384_s15, %s296_s8  ;;  %p302_p13 = scmp.lt.s32.totalorder %s296_s8, %s296_s8 }
  0x1d   :  { %p303_p0 = por %p302_p13, %p301_p12 }
  0x1f   :  { %p304_p1 = pnand %p303_p0, %p297_p11 }
  0x21   :  { %307 = shalt.err (!%p304_p1)
}
  0x22   :  { %22 = dma.hbm_to_vmem [thread:$0]  %s448_s0, 256, %s384_s15, [#allocation3], %s360_s24, %s360_s24, %s361_s25  }
  0x23   :  { %s362_s10 = smov [#allocation7]   ;;  %s308_s14 = scalar_lea.hbm %s450_s2, 16 }
  0x24   :  { %s41_s11 = sshll.u32 %s362_s10, 4  ;;  %p309_p2 = scmp.ne.s32.totalorder %s450_s2, %s308_s14  ;;  %s42_s11 = int_to_ptr.vmem [resolvable:$true] %s41_s11 }
  0x25   :  { %p312_p3 = scmp.lt.u32.totalorder %s308_s14, %s450_s2 }
  0x27   :  { %p314_p4 = pnand %p312_p3, %p309_p2 }
  0x29   :  { %317 = shalt.err (!%p314_p4)
}
  0x2a   :  { %s318_s20 = scalar_lea.vmem %s42_s11, 16  ;;  %s322_s0 = scalar_lea.vmem %s42_s11, 32 }
  0x2b   :  { %p319_p5 = scmp.ne.s32.totalorder %s42_s11, %s318_s20  ;;  %p323_p6 = scmp.lt.s32.totalorder %s42_s11, %s42_s11 }
  0x2c   :  { %p324_p7 = scmp.lt.s32.totalorder %s322_s0, %s318_s20 }
  0x2e   :  { %p325_p8 = por %p324_p7, %p323_p6 }
  0x30   :  { %p326_p9 = pnand %p325_p8, %p319_p5 }
  0x32   :  { %329 = shalt.err (!%p326_p9)
}
  0x33   :  { %44 = dma.hbm_to_vmem [thread:$0]  %s450_s2, 16, %s42_s11, [#allocation6]  }
  0x34   :  { %352 = dma.done.wait [#allocation3], 256  }
  0x35   :  { %353 = vsyncadd [#allocation3], 4294967040 }
  0x36   :  { %354 = dma.done.wait [#allocation6], 528  }
  0x37   :  { %355 = vsyncadd [#allocation6], 4294966768  ;;  %v258_v0 = vld [vmem:[#allocation5] sm:$0xff]   ;;  %v259_v1 = vld [vmem:[#allocation5 + $0x8] sm:$0xff]   ;;  %vm108_vm0 = vcmask 523264   ;;  %s363_s2 = smov [#allocation8]  }
  0x38   :  { %240 = vmatprep.subr.bf16.mxu0 %v258_v0  ;;  %v260_v2 = vld [vmem:[#allocation5 + $0x10] sm:$0xff]   ;;  %v261_v4 = vld [vmem:[#allocation5 + $0x18] sm:$0xff]   ;;  %v206_v6 = vld [vmem:[#allocation7] ss:$0 sm:$0xff]  ;;  %s193_s22 = sshll.u32 %s363_s2, 4  ;;  %s194_s22 = int_to_ptr.vmem [resolvable:$true] %s193_s22 }
  0x39   :  { %241 = vmatpush3.bf16.msra.mxu0 %v258_v0  ;;  %v262_v3 = vld [vmem:[#allocation2] sm:$0xff]   ;;  %v263_v5 = vld [vmem:[#allocation2 + $0x8] sm:$0xff]   ;;  %s330_s23 = scalar_lea.vmem %s194_s22, 256  ;;  %p335_p11 = scmp.lt.s32.totalorder %s194_s22, %s194_s22 }
  0x3a   :  { %242 = vmatprep.subr.bf16.mxu0 %v259_v1  ;;  %248 = vmatprep.mubr.msk.bf16.mxu0 %vm108_vm0, %v262_v3  ;;  %p331_p10 = scmp.ne.s32.totalorder %s194_s22, %s330_s23  ;;  %p336_p12 = scmp.lt.s32.totalorder %s330_s23, %s330_s23 }
  0x3c   :  { %p337_p13 = por %p336_p12, %p335_p11 }
  0x3d   :  { %243 = vmatpush3.bf16.msra.mxu0 %v259_v1 }
  0x3e   :  { %244 = vmatprep.subr.bf16.mxu0 %v260_v2  ;;  %p338_p0 = pnand %p337_p13, %p331_p10 }
  0x41   :  { %245 = vmatpush3.bf16.msra.mxu0 %v260_v2 }
  0x42   :  { %246 = vmatprep.subr.bf16.mxu0 %v261_v4 }
  0x45   :  { %247 = vmatpush3.bf16.msra.mxu0 %v261_v4 }
  0x48   :  { %249 = vmatmul.mubr.msk.bf16.vlgmr.msra.gmra.mrb[0].mxu0 %vm108_vm0, %v263_v5 }
 0x11b   :  { %v250_v7 = vpop.f32.mrb[0].mxu0 }
 0x11c   :  { %v158_v8 = vadd.f32 %v250_v7, %v206_v6  ;;  %v149_v9 = vpop.f32.mrb[1].mxu0 }
 0x11d   :  { %v150_v10 = vadd.f32 %v206_v6, %v149_v9  ;;  %v251_v11 = vpop.f32.mrb[2].mxu0 }
 0x11e   :  { %v161_v12 = vadd.f32 %v251_v11, %v206_v6  ;;  %v152_v13 = vpop.f32.mrb[3].mxu0  ;;  %v166_v15 = vmax.f32 %v158_v8, 0.0 }
 0x11f   :  { %v153_v14 = vadd.f32 %v206_v6, %v152_v13  ;;  %v164_v17 = vmax.f32 %v150_v10, 0.0 }
 0x120   :  { %v167_v16 = vmax.f32 %v161_v12, 0.0 }
 0x121   :  { %v165_v18 = vmax.f32 %v153_v14, 0.0 }
 0x122   :  { %v231_v19 = vpack.c.bf16 %v167_v16, %v166_v15 }
 0x123   :  { %v226_v20 = vpack.c.bf16 %v165_v18, %v164_v17 }
 0x124   :  { %233 = vst [vmem:[#allocation8 + $0x8] sm:$0xff] %v231_v19  }
 0x125   :  { %227 = vst [vmem:[#allocation8] sm:$0xff] %v226_v20  }
 0x126   :  { %341 = shalt.err (!%p338_p0)
}
 0x127   :  { %s342_s28 = scalar_lea.hbm %s451_s3, 256 }
 0x128   :  { %p343_p1 = scmp.ne.s32.totalorder %s451_s3, %s342_s28  ;;  %p346_p2 = scmp.lt.u32.totalorder %s342_s28, %s451_s3 }
 0x12a   :  { %p348_p3 = pnand %p346_p2, %p343_p1 }
 0x12c   :  { %351 = shalt.err (!%p348_p3)
}
 0x12d   :  { %199 = dma.vmem_to_hbm [thread:$0]  %s194_s22, 256, %s451_s3, [#allocation4], %s360_s24, %s360_s24, %s361_s25  }
 0x12e   :  { %356 = dma.done.wait [#allocation4], 256  }
 0x12f   :  { %357 = vsyncadd [#allocation4], 4294967040 }
 0x130   :  { %203 = vsyncpa [#allocation3], 1 }
 0x131   :  { %204 = vsyncpa [#allocation6], 1 }
 0x132   :  { %205 = vsyncpa [#allocation4], 1 }

// kernel: img2vec_forward.6
= control target key start
LH: loop header
LB: loop body
LE: loop exit
PB: predicated region body
PF: predicated region fallthrough
CT: control target
= control target key end

     0   :  { %8 = vsyncpa [#allocation3], 0  ;;  %s821_s0 = inlined_call_operand.hbm [shape: bf16[128,147], index: 0, kind: input, shape index: {}]   ;;  %s822_s1 = inlined_call_operand.hbm [shape: bf16[147,64], index: 1, kind: input, shape index: {}]   ;;  %s823_s2 = inlined_call_operand.hbm [shape: f32[1,64], index: 2, kind: input, shape index: {}]   ;;  %s824_s3 = inlined_call_operand.hbm [shape: bf16[128,64], index: 3, kind: output, shape index: {}]  }
   0x1   :  { %9 = vsyncpa [#allocation6], 0 }
   0x2   :  { %10 = vsyncpa [#allocation4], 0  ;;  %s695_s12 = smov [#allocation5]   ;;  %s601_s16 = scalar_lea.hbm %s822_s1, 1216 }
   0x3   :  { %s28_s13 = sshll.u32 %s695_s12, 4  ;;  %p602_p0 = scmp.ne.s32.totalorder %s822_s1, %s601_s16  ;;  %s29_s13 = int_to_ptr.vmem [resolvable:$true] %s28_s13 }
   0x4   :  { %p605_p1 = scmp.lt.u32.totalorder %s601_s16, %s822_s1 }
   0x6   :  { %p607_p2 = pnand %p605_p1, %p602_p0 }
   0x8   :  { %610 = shalt.err (!%p607_p2)
}
   0x9   :  { %s611_s21 = scalar_lea.vmem %s29_s13, 1216  ;;  %p616_p4 = scmp.lt.s32.totalorder %s29_s13, %s29_s13 }
   0xa   :  { %p612_p3 = scmp.ne.s32.totalorder %s29_s13, %s611_s21  ;;  %p617_p5 = scmp.lt.s32.totalorder %s611_s21, %s611_s21 }
   0xc   :  { %p618_p6 = por %p617_p5, %p616_p4 }
   0xe   :  { %p619_p7 = pnand %p618_p6, %p612_p3 }
  0x10   :  { %622 = shalt.err (!%p619_p7)
}
  0x11   :  { %s696_s22 = smov 64   ;;  %s697_s23 = smov 4  }
  0x12   :  { %34 = dma.hbm_to_vmem [thread:$0]  %s822_s1, 1216, %s29_s13, [#allocation6], %s696_s22, %s696_s22, %s697_s23  }
  0x13   :  { %s698_s26 = smov [#allocation2]   ;;  %s623_s30 = scalar_lea.hbm %s821_s0, 2048 }
  0x14   :  { %s16_s27 = sshll.u32 %s698_s26, 4  ;;  %p624_p8 = scmp.ne.s32.totalorder %s821_s0, %s623_s30  ;;  %s17_s27 = int_to_ptr.vmem [resolvable:$true] %s16_s27 }
  0x15   :  { %p627_p9 = scmp.lt.u32.totalorder %s623_s30, %s821_s0 }
  0x17   :  { %p629_p10 = pnand %p627_p9, %p624_p8 }
  0x19   :  { %632 = shalt.err (!%p629_p10)
}
  0x1a   :  { %s633_s8 = scalar_lea.vmem %s17_s27, 2048  ;;  %p638_p12 = scmp.lt.s32.totalorder %s17_s27, %s17_s27 }
  0x1b   :  { %p634_p11 = scmp.ne.s32.totalorder %s17_s27, %s633_s8  ;;  %p639_p13 = scmp.lt.s32.totalorder %s633_s8, %s633_s8 }
  0x1d   :  { %p640_p0 = por %p639_p13, %p638_p12 }
  0x1f   :  { %p641_p1 = pnand %p640_p0, %p634_p11 }
  0x21   :  { %644 = shalt.err (!%p641_p1)
}
  0x22   :  { %s699_s1 = smov 128   ;;  %s700_s9 = smov 8  }
  0x23   :  { %22 = dma.hbm_to_vmem [thread:$0]  %s821_s0, 2048, %s17_s27, [#allocation3], %s699_s1, %s699_s1, %s700_s9  }
  0x24   :  { %s701_s12 = smov [#allocation7]   ;;  %s645_s16 = scalar_lea.hbm %s823_s2, 16 }
  0x25   :  { %s41_s13 = sshll.u32 %s701_s12, 4  ;;  %p646_p2 = scmp.ne.s32.totalorder %s823_s2, %s645_s16  ;;  %s42_s13 = int_to_ptr.vmem [resolvable:$true] %s41_s13 }
  0x26   :  { %p649_p3 = scmp.lt.u32.totalorder %s645_s16, %s823_s2 }
  0x28   :  { %p651_p4 = pnand %p649_p3, %p646_p2 }
  0x2a   :  { %654 = shalt.err (!%p651_p4)
}
  0x2b   :  { %s655_s21 = scalar_lea.vmem %s42_s13, 16  ;;  %s659_s0 = scalar_lea.vmem %s42_s13, 32 }
  0x2c   :  { %p656_p5 = scmp.ne.s32.totalorder %s42_s13, %s655_s21  ;;  %p660_p6 = scmp.lt.s32.totalorder %s42_s13, %s42_s13 }
  0x2d   :  { %p661_p7 = scmp.lt.s32.totalorder %s659_s0, %s655_s21 }
  0x2f   :  { %p662_p8 = por %p661_p7, %p660_p6 }
  0x31   :  { %p663_p9 = pnand %p662_p8, %p656_p5 }
  0x33   :  { %666 = shalt.err (!%p663_p9)
}
  0x34   :  { %44 = dma.hbm_to_vmem [thread:$0]  %s823_s2, 16, %s42_s13, [#allocation6]  }
  0x35   :  { %689 = dma.done.wait [#allocation3], 2048  }
  0x36   :  { %690 = vsyncadd [#allocation3], 4294965248 }
  0x37   :  { %691 = dma.done.wait [#allocation6], 1232  }
  0x38   :  { %692 = vsyncadd [#allocation6], 4294966064  ;;  %v702_v0 = vmov 0   ;;  %v567_v1 = vld [vmem:[#allocation5] sm:$0xff]   ;;  %v568_v2 = vld [vmem:[#allocation5 + $0x8] sm:$0xff]   ;;  %vm226_vm0 = vcmask 154624  }
  0x39   :  { %258 = vmatprep.subr.bf16.mxu0 %v702_v0  ;;  %537 = vmatprep.subr.bf16.mxu1 %v702_v0  ;;  %v569_v3 = vld [vmem:[#allocation5 + $0x10] sm:$0xff]   ;;  %v570_v4 = vld [vmem:[#allocation5 + $0x18] sm:$0xff]   ;;  %v579_v5 = vld [vmem:[#allocation2 + $0x4] ss:$8 sps:$4 sm:$0xff]   ;;  %vm251_vm1 = vcmask 1040384   ;;  %vm252_vm2 = vcmask 1041408  }
  0x3a   :  { %259 = vmatpush1.bf16.msra.mxu0 %v567_v1  ;;  %547 = vmatpush1.bf16.msra.mxu1 %v567_v1  ;;  %v582_v6 = vld [vmem:[#allocation2 + $0x44] ss:$8 sps:$4 sm:$0xff]   ;;  %v573_v9 = vld [vmem:[#allocation5 + $0x30] sm:$0xff]   ;;  %v574_v10 = vld [vmem:[#allocation5 + $0x38] sm:$0xff]   ;;  %v703_v11 = vmov 65535   ;;  %vm435_vm3 = vcmask 519168  }
  0x3b   :  { %260 = vmatprep.subr.bf16.mxu0 %v702_v0  ;;  %538 = vmatprep.subr.bf16.mxu1 %v702_v0  ;;  %v571_v7 = vld [vmem:[#allocation5 + $0x20] sm:$0xff]   ;;  %v572_v8 = vld [vmem:[#allocation5 + $0x28] sm:$0xff]   ;;  %v253_v12 = vsel %vm251_vm1, 4294967295, %v703_v11  ;;  %v583_v19 = vld [vmem:[#allocation2 + $0x14] ss:$8 sps:$4 sm:$0xff]   ;;  %s704_s2 = smov [#allocation8]  }
  0x3c   :  { %497 = vmatprep.mubr.msk.bf16.mxu0 %vm226_vm0, %v579_v5  ;;  %501 = vmatprep.mubr.msk.bf16.mxu1 %vm226_vm0, %v582_v6  ;;  %v575_v13 = vld [vmem:[#allocation5 + $0x40] sm:$0xff]   ;;  %v576_v14 = vld [vmem:[#allocation5 + $0x48] ss:$0 sps:$4 sm:$0x33]   ;;  %v254_v15 = vsel %vm252_vm2, %v253_v12, 0  ;;  %s457_s26 = sshll.u32 %s704_s2, 4  ;;  %s458_s26 = int_to_ptr.vmem [resolvable:$true] %s457_s26 }
  0x3d   :  { %v256_v16 = vand.u32 %v576_v14, %v254_v15  ;;  %v577_v17 = vld [vmem:[#allocation2] ss:$8 sps:$4 sm:$0xff]   ;;  %v585_v20 = vld [vmem:[#allocation2 + $0x54] ss:$8 sps:$4 sm:$0xff]   ;;  %v587_v21 = vld [vmem:[#allocation2 + $0x10] ss:$8 sps:$4 sm:$0xff]   ;;  %p672_p11 = scmp.lt.s32.totalorder %s458_s26, %s458_s26 }
  0x3e   :  { %261 = vmatpush1.bf16.msra.mxu0 %v568_v2  ;;  %548 = vmatpush1.bf16.msra.mxu1 %v568_v2  ;;  %v580_v18 = vld [vmem:[#allocation2 + $0x40] ss:$8 sps:$4 sm:$0xff]   ;;  %v588_v22 = vld [vmem:[#allocation2 + $0x50] ss:$8 sps:$4 sm:$0xff]   ;;  %v589_v23 = vld [vmem:[#allocation2 + $0x24] ss:$8 sps:$4 sm:$0xff]  }
  0x3f   :  { %262 = vmatprep.subr.bf16.mxu0 %v702_v0  ;;  %539 = vmatprep.subr.bf16.mxu1 %v702_v0  ;;  %v591_v24 = vld [vmem:[#allocation2 + $0x64] ss:$8 sps:$4 sm:$0xff]   ;;  %v593_v25 = vld [vmem:[#allocation2 + $0x20] ss:$8 sps:$4 sm:$0xff]   ;;  %v595_v27 = vld [vmem:[#allocation2 + $0x34] ss:$8 sps:$4 sm:$0xff]  }
  0x40   :  { %v594_v26 = vld [vmem:[#allocation2 + $0x60] ss:$8 sps:$4 sm:$0xff]   ;;  %v597_v28 = vld [vmem:[#allocation2 + $0x74] ss:$8 sps:$4 sm:$0xff]   ;;  %v599_v29 = vld [vmem:[#allocation2 + $0x30] ss:$8 sps:$4 sm:$0xff]  }
  0x41   :  { %v600_v30 = vld [vmem:[#allocation2 + $0x70] ss:$8 sps:$4 sm:$0xff]   ;;  %v772_v31 = vld [vmem:[#allocation7] ss:$0 sm:$0xff]  ;;  %s667_s27 = scalar_lea.vmem %s458_s26, 1024 }
  0x42   :  { %263 = vmatpush1.bf16.msra.mxu0 %v569_v3  ;;  %549 = vmatpush1.bf16.msra.mxu1 %v569_v3  ;;  %p668_p10 = scmp.ne.s32.totalorder %s458_s26, %s667_s27  ;;  %p673_p12 = scmp.lt.s32.totalorder %s667_s27, %s667_s27 }
  0x43   :  { %264 = vmatprep.subr.bf16.mxu0 %v702_v0  ;;  %540 = vmatprep.subr.bf16.mxu1 %v702_v0 }
  0x44   :  { %p674_p13 = por %p673_p12, %p672_p11 }
  0x46   :  { %265 = vmatpush1.bf16.msra.mxu0 %v570_v4  ;;  %550 = vmatpush1.bf16.msra.mxu1 %v570_v4  ;;  %p675_p0 = pnand %p674_p13, %p668_p10 }
  0x47   :  { %266 = vmatprep.subr.bf16.mxu0 %v702_v0  ;;  %541 = vmatprep.subr.bf16.mxu1 %v702_v0 }
  0x4a   :  { %267 = vmatpush1.bf16.msra.mxu0 %v571_v7  ;;  %551 = vmatpush1.bf16.msra.mxu1 %v571_v7 }
  0x4b   :  { %268 = vmatprep.subr.bf16.mxu0 %v702_v0  ;;  %542 = vmatprep.subr.bf16.mxu1 %v702_v0 }
  0x4e   :  { %269 = vmatpush1.bf16.msra.mxu0 %v572_v8  ;;  %552 = vmatpush1.bf16.msra.mxu1 %v572_v8 }
  0x4f   :  { %270 = vmatprep.subr.bf16.mxu0 %v702_v0  ;;  %543 = vmatprep.subr.bf16.mxu1 %v702_v0 }
  0x52   :  { %271 = vmatpush1.bf16.msra.mxu0 %v573_v9  ;;  %553 = vmatpush1.bf16.msra.mxu1 %v573_v9 }
  0x53   :  { %272 = vmatprep.subr.bf16.mxu0 %v702_v0  ;;  %544 = vmatprep.subr.bf16.mxu1 %v702_v0 }
  0x56   :  { %273 = vmatpush1.bf16.msra.mxu0 %v574_v10  ;;  %554 = vmatpush1.bf16.msra.mxu1 %v574_v10 }
  0x57   :  { %274 = vmatprep.subr.bf16.mxu0 %v702_v0  ;;  %545 = vmatprep.subr.bf16.mxu1 %v702_v0 }
  0x5a   :  { %275 = vmatpush1.bf16.msra.mxu0 %v575_v13  ;;  %555 = vmatpush1.bf16.msra.mxu1 %v575_v13 }
  0x5b   :  { %276 = vmatprep.subr.bf16.mxu0 %v702_v0  ;;  %546 = vmatprep.subr.bf16.mxu1 %v702_v0 }
  0x5e   :  { %277 = vmatpush1.bf16.msra.mxu0 %v256_v16  ;;  %556 = vmatpush1.bf16.msra.mxu1 %v256_v16 }
  0x61   :  { %291 = vmatmul.mubr.bf16.vlgmr.msra.gmra.mrb[0].mxu0 %v577_v17  ;;  %323 = vmatmul.mubr.bf16.vlgmr.msra.gmra.mrb[0].mxu1 %v580_v18 }
  0x62   :  { %498 = vmatprep.mubr.msk.bf16.mxu0 %vm226_vm0, %v583_v19  ;;  %502 = vmatprep.mubr.msk.bf16.mxu1 %vm226_vm0, %v585_v20 }
  0x69   :  { %299 = vmatmul.mubr.bf16.gmra.mrb[4].mxu0 %v587_v21  ;;  %331 = vmatmul.mubr.bf16.gmra.mrb[4].mxu1 %v588_v22 }
  0x6a   :  { %499 = vmatprep.mubr.msk.bf16.mxu0 %vm226_vm0, %v589_v23  ;;  %503 = vmatprep.mubr.msk.bf16.mxu1 %vm226_vm0, %v591_v24 }
  0x71   :  { %307 = vmatmul.mubr.bf16.gmra.mrb[8].mxu0 %v593_v25  ;;  %339 = vmatmul.mubr.bf16.gmra.mrb[8].mxu1 %v594_v26 }
  0x72   :  { %500 = vmatprep.mubr.msk.bf16.mxu0 %vm226_vm0, %v595_v27  ;;  %504 = vmatprep.mubr.msk.bf16.mxu1 %vm226_vm0, %v597_v28 }
  0x79   :  { %315 = vmatmul.mubr.bf16.gmra.mrb[12].mxu0 %v599_v29  ;;  %347 = vmatmul.mubr.bf16.gmra.mrb[12].mxu1 %v600_v30 }
 0x134   :  { %v292_v32 = vpop.f32.mrb[0].mxu0  ;;  %v324_v33 = vpop.f32.mrb[0].mxu1 }
 0x135   :  { %v293_v34 = vadd.f32 %v772_v31, %v292_v32  ;;  %v325_v35 = vadd.f32 %v772_v31, %v324_v33  ;;  %v294_v36 = vpop.f32.mrb[1].mxu0  ;;  %v326_v37 = vpop.f32.mrb[1].mxu1 }
 0x136   :  { %v295_v38 = vpop.f32.mrb[2].mxu0  ;;  %v327_v39 = vpop.f32.mrb[2].mxu1 }
 0x137   :  { %v355_v40 = vmax.f32 %v293_v34, 0.0  ;;  %v363_v41 = vmax.f32 %v325_v35, 0.0  ;;  %v296_v42 = vadd.f32 %v772_v31, %v295_v38  ;;  %v328_v43 = vadd.f32 %v772_v31, %v327_v39  ;;  %v297_v44 = vpop.f32.mrb[3].mxu0  ;;  %v329_v45 = vpop.f32.mrb[3].mxu1 }
 0x139   :  { %v521_v46 = vpack.c.bf16 %v355_v40, %v355_v40  ;;  %v529_v47 = vpack.c.bf16 %v363_v41, %v363_v41  ;;  %v356_v48 = vmax.f32 %v296_v42, 0.0  ;;  %v364_v49 = vmax.f32 %v328_v43, 0.0 }
 0x13b   :  { %436 = vst.msk [vmem:[#allocation8] sm:$0xf] %vm435_vm3, %v521_v46  ;;  %444 = vst.msk [vmem:[#allocation8 + $0x20] sm:$0xf] %vm435_vm3, %v529_v47  ;;  %v522_v50 = vpack.c.bf16 %v356_v48, %v356_v48  ;;  %v530_v51 = vpack.c.bf16 %v364_v49, %v364_v49 }
 0x13c   :  { %v300_v52 = vpop.f32.mrb[4].mxu0  ;;  %v332_v53 = vpop.f32.mrb[4].mxu1 }
 0x13d   :  { %437 = vst.msk [vmem:[#allocation8 + $0x4] sm:$0xf] %vm435_vm3, %v522_v50  ;;  %445 = vst.msk [vmem:[#allocation8 + $0x24] sm:$0xf] %vm435_vm3, %v530_v51  ;;  %v301_v54 = vadd.f32 %v772_v31, %v300_v52  ;;  %v333_v55 = vadd.f32 %v772_v31, %v332_v53  ;;  %v302_v56 = vpop.f32.mrb[5].mxu0  ;;  %v334_v57 = vpop.f32.mrb[5].mxu1 }
 0x13e   :  { %v303_v58 = vpop.f32.mrb[6].mxu0  ;;  %v335_v59 = vpop.f32.mrb[6].mxu1 }
 0x13f   :  { %v357_v60 = vmax.f32 %v301_v54, 0.0  ;;  %v365_v61 = vmax.f32 %v333_v55, 0.0  ;;  %v304_v62 = vadd.f32 %v772_v31, %v303_v58  ;;  %v336_v63 = vadd.f32 %v772_v31, %v335_v59  ;;  %v305_v0 = vpop.f32.mrb[7].mxu0  ;;  %v337_v1 = vpop.f32.mrb[7].mxu1 }
 0x141   :  { %v523_v2 = vpack.c.bf16 %v357_v60, %v357_v60  ;;  %v531_v3 = vpack.c.bf16 %v365_v61, %v365_v61  ;;  %v358_v4 = vmax.f32 %v304_v62, 0.0  ;;  %v366_v5 = vmax.f32 %v336_v63, 0.0 }
 0x143   :  { %438 = vst.msk [vmem:[#allocation8 + $0x8] sm:$0xf] %vm435_vm3, %v523_v2  ;;  %446 = vst.msk [vmem:[#allocation8 + $0x28] sm:$0xf] %vm435_vm3, %v531_v3  ;;  %v524_v6 = vpack.c.bf16 %v358_v4, %v358_v4  ;;  %v532_v7 = vpack.c.bf16 %v366_v5, %v366_v5 }
 0x144   :  { %v308_v8 = vpop.f32.mrb[8].mxu0  ;;  %v340_v9 = vpop.f32.mrb[8].mxu1 }
 0x145   :  { %439 = vst.msk [vmem:[#allocation8 + $0xc] sm:$0xf] %vm435_vm3, %v524_v6  ;;  %447 = vst.msk [vmem:[#allocation8 + $0x2c] sm:$0xf] %vm435_vm3, %v532_v7  ;;  %v309_v10 = vadd.f32 %v772_v31, %v308_v8  ;;  %v341_v11 = vadd.f32 %v772_v31, %v340_v9  ;;  %v310_v12 = vpop.f32.mrb[9].mxu0  ;;  %v342_v13 = vpop.f32.mrb[9].mxu1 }
 0x146   :  { %v311_v14 = vpop.f32.mrb[10].mxu0  ;;  %v343_v15 = vpop.f32.mrb[10].mxu1 }
 0x147   :  { %v359_v16 = vmax.f32 %v309_v10, 0.0  ;;  %v367_v17 = vmax.f32 %v341_v11, 0.0  ;;  %v312_v18 = vadd.f32 %v772_v31, %v311_v14  ;;  %v344_v19 = vadd.f32 %v772_v31, %v343_v15  ;;  %v313_v20 = vpop.f32.mrb[11].mxu0  ;;  %v345_v21 = vpop.f32.mrb[11].mxu1 }
 0x149   :  { %v525_v22 = vpack.c.bf16 %v359_v16, %v359_v16  ;;  %v533_v23 = vpack.c.bf16 %v367_v17, %v367_v17  ;;  %v360_v24 = vmax.f32 %v312_v18, 0.0  ;;  %v368_v25 = vmax.f32 %v344_v19, 0.0 }
 0x14b   :  { %440 = vst.msk [vmem:[#allocation8 + $0x10] sm:$0xf] %vm435_vm3, %v525_v22  ;;  %448 = vst.msk [vmem:[#allocation8 + $0x30] sm:$0xf] %vm435_vm3, %v533_v23  ;;  %v526_v26 = vpack.c.bf16 %v360_v24, %v360_v24  ;;  %v534_v27 = vpack.c.bf16 %v368_v25, %v368_v25 }
 0x14c   :  { %v316_v28 = vpop.f32.mrb[12].mxu0  ;;  %v348_v29 = vpop.f32.mrb[12].mxu1 }
 0x14d   :  { %441 = vst.msk [vmem:[#allocation8 + $0x14] sm:$0xf] %vm435_vm3, %v526_v26  ;;  %449 = vst.msk [vmem:[#allocation8 + $0x34] sm:$0xf] %vm435_vm3, %v534_v27  ;;  %v317_v30 = vadd.f32 %v772_v31, %v316_v28  ;;  %v349_v32 = vadd.f32 %v772_v31, %v348_v29  ;;  %v318_v33 = vpop.f32.mrb[13].mxu0  ;;  %v350_v34 = vpop.f32.mrb[13].mxu1 }
 0x14e   :  { %v319_v35 = vpop.f32.mrb[14].mxu0  ;;  %v351_v36 = vpop.f32.mrb[14].mxu1 }
 0x14f   :  { %v361_v37 = vmax.f32 %v317_v30, 0.0  ;;  %v369_v38 = vmax.f32 %v349_v32, 0.0  ;;  %v320_v39 = vadd.f32 %v772_v31, %v319_v35  ;;  %v352_v40 = vadd.f32 %v772_v31, %v351_v36  ;;  %v321_v41 = vpop.f32.mrb[15].mxu0  ;;  %v353_v42 = vpop.f32.mrb[15].mxu1 }
 0x151   :  { %v527_v43 = vpack.c.bf16 %v361_v37, %v361_v37  ;;  %v535_v44 = vpack.c.bf16 %v369_v38, %v369_v38  ;;  %v362_v45 = vmax.f32 %v320_v39, 0.0  ;;  %v370_v46 = vmax.f32 %v352_v40, 0.0 }
 0x153   :  { %442 = vst.msk [vmem:[#allocation8 + $0x18] sm:$0xf] %vm435_vm3, %v527_v43  ;;  %450 = vst.msk [vmem:[#allocation8 + $0x38] sm:$0xf] %vm435_vm3, %v535_v44  ;;  %v528_v47 = vpack.c.bf16 %v362_v45, %v362_v45  ;;  %v536_v48 = vpack.c.bf16 %v370_v46, %v370_v46 }
 0x155   :  { %443 = vst.msk [vmem:[#allocation8 + $0x1c] sm:$0xf] %vm435_vm3, %v528_v47  ;;  %451 = vst.msk [vmem:[#allocation8 + $0x3c] sm:$0xf] %vm435_vm3, %v536_v48 }
 0x156   :  { %678 = shalt.err (!%p675_p0)
}
 0x157   :  { %s679_s30 = scalar_lea.hbm %s824_s3, 1024 }
 0x158   :  { %p680_p1 = scmp.ne.s32.totalorder %s824_s3, %s679_s30  ;;  %p683_p2 = scmp.lt.u32.totalorder %s679_s30, %s824_s3 }
 0x15a   :  { %p685_p3 = pnand %p683_p2, %p680_p1 }
 0x15c   :  { %688 = shalt.err (!%p685_p3)
}
 0x15d   :  { %463 = dma.vmem_to_hbm [thread:$0]  %s458_s26, 1024, %s824_s3, [#allocation4], %s696_s22, %s696_s22, %s697_s23  }
 0x15e   :  { %693 = dma.done.wait [#allocation4], 1024  }
 0x15f   :  { %694 = vsyncadd [#allocation4], 4294966272 }
 0x160   :  { %467 = vsyncpa [#allocation3], 1 }
 0x161   :  { %468 = vsyncpa [#allocation6], 1 }
 0x162   :  { %469 = vsyncpa [#allocation4], 1 }

// kernel: img2vec_forward.10
= control target key start
LH: loop header
LB: loop body
LE: loop exit
PB: predicated region body
PF: predicated region fallthrough
CT: control target
= control target key end

     0   :  { %10 = vsyncpa [#allocation3], 0  ;;  %s809_s0 = inlined_call_operand.hbm [shape: bf16[32,128], index: 0, kind: input, shape index: {}]   ;;  %s810_s1 = inlined_call_operand.hbm [shape: bf16[128,256], index: 1, kind: input, shape index: {}]   ;;  %s811_s2 = inlined_call_operand.hbm [shape: bf16[32,64], index: 2, kind: input, shape index: {}]   ;;  %s812_s3 = inlined_call_operand.hbm [shape: bf16[64,256], index: 3, kind: input, shape index: {}]   ;;  %s813_s4 = inlined_call_operand.hbm [shape: f32[1,256], index: 4, kind: input, shape index: {}]   ;;  %s814_s5 = inlined_call_operand.hbm [shape: bf16[32,256], index: 5, kind: output, shape index: {}]  }
   0x1   :  { %11 = vsyncpa [#allocation6], 0 }
   0x2   :  { %12 = vsyncpa [#allocation9], 0 }
   0x3   :  { %13 = vsyncpa [#allocation4], 0  ;;  %s687_s18 = smov [#allocation5]   ;;  %s547_s22 = scalar_lea.hbm %s810_s1, 2048 }
   0x4   :  { %s31_s19 = sshll.u32 %s687_s18, 4  ;;  %p548_p0 = scmp.ne.s32.totalorder %s810_s1, %s547_s22  ;;  %s32_s19 = int_to_ptr.vmem [resolvable:$true] %s31_s19 }
   0x5   :  { %p551_p1 = scmp.lt.u32.totalorder %s547_s22, %s810_s1 }
   0x7   :  { %p553_p2 = pnand %p551_p1, %p548_p0 }
   0x9   :  { %556 = shalt.err (!%p553_p2)
}
   0xa   :  { %s557_s27 = scalar_lea.vmem %s32_s19, 2048  ;;  %p562_p4 = scmp.lt.s32.totalorder %s32_s19, %s32_s19 }
   0xb   :  { %p558_p3 = scmp.ne.s32.totalorder %s32_s19, %s557_s27  ;;  %p563_p5 = scmp.lt.s32.totalorder %s557_s27, %s557_s27 }
   0xd   :  { %p564_p6 = por %p563_p5, %p562_p4 }
   0xf   :  { %p565_p7 = pnand %p564_p6, %p558_p3 }
  0x11   :  { %568 = shalt.err (!%p565_p7)
}
  0x12   :  { %s688_s28 = smov 128   ;;  %s689_s29 = smov 8  }
  0x13   :  { %37 = dma.hbm_to_vmem [thread:$0]  %s810_s1, 2048, %s32_s19, [#allocation6], %s688_s28, %s688_s28, %s689_s29  }
  0x14   :  { %s690_s7 = smov [#allocation8]   ;;  %s691_s9 = smov [#allocation2]  }
  0x15   :  { %s55_s8 = sshll.u32 %s690_s7, 4  ;;  %s19_s10 = sshll.u32 %s691_s9, 4  ;;  %s56_s8 = int_to_ptr.vmem [resolvable:$true] %s55_s8  ;;  %s20_s10 = int_to_ptr.vmem [resolvable:$true] %s19_s10 }
  0x16   :  { %s569_s13 = scalar_lea.hbm %s812_s3, 1024 }
  0x17   :  { %p570_p8 = scmp.ne.s32.totalorder %s812_s3, %s569_s13  ;;  %p573_p9 = scmp.lt.u32.totalorder %s569_s13, %s812_s3 }
  0x19   :  { %p575_p10 = pnand %p573_p9, %p570_p8 }
  0x1b   :  { %578 = shalt.err (!%p575_p10)
}
  0x1c   :  { %s579_s1 = scalar_lea.vmem %s56_s8, 1024  ;;  %p584_p12 = scmp.lt.s32.totalorder %s56_s8, %s56_s8 }
  0x1d   :  { %p580_p11 = scmp.ne.s32.totalorder %s56_s8, %s579_s1  ;;  %p585_p13 = scmp.lt.s32.totalorder %s579_s1, %s579_s1 }
  0x1f   :  { %p586_p0 = por %p585_p13, %p584_p12 }
  0x21   :  { %p587_p1 = pnand %p586_p0, %p580_p11 }
  0x23   :  { %590 = shalt.err (!%p587_p1)
}
  0x24   :  { %61 = dma.hbm_to_vmem [thread:$0]  %s812_s3, 1024, %s56_s8, [#allocation9], %s688_s28, %s688_s28, %s689_s29  }
  0x25   :  { %s591_s22 = scalar_lea.hbm %s809_s0, 256 }
  0x26   :  { %p592_p2 = scmp.ne.s32.totalorder %s809_s0, %s591_s22  ;;  %p595_p3 = scmp.lt.u32.totalorder %s591_s22, %s809_s0 }
  0x28   :  { %p597_p4 = pnand %p595_p3, %p592_p2 }
  0x2a   :  { %600 = shalt.err (!%p597_p4)
}
  0x2b   :  { %s601_s27 = scalar_lea.vmem %s20_s10, 256  ;;  %p606_p6 = scmp.lt.s32.totalorder %s20_s10, %s20_s10 }
  0x2c   :  { %p602_p5 = scmp.ne.s32.totalorder %s20_s10, %s601_s27  ;;  %p607_p7 = scmp.lt.s32.totalorder %s601_s27, %s601_s27 }
  0x2e   :  { %p608_p8 = por %p607_p7, %p606_p6 }
  0x30   :  { %p609_p9 = pnand %p608_p8, %p602_p5 }
  0x32   :  { %612 = shalt.err (!%p609_p9)
}
  0x33   :  { %s692_s3 = smov 64   ;;  %s693_s30 = smov 4  }
  0x34   :  { %25 = dma.hbm_to_vmem [thread:$0]  %s809_s0, 256, %s20_s10, [#allocation3], %s692_s3, %s692_s3, %s693_s30  }
  0x35   :  { %s694_s8 = smov [#allocation7]   ;;  %s695_s11 = smov [#allocation10]  }
  0x36   :  { %s43_s9 = sshll.u32 %s694_s8, 4  ;;  %s68_s12 = sshll.u32 %s695_s11, 4  ;;  %s44_s9 = int_to_ptr.vmem [resolvable:$true] %s43_s9  ;;  %s69_s12 = int_to_ptr.vmem [resolvable:$true] %s68_s12 }
  0x37   :  { %s613_s15 = scalar_lea.hbm %s811_s2, 256 }
  0x38   :  { %p614_p10 = scmp.ne.s32.totalorder %s811_s2, %s613_s15  ;;  %p617_p11 = scmp.lt.u32.totalorder %s613_s15, %s811_s2 }
  0x3a   :  { %p619_p12 = pnand %p617_p11, %p614_p10 }
  0x3c   :  { %622 = shalt.err (!%p619_p12)
}
  0x3d   :  { %s623_s0 = scalar_lea.vmem %s44_s9, 256  ;;  %p628_p0 = scmp.lt.s32.totalorder %s44_s9, %s44_s9 }
  0x3e   :  { %p624_p13 = scmp.ne.s32.totalorder %s44_s9, %s623_s0  ;;  %p629_p1 = scmp.lt.s32.totalorder %s623_s0, %s623_s0 }
  0x40   :  { %p630_p2 = por %p629_p1, %p628_p0 }
  0x42   :  { %p631_p3 = pnand %p630_p2, %p624_p13 }
  0x44   :  { %634 = shalt.err (!%p631_p3)
}
  0x45   :  { %49 = dma.hbm_to_vmem [thread:$0]  %s811_s2, 256, %s44_s9, [#allocation6], %s692_s3, %s692_s3, %s693_s30  }
  0x46   :  { %s635_s22 = scalar_lea.hbm %s813_s4, 32 }
  0x47   :  { %p636_p4 = scmp.ne.s32.totalorder %s813_s4, %s635_s22  ;;  %p639_p5 = scmp.lt.u32.totalorder %s635_s22, %s813_s4 }
  0x49   :  { %p641_p6 = pnand %p639_p5, %p636_p4 }
  0x4b   :  { %644 = shalt.err (!%p641_p6)
}
  0x4c   :  { %s645_s27 = scalar_lea.vmem %s69_s12, 32  ;;  %p650_p8 = scmp.lt.s32.totalorder %s69_s12, %s69_s12 }
  0x4d   :  { %p646_p7 = scmp.ne.s32.totalorder %s69_s12, %s645_s27  ;;  %p651_p9 = scmp.lt.s32.totalorder %s645_s27, %s645_s27 }
  0x4f   :  { %p652_p10 = por %p651_p9, %p650_p8 }
  0x51   :  { %p653_p11 = pnand %p652_p10, %p646_p7 }
  0x53   :  { %656 = shalt.err (!%p653_p11)
}
  0x54   :  { %71 = dma.hbm_to_vmem [thread:$0]  %s813_s4, 32, %s69_s12, [#allocation9]  }
  0x55   :  { %679 = dma.done.wait [#allocation3], 256  }
  0x56   :  { %680 = vsyncadd [#allocation3], 4294967040 }
  0x57   :  { %681 = dma.done.wait [#allocation6], 2304  }
  0x58   :  { %682 = vsyncadd [#allocation6], 4294964992 }
  0x59   :  { %683 = dma.done.wait [#allocation9], 1056  }
  0x5a   :  { %684 = vsyncadd [#allocation9], 4294966240  ;;  %v696_v0 = vmov 0   ;;  %v507_v1 = vld [vmem:[#allocation5 + $0x4] ss:$8 sps:$4 sm:$0xff]   ;;  %vm170_vm0 = vcmask 523264   ;;  %v377_v29 = vlaneseq }
  0x5b   :  { %209 = vmatprep.mubr.bf16.mxu1 %v696_v0  ;;  %354 = vmatprep.mubr.bf16.mxu0 %v696_v0  ;;  %v509_v2 = vld [vmem:[#allocation5] ss:$8 sps:$4 sm:$0xff]   ;;  %v510_v3 = vld [vmem:[#allocation5 + $0x14] ss:$8 sps:$4 sm:$0xff]   ;;  %v512_v4 = vld [vmem:[#allocation5 + $0x10] ss:$8 sps:$4 sm:$0xff]  }
  0x5c   :  { %322 = vmatprep.subr.bf16.mxu0 %v507_v1  ;;  %v513_v5 = vld [vmem:[#allocation5 + $0x24] ss:$8 sps:$4 sm:$0xff]   ;;  %v518_v6 = vld [vmem:[#allocation8 + $0x4] ss:$8 sps:$4 sm:$0xff]   ;;  %v521_v7 = vld [vmem:[#allocation8] ss:$8 sps:$4 sm:$0xff]  }
  0x5d   :  { %323 = vmatpush1.bf16.msra.mxu0 %v509_v2  ;;  %v515_v8 = vld [vmem:[#allocation5 + $0x20] ss:$8 sps:$4 sm:$0xff]   ;;  %177 = vmatprep.subr.bf16.mxu1 %v518_v6  ;;  %v516_v9 = vld [vmem:[#allocation5 + $0x34] ss:$8 sps:$4 sm:$0xff]   ;;  %v524_v10 = vld [vmem:[#allocation8 + $0x14] ss:$8 sps:$4 sm:$0xff]  }
  0x5e   :  { %324 = vmatprep.subr.bf16.mxu0 %v510_v3  ;;  %178 = vmatpush1.bf16.msra.mxu1 %v521_v7  ;;  %v527_v11 = vld [vmem:[#allocation8 + $0x10] ss:$8 sps:$4 sm:$0xff]   ;;  %v520_v12 = vld [vmem:[#allocation5 + $0x30] ss:$8 sps:$4 sm:$0xff]   ;;  %v522_v13 = vld [vmem:[#allocation5 + $0x44] ss:$8 sps:$4 sm:$0xff]  }
  0x5f   :  { %179 = vmatprep.subr.bf16.mxu1 %v524_v10  ;;  %v530_v14 = vld [vmem:[#allocation8 + $0x24] ss:$8 sps:$4 sm:$0xff]   ;;  %v533_v15 = vld [vmem:[#allocation8 + $0x20] ss:$8 sps:$4 sm:$0xff]   ;;  %v536_v16 = vld [vmem:[#allocation8 + $0x34] ss:$8 sps:$4 sm:$0xff]  }
  0x60   :  { %v526_v17 = vld [vmem:[#allocation5 + $0x40] ss:$8 sps:$4 sm:$0xff]   ;;  %v528_v18 = vld [vmem:[#allocation5 + $0x54] ss:$8 sps:$4 sm:$0xff]   ;;  %v532_v20 = vld [vmem:[#allocation5 + $0x50] ss:$8 sps:$4 sm:$0xff]  }
  0x61   :  { %325 = vmatpush1.bf16.msra.mxu0 %v512_v4  ;;  %v539_v19 = vld [vmem:[#allocation8 + $0x30] ss:$8 sps:$4 sm:$0xff]   ;;  %v534_v22 = vld [vmem:[#allocation5 + $0x64] ss:$8 sps:$4 sm:$0xff]   ;;  %v540_v24 = vld [vmem:[#allocation5 + $0x74] ss:$8 sps:$4 sm:$0xff]  }
  0x62   :  { %326 = vmatprep.subr.bf16.mxu0 %v513_v5  ;;  %180 = vmatpush1.bf16.msra.mxu1 %v527_v11  ;;  %v542_v21 = vld [vmem:[#allocation7] sm:$0xff]   ;;  %v543_v25 = vld [vmem:[#allocation5 + $0x70] ss:$8 sps:$4 sm:$0xff]   ;;  %v545_v26 = vld [vmem:[#allocation7 + $0x8] sm:$0xff]   ;;  %v378_v33 = vshrl.u32 %v377_v29, 7  ;;  %s697_s4 = smov [#allocation11]  }
  0x63   :  { %181 = vmatprep.subr.bf16.mxu1 %v530_v14  ;;  %v538_v23 = vld [vmem:[#allocation5 + $0x60] ss:$8 sps:$4 sm:$0xff]   ;;  %v544_v27 = vld [vmem:[#allocation2] sm:$0xff]   ;;  %v546_v28 = vld [vmem:[#allocation2 + $0x8] sm:$0xff]   ;;  %s436_s30 = sshll.u32 %s697_s4, 4  ;;  %s437_s30 = int_to_ptr.vmem [resolvable:$true] %s436_s30 }
  0x64   :  { %v379_v35 = vsub.s32 0, %v378_v33  ;;  %v375_v36 = vld [vmem:[#allocation10] sm:$0x3]  ;;  %v383_v37 = vsub.s32 1, %v378_v33  ;;  %s657_s6 = scalar_lea.vmem %s437_s30, 512  ;;  %p662_p13 = scmp.lt.s32.totalorder %s437_s30, %s437_s30 }
  0x65   :  { %327 = vmatpush1.bf16.msra.mxu0 %v515_v8  ;;  %p658_p12 = scmp.ne.s32.totalorder %s437_s30, %s657_s6  ;;  %p663_p0 = scmp.lt.s32.totalorder %s657_s6, %s657_s6 }
  0x66   :  { %328 = vmatprep.subr.bf16.mxu0 %v516_v9  ;;  %182 = vmatpush1.bf16.msra.mxu1 %v533_v15  ;;  %v380_v40 = vrot.slane %v375_v36, %v379_v35  ;;  %v384_v43 = vrot.slane %v375_v36, %v383_v37 }
  0x67   :  { %183 = vmatprep.subr.bf16.mxu1 %v536_v16  ;;  %p664_p1 = por %p663_p0, %p662_p13 }
  0x69   :  { %329 = vmatpush1.bf16.msra.mxu0 %v520_v12  ;;  %p665_p2 = pnand %p664_p1, %p658_p12 }
  0x6a   :  { %330 = vmatprep.subr.bf16.mxu0 %v522_v13  ;;  %184 = vmatpush1.bf16.msra.mxu1 %v539_v19 }
  0x6d   :  { %331 = vmatpush1.bf16.msra.mxu0 %v526_v17  ;;  %460 = vmatmul.mubr.msk.bf16.vlgmr.msra.gmra.mrb[0].mxu1 %vm170_vm0, %v542_v21 }
  0x6e   :  { %332 = vmatprep.subr.bf16.mxu0 %v528_v18  ;;  %219 = vmatprep.mubr.bf16.mxu1 %v696_v0 }
  0x71   :  { %333 = vmatpush1.bf16.msra.mxu0 %v532_v20 }
  0x72   :  { %334 = vmatprep.subr.bf16.mxu0 %v534_v22 }
  0x75   :  { %335 = vmatpush1.bf16.msra.mxu0 %v538_v23  ;;  %461 = vmatmul.mubr.msk.bf16.gmra.mrb[4].mxu1 %vm170_vm0, %v545_v26 }
  0x76   :  { %336 = vmatprep.subr.bf16.mxu0 %v540_v24 }
  0x79   :  { %337 = vmatpush1.bf16.msra.mxu0 %v543_v25 }
  0x7c   :  { %355 = vmatmul.mubr.bf16.vlgmr.msra.gmra.mrb[0].mxu0 %v544_v27 }
  0x7d   :  { %364 = vmatprep.mubr.bf16.mxu0 %v696_v0 }
  0x84   :  { %365 = vmatmul.mubr.bf16.gmra.mrb[4].mxu0 %v546_v28 }
 0x140   :  { %v211_v30 = vpop.f32.mrb[0].mxu1 }
 0x141   :  { %v213_v31 = vpop.f32.mrb[1].mxu1 }
 0x142   :  { %v215_v32 = vpop.f32.mrb[2].mxu1 }
 0x143   :  { %v217_v34 = vpop.f32.mrb[3].mxu1 }
 0x148   :  { %v221_v38 = vpop.f32.mrb[4].mxu1 }
 0x149   :  { %v223_v39 = vpop.f32.mrb[5].mxu1 }
 0x14a   :  { %v225_v41 = vpop.f32.mrb[6].mxu1 }
 0x14b   :  { %v227_v44 = vpop.f32.mrb[7].mxu1 }
 0x14f   :  { %v356_v42 = vpop.f32.mrb[0].mxu0 }
 0x150   :  { %v357_v45 = vadd.f32 %v356_v42, %v211_v30  ;;  %v358_v46 = vpop.f32.mrb[1].mxu0 }
 0x151   :  { %v359_v47 = vadd.f32 %v358_v46, %v213_v31  ;;  %v360_v48 = vpop.f32.mrb[2].mxu0 }
 0x152   :  { %v387_v49 = vadd.f32 %v380_v40, %v357_v45  ;;  %v361_v50 = vadd.f32 %v360_v48, %v215_v32  ;;  %v362_v51 = vpop.f32.mrb[3].mxu0 }
 0x153   :  { %v388_v52 = vadd.f32 %v384_v43, %v359_v47  ;;  %v363_v53 = vadd.f32 %v362_v51, %v217_v34 }
 0x154   :  { %v395_v54 = vmax.f32 %v387_v49, 0.0  ;;  %v389_v55 = vadd.f32 %v380_v40, %v361_v50 }
 0x155   :  { %v396_v56 = vmax.f32 %v388_v52, 0.0  ;;  %v390_v57 = vadd.f32 %v384_v43, %v363_v53 }
 0x156   :  { %v397_v58 = vmax.f32 %v389_v55, 0.0 }
 0x157   :  { %v484_v59 = vpack.c.bf16 %v396_v56, %v395_v54  ;;  %v398_v60 = vmax.f32 %v390_v57, 0.0  ;;  %v366_v61 = vpop.f32.mrb[4].mxu0 }
 0x158   :  { %v367_v62 = vadd.f32 %v366_v61, %v221_v38  ;;  %v368_v63 = vpop.f32.mrb[5].mxu0 }
 0x159   :  { %427 = vst [vmem:[#allocation11] sm:$0xff] %v484_v59  ;;  %v485_v0 = vpack.c.bf16 %v398_v60, %v397_v58  ;;  %v369_v1 = vadd.f32 %v368_v63, %v223_v39  ;;  %v370_v2 = vpop.f32.mrb[6].mxu0 }
 0x15a   :  { %v391_v3 = vadd.f32 %v380_v40, %v367_v62  ;;  %v371_v4 = vadd.f32 %v370_v2, %v225_v41  ;;  %v372_v5 = vpop.f32.mrb[7].mxu0 }
 0x15b   :  { %428 = vst [vmem:[#allocation11 + $0x8] sm:$0xff] %v485_v0  ;;  %v392_v6 = vadd.f32 %v384_v43, %v369_v1  ;;  %v373_v7 = vadd.f32 %v372_v5, %v227_v44 }
 0x15c   :  { %v399_v8 = vmax.f32 %v391_v3, 0.0  ;;  %v393_v9 = vadd.f32 %v380_v40, %v371_v4 }
 0x15d   :  { %v400_v10 = vmax.f32 %v392_v6, 0.0  ;;  %v394_v11 = vadd.f32 %v384_v43, %v373_v7 }
 0x15e   :  { %v401_v12 = vmax.f32 %v393_v9, 0.0 }
 0x15f   :  { %v486_v13 = vpack.c.bf16 %v400_v10, %v399_v8  ;;  %v402_v14 = vmax.f32 %v394_v11, 0.0 }
 0x161   :  { %429 = vst [vmem:[#allocation11 + $0x10] sm:$0xff] %v486_v13  ;;  %v487_v15 = vpack.c.bf16 %v402_v14, %v401_v12 }
 0x163   :  { %430 = vst [vmem:[#allocation11 + $0x18] sm:$0xff] %v487_v15 }
 0x164   :  { %668 = shalt.err (!%p665_p2)
}
 0x165   :  { %s669_s9 = scalar_lea.hbm %s814_s5, 512 }
 0x166   :  { %p670_p3 = scmp.ne.s32.totalorder %s814_s5, %s669_s9  ;;  %p673_p4 = scmp.lt.u32.totalorder %s669_s9, %s814_s5 }
 0x168   :  { %p675_p5 = pnand %p673_p4, %p670_p3 }
 0x16a   :  { %678 = shalt.err (!%p675_p5)
}
 0x16b   :  { %442 = dma.vmem_to_hbm [thread:$0]  %s437_s30, 512, %s814_s5, [#allocation4], %s688_s28, %s688_s28, %s689_s29  }
 0x16c   :  { %685 = dma.done.wait [#allocation4], 512  }
 0x16d   :  { %686 = vsyncadd [#allocation4], 4294966784 }
 0x16e   :  { %446 = vsyncpa [#allocation3], 1 }
 0x16f   :  { %447 = vsyncpa [#allocation6], 1 }
 0x170   :  { %448 = vsyncpa [#allocation9], 1 }
 0x171   :  { %449 = vsyncpa [#allocation4], 1 }

// kernel: img2vec_forward.11
= control target key start
LH: loop header
LB: loop body
LE: loop exit
PB: predicated region body
PF: predicated region fallthrough
CT: control target
= control target key end

     0   :  { %7 = vsyncpa [#allocation3], 0  ;;  %s414_s0 = inlined_call_operand.hbm [shape: bf16[2,16,256], index: 0, kind: input, shape index: {}]   ;;  %s415_s1 = inlined_call_operand.hbm [shape: f32[256,64], index: 1, kind: input, shape index: {}]   ;;  %s416_s2 = inlined_call_operand.hbm [shape: f32[2,64], index: 2, kind: output, shape index: {}]  }
   0x1   :  { %8 = vsyncpa [#allocation6], 0 }
   0x2   :  { %9 = vsyncpa [#allocation4], 0  ;;  %s358_s9 = smov [#allocation2]   ;;  %s286_s13 = scalar_lea.hbm %s414_s0, 512 }
   0x3   :  { %s15_s10 = sshll.u32 %s358_s9, 4  ;;  %p287_p0 = scmp.ne.s32.totalorder %s414_s0, %s286_s13  ;;  %s16_s10 = int_to_ptr.vmem [resolvable:$true] %s15_s10 }
   0x4   :  { %p290_p1 = scmp.lt.u32.totalorder %s286_s13, %s414_s0 }
   0x6   :  { %p292_p2 = pnand %p290_p1, %p287_p0 }
   0x8   :  { %295 = shalt.err (!%p292_p2)
}
   0x9   :  { %s296_s18 = scalar_lea.vmem %s16_s10, 512  ;;  %p301_p4 = scmp.lt.s32.totalorder %s16_s10, %s16_s10 }
   0xa   :  { %p297_p3 = scmp.ne.s32.totalorder %s16_s10, %s296_s18  ;;  %p302_p5 = scmp.lt.s32.totalorder %s296_s18, %s296_s18 }
   0xc   :  { %p303_p6 = por %p302_p5, %p301_p4 }
   0xe   :  { %p304_p7 = pnand %p303_p6, %p297_p3 }
  0x10   :  { %307 = shalt.err (!%p304_p7)
}
  0x11   :  { %s359_s19 = smov 128   ;;  %s360_s20 = smov 8  }
  0x12   :  { %21 = dma.hbm_to_vmem [thread:$0]  %s414_s0, 512, %s16_s10, [#allocation3], %s359_s19, %s359_s19, %s360_s20  }
  0x13   :  { %s361_s23 = smov [#allocation5]   ;;  %s308_s27 = scalar_lea.hbm %s415_s1, 4096 }
  0x14   :  { %s27_s24 = sshll.u32 %s361_s23, 4  ;;  %p309_p8 = scmp.ne.s32.totalorder %s415_s1, %s308_s27  ;;  %s28_s24 = int_to_ptr.vmem [resolvable:$true] %s27_s24 }
  0x15   :  { %p312_p9 = scmp.lt.u32.totalorder %s308_s27, %s415_s1 }
  0x17   :  { %p314_p10 = pnand %p312_p9, %p309_p8 }
  0x19   :  { %317 = shalt.err (!%p314_p10)
}
  0x1a   :  { %s318_s4 = scalar_lea.vmem %s28_s24, 4096  ;;  %p323_p12 = scmp.lt.s32.totalorder %s28_s24, %s28_s24 }
  0x1b   :  { %p319_p11 = scmp.ne.s32.totalorder %s28_s24, %s318_s4  ;;  %p324_p13 = scmp.lt.s32.totalorder %s318_s4, %s318_s4 }
  0x1d   :  { %p325_p0 = por %p324_p13, %p323_p12 }
  0x1f   :  { %p326_p1 = pnand %p325_p0, %p319_p11 }
  0x21   :  { %329 = shalt.err (!%p326_p1)
}
  0x22   :  { %33 = dma.hbm_to_vmem [thread:$0]  %s415_s1, 4096, %s28_s24, [#allocation6], %s359_s19, %s359_s19, %s360_s20  }
  0x23   :  { %352 = dma.done.wait [#allocation3], 512  }
  0x24   :  { %353 = vsyncadd [#allocation3], 4294966784 }
  0x25   :  { %354 = dma.done.wait [#allocation6], 4096  }
  0x26   :  { %355 = vsyncadd [#allocation6], 4294963200  ;;  %v101_v0 = vld [vmem:[#allocation5 + $0x80] sm:$0xff]  ;;  %v102_v1 = vld [vmem:[#allocation5 + $0x88] sm:$0xff]  ;;  %vm121_vm0 = vcmask 1041409   ;;  %s362_s1 = smov [#allocation7]  }
  0x27   :  { %v85_v2 = vld [vmem:[#allocation5] sm:$0xff]  ;;  %v249_v3 = vpack.c.bf16 %v102_v1, %v101_v0  ;;  %v86_v4 = vld [vmem:[#allocation5 + $0x8] sm:$0xff]  ;;  %v103_v5 = vld [vmem:[#allocation5 + $0x90] sm:$0xff]  ;;  %s204_s6 = sshll.u32 %s362_s1, 4  ;;  %vm196_vm1 = vcmask 517120   ;;  %s205_s6 = int_to_ptr.vmem [resolvable:$true] %s204_s6 }
  0x28   :  { %v104_v6 = vld [vmem:[#allocation5 + $0x98] sm:$0xff]  ;;  %v251_v7 = vpack.c.bf16 %v86_v4, %v85_v2  ;;  %v87_v9 = vld [vmem:[#allocation5 + $0x10] sm:$0xff]  ;;  %v105_v11 = vld [vmem:[#allocation5 + $0xa0] sm:$0xff]  ;;  %s330_s7 = scalar_lea.vmem %s205_s6, 32  ;;  %p335_p3 = scmp.lt.s32.totalorder %s205_s6, %s205_s6 }
  0x29   :  { %v253_v8 = vpack.c.bf16 %v104_v6, %v103_v5  ;;  %v88_v10 = vld [vmem:[#allocation5 + $0x18] sm:$0xff]  ;;  %250 = vmatprep.subr.bf16.mxu0 %v249_v3  ;;  %v106_v12 = vld [vmem:[#allocation5 + $0xa8] sm:$0xff]  ;;  %v89_v15 = vld [vmem:[#allocation5 + $0x20] sm:$0xff]  ;;  %p331_p2 = scmp.ne.s32.totalorder %s205_s6, %s330_s7  ;;  %p336_p4 = scmp.lt.s32.totalorder %s330_s7, %s330_s7 }
  0x2a   :  { %252 = vmatpush3.bf16.msra.mxu0 %v251_v7  ;;  %v255_v13 = vpack.c.bf16 %v88_v10, %v87_v9  ;;  %v257_v14 = vpack.c.bf16 %v106_v12, %v105_v11  ;;  %v90_v16 = vld [vmem:[#allocation5 + $0x28] sm:$0xff]  ;;  %v107_v17 = vld [vmem:[#allocation5 + $0xb0] sm:$0xff]  ;;  %v108_v18 = vld [vmem:[#allocation5 + $0xb8] sm:$0xff] }
  0x2b   :  { %254 = vmatprep.subr.bf16.mxu0 %v253_v8  ;;  %v259_v19 = vpack.c.bf16 %v90_v16, %v89_v15  ;;  %v91_v20 = vld [vmem:[#allocation5 + $0x30] sm:$0xff]  ;;  %v92_v21 = vld [vmem:[#allocation5 + $0x38] sm:$0xff]  ;;  %v261_v22 = vpack.c.bf16 %v108_v18, %v107_v17  ;;  %v109_v23 = vld [vmem:[#allocation5 + $0xc0] sm:$0xff]  ;;  %p337_p5 = por %p336_p4, %p335_p3 }
  0x2c   :  { %v110_v24 = vld [vmem:[#allocation5 + $0xc8] sm:$0xff]  ;;  %v40_v25 = vld [vmem:[#allocation2] sm:$0xff]  ;;  %v263_v26 = vpack.c.bf16 %v92_v21, %v91_v20  ;;  %v42_v28 = vld [vmem:[#allocation2 + $0x10] sm:$0xff] }
  0x2d   :  { %v41_v27 = vld [vmem:[#allocation2 + $0x8] sm:$0xff]  ;;  %v43_v29 = vld [vmem:[#allocation2 + $0x18] sm:$0xff]  ;;  %v45_v30 = vunpack.c.h.bf16 %v40_v25  ;;  %v44_v31 = vunpack.c.l.bf16 %v40_v25  ;;  %v49_v33 = vunpack.c.h.bf16 %v42_v28  ;;  %v265_v36 = vpack.c.bf16 %v110_v24, %v109_v23  ;;  %v93_v37 = vld [vmem:[#allocation5 + $0x40] sm:$0xff]  ;;  %p338_p6 = pnand %p337_p5, %p331_p2 }
  0x2e   :  { %256 = vmatpush3.bf16.msra.mxu0 %v255_v13  ;;  %v47_v32 = vunpack.c.h.bf16 %v41_v27  ;;  %v51_v34 = vunpack.c.h.bf16 %v43_v29  ;;  %v46_v35 = vunpack.c.l.bf16 %v41_v27  ;;  %v94_v38 = vld [vmem:[#allocation5 + $0x48] sm:$0xff]  ;;  %v48_v39 = vunpack.c.l.bf16 %v42_v28  ;;  %v111_v41 = vld [vmem:[#allocation5 + $0xd0] sm:$0xff]  ;;  %v112_v42 = vld [vmem:[#allocation5 + $0xd8] sm:$0xff] }
  0x2f   :  { %258 = vmatprep.subr.bf16.mxu0 %v257_v14  ;;  %v50_v40 = vunpack.c.l.bf16 %v43_v29  ;;  %v267_v47 = vpack.c.bf16 %v94_v38, %v93_v37  ;;  %v269_v51 = vpack.c.bf16 %v112_v42, %v111_v41  ;;  %v95_v52 = vld [vmem:[#allocation5 + $0x50] sm:$0xff]  ;;  %v96_v53 = vld [vmem:[#allocation5 + $0x58] sm:$0xff]  ;;  %v113_v55 = vld [vmem:[#allocation5 + $0xe0] sm:$0xff] }
  0x30   :  { %v59_v43 = vadd.f32 %v47_v32, %v45_v30  ;;  %v73_v44 = vadd.f32 %v51_v34, %v49_v33  ;;  %v52_v45 = vadd.f32 %v46_v35, %v44_v31  ;;  %v114_v56 = vld [vmem:[#allocation5 + $0xe8] sm:$0xff]  ;;  %v271_v61 = vpack.c.bf16 %v96_v53, %v95_v52  ;;  %v97_v2 = vld [vmem:[#allocation5 + $0x60] sm:$0xff]  ;;  %v115_v5 = vld [vmem:[#allocation5 + $0xf0] sm:$0xff] }
  0x31   :  { %v66_v46 = vadd.f32 %v50_v40, %v48_v39  ;;  %v273_v1 = vpack.c.bf16 %v114_v56, %v113_v55  ;;  %v98_v3 = vld [vmem:[#allocation5 + $0x68] sm:$0xff]  ;;  %v116_v6 = vld [vmem:[#allocation5 + $0xf8] sm:$0xff]  ;;  %v99_v16 = vld [vmem:[#allocation5 + $0x70] sm:$0xff] }
  0x32   :  { %260 = vmatpush3.bf16.msra.mxu0 %v259_v19  ;;  %v60_v48 = vrot.slane %v59_v43, 4  ;;  %v74_v49 = vrot.slane %v73_v44, 4  ;;  %v53_v50 = vrot.slane %v52_v45, 4  ;;  %v275_v11 = vpack.c.bf16 %v98_v3, %v97_v2  ;;  %v100_v17 = vld [vmem:[#allocation5 + $0x78] sm:$0xff] }
  0x33   :  { %262 = vmatprep.subr.bf16.mxu0 %v261_v22  ;;  %v67_v54 = vrot.slane %v66_v46, 4  ;;  %v277_v15 = vpack.c.bf16 %v116_v6, %v115_v5  ;;  %v279_v23 = vpack.c.bf16 %v100_v17, %v99_v16 }
  0x34   :  { %v61_v57 = vadd.f32 %v60_v48, %v59_v43  ;;  %v75_v58 = vadd.f32 %v74_v49, %v73_v44  ;;  %v54_v59 = vadd.f32 %v53_v50, %v52_v45 }
  0x35   :  { %v68_v60 = vadd.f32 %v67_v54, %v66_v46 }
  0x36   :  { %264 = vmatpush3.bf16.msra.mxu0 %v263_v26  ;;  %v62_v62 = vrot.slane %v61_v57, 2  ;;  %v76_v63 = vrot.slane %v75_v58, 2  ;;  %v55_v0 = vrot.slane %v54_v59, 2 }
  0x37   :  { %266 = vmatprep.subr.bf16.mxu0 %v265_v36  ;;  %v69_v4 = vrot.slane %v68_v60, 2 }
  0x38   :  { %v63_v7 = vadd.f32 %v62_v62, %v61_v57  ;;  %v77_v8 = vadd.f32 %v76_v63, %v75_v58  ;;  %v56_v9 = vadd.f32 %v55_v0, %v54_v59 }
  0x39   :  { %v70_v10 = vadd.f32 %v69_v4, %v68_v60 }
  0x3a   :  { %268 = vmatpush3.bf16.msra.mxu0 %v267_v47  ;;  %v64_v12 = vrot.slane %v63_v7, 1  ;;  %v78_v13 = vrot.slane %v77_v8, 1  ;;  %v57_v14 = vrot.slane %v56_v9, 1 }
  0x3b   :  { %270 = vmatprep.subr.bf16.mxu0 %v269_v51  ;;  %v71_v18 = vrot.slane %v70_v10, 1 }
  0x3c   :  { %v65_v19 = vadd.f32 %v64_v12, %v63_v7  ;;  %v79_v20 = vadd.f32 %v78_v13, %v77_v8  ;;  %v58_v21 = vadd.f32 %v57_v14, %v56_v9 }
  0x3d   :  { %v72_v22 = vadd.f32 %v71_v18, %v70_v10 }
  0x3e   :  { %272 = vmatpush3.bf16.msra.mxu0 %v271_v61  ;;  %v82_v24 = vmul.f32 0.0625, %v65_v19  ;;  %v84_v25 = vmul.f32 0.0625, %v79_v20  ;;  %v81_v26 = vmul.f32 0.0625, %v58_v21 }
  0x3f   :  { %274 = vmatprep.subr.bf16.mxu0 %v273_v1  ;;  %v83_v27 = vmul.f32 0.0625, %v72_v22 }
  0x40   :  { %v123_v28 = vsel %vm121_vm0, %v84_v25, %v82_v24 }
  0x41   :  { %190 = vmatprep.mubr.f32.mxu0 %v123_v28  ;;  %v122_v29 = vsel %vm121_vm0, %v83_v27, %v81_v26 }
  0x42   :  { %276 = vmatpush3.bf16.msra.mxu0 %v275_v11 }
  0x43   :  { %278 = vmatprep.subr.bf16.mxu0 %v277_v15 }
  0x46   :  { %280 = vmatpush3.bf16.msra.mxu0 %v279_v23 }
  0x49   :  { %191 = vmatmul.mubr.f32.vlgmr.msra.gmra.mrb[0].mxu0 %v122_v29 }
 0x11c   :  { %v246_v30 = vpop.f32.mrb[0].mxu0 }
 0x11d   :  { %v247_v31 = vpop.f32.mrb[1].mxu0 }
 0x11e   :  { %v248_v32 = vadd.f32 %v247_v31, %v246_v30 }
 0x120   :  { %197 = vst.msk [vmem:[#allocation7] sm:$0x3] %vm196_vm1, %v248_v32 }
 0x121   :  { %341 = shalt.err (!%p338_p6)
}
 0x122   :  { %s342_s10 = scalar_lea.hbm %s416_s2, 32 }
 0x123   :  { %p343_p7 = scmp.ne.s32.totalorder %s416_s2, %s342_s10  ;;  %p346_p8 = scmp.lt.u32.totalorder %s342_s10, %s416_s2 }
 0x125   :  { %p348_p9 = pnand %p346_p8, %p343_p7 }
 0x127   :  { %351 = shalt.err (!%p348_p9)
}
 0x128   :  { %207 = dma.vmem_to_hbm [thread:$0]  %s205_s6, 32, %s416_s2, [#allocation4]  }
 0x129   :  { %356 = dma.done.wait [#allocation4], 32  }
 0x12a   :  { %357 = vsyncadd [#allocation4], 4294967264 }
 0x12b   :  { %211 = vsyncpa [#allocation3], 1 }
 0x12c   :  { %212 = vsyncpa [#allocation6], 1 }
 0x12d   :  { %213 = vsyncpa [#allocation4], 1 }

// kernel: img2vec_forward.9
= control target key start
LH: loop header
LB: loop body
LE: loop exit
PB: predicated region body
PF: predicated region fallthrough
CT: control target
= control target key end

     0   :  { %8 = vsyncpa [#allocation4], 0  ;;  %s2727_s0 = inlined_call_operand.hbm [shape: bf16[2,42,128], index: 0, kind: input, shape index: {}]   ;;  %s2728_s1 = inlined_call_operand.hbm [shape: bf16[3,3,128,128], index: 1, kind: input, shape index: {}]   ;;  %s2729_s2 = inlined_call_operand.hbm [shape: f32[1,128], index: 2, kind: input, shape index: {}]   ;;  %s2730_s3 = inlined_call_operand.hbm [shape: bf16[2,4,4,128], index: 3, kind: output, shape index: {}]  }
   0x1   :  { %10 = vsyncpa [#allocation4 + $0x1], 0 }
   0x2   :  { %11 = vsyncpa [#allocation7], 0 }
   0x3   :  { %12 = vsyncpa [#allocation5], 0 }
   0x4   :  { %14 = vsyncpa [#allocation5 + $0x1], 0  ;;  %s2431_s12 = smov 0   ;;  %s2433_s13 = smov 0  }
   0x5   :  { %s2435_s14 = smov 0   ;;  %s2437_s15 = smov 0  }
   0x6 LB: > { %s2452_s16 = sadd.s32 4294967295, %s2397_s15   ;;  %s1650_s17 = sadd.s32 4294967294, %s2397_s15   ;;  %s2397_s15 = sphi %s2437_s15, %s2750_s15   ;;  %s2393_s14 = sphi %s2435_s14, %s2749_s14   ;;  %s2389_s13 = sphi %s2433_s13, %s2748_s13   ;;  %s2385_s12 = sphi %s2431_s12, %s2747_s12  }
   0x7   : > { %p40_p0 = scmp.ne.s32.totalorder %s2389_s13, %s2385_s12  ;;  %p2731_p1 = scmp.eq.s32.totalorder %s2452_s16, 0 }
   0x8   : > { %p112_p3 = scmp.eq.s32.totalorder %s1650_s17, 1  ;;  %p1651_p5 = scmp.ge.s32.totalorder %s2397_s15, 1 }
   0x9   : > { %p2461_p4 = por %p2731_p1, %p40_p0  ;;  %p119_p7 = scmp.lt.s32.totalorder %s2397_s15, 3 }
   0xa   : > { %p2466_p6 = por %p112_p3, %p40_p0  ;;  %s2403_s21 = smov [#allocation6]  }
   0xb   : > { %s2734_s18 = scalar_select %p2461_p4, 1, 0 }
   0xc   : > { %s2735_s19 = scalar_select %p2466_p6, 1, 0 }
   0xd   : > { %p2471_p8 = pnand %p1651_p5, %p119_p7  ;;  %s131_s22 = sshll.u32 %s2403_s21, 4  ;;  %s2475_s22 = int_to_ptr.vmem [resolvable:$true] %s131_s22 }
   0xe   : > { %s2404_s24 = smov [#allocation8]   ;;  %s2237_s28 = scalar_lea.hbm %s2728_s1, 9216 }
   0xf   : > { %p2080_p9 = pneg %p2471_p8  ;;  %s145_s25 = sshll.u32 %s2404_s24, 4  ;;  %s2486_s25 = int_to_ptr.vmem [resolvable:$true] %s145_s25 }
  0x10   : > { %p2238_p12 = scmp.ne.s32.totalorder %s2728_s1, %s2237_s28  ;;  %p2244_p5 = scmp.lt.u32.totalorder %s2237_s28, %s2728_s1 }
  0x11   : > { %p2482_p11 = pnand %p2080_p9, %p2731_p1 }
  0x13   : > { %p2239_p13 = pneg %p2482_p11 }
  0x15   : > { %p2240_p0 = pnand %p2239_p13, %p2238_p12 }
  0x17   : > { %p2241_p3 = pneg %p2240_p0 }
  0x19   : > { %p2246_p7 = pnand %p2244_p5, %p2241_p3 }
  0x1b   : > { %2249 = shalt.err (!%p2246_p7)
}
  0x1c   : > { %s2250_s6 = scalar_lea.vmem %s2475_s22, 9216  ;;  %p2258_p2 = scmp.lt.s32.totalorder %s2475_s22, %s2475_s22 }
  0x1d   : > { %p2251_p9 = scmp.ne.s32.totalorder %s2475_s22, %s2250_s6  ;;  %p2259_p12 = scmp.lt.s32.totalorder %s2250_s6, %s2250_s6 }
  0x1f   : > { %p2253_p10 = pnand %p2251_p9, %p2239_p13  ;;  %p2260_p0 = por %p2259_p12, %p2258_p2 }
  0x21   : > { %p2254_p1 = pneg %p2253_p10 }
  0x23   : > { %p2261_p6 = pnand %p2260_p0, %p2254_p1 }
  0x25   : > { %2264 = shalt.err (!%p2261_p6)
}
  0x26   : > { %s2405_s7 = smov 64   ;;  %s2406_s8 = smov 4  }
  0x27   : > { %2083 = dma.hbm_to_vmem [thread:$0]  (!%p2482_p11), %s2728_s1, 9216, %s2475_s22, [#allocation7], %s2405_s7, %s2405_s7, %s2406_s8  }
  0x28   : > { %s2265_s21 = scalar_lea.hbm %s2729_s2, 16 }
  0x29   : > { %p2266_p1 = scmp.ne.s32.totalorder %s2729_s2, %s2265_s21  ;;  %p2272_p10 = scmp.lt.u32.totalorder %s2265_s21, %s2729_s2 }
  0x2b   : > { %p2268_p2 = pnand %p2266_p1, %p2239_p13 }
  0x2d   : > { %p2269_p6 = pneg %p2268_p2 }
  0x2f   : > { %p2274_p3 = pnand %p2272_p10, %p2269_p6 }
  0x31   : > { %2277 = shalt.err (!%p2274_p3)
}
  0x32   : > { %s2278_s22 = scalar_lea.vmem %s2486_s25, 16  ;;  %s2285_s29 = scalar_lea.vmem %s2486_s25, 32 }
  0x33   : > { %p2279_p5 = scmp.ne.s32.totalorder %s2486_s25, %s2278_s22  ;;  %p2286_p12 = scmp.lt.s32.totalorder %s2486_s25, %s2486_s25 }
  0x34   : > { %p2287_p0 = scmp.lt.s32.totalorder %s2285_s29, %s2278_s22 }
  0x35   : > { %p2281_p7 = pnand %p2279_p5, %p2239_p13 }
  0x36   : > { %p2288_p1 = por %p2287_p0, %p2286_p12 }
  0x37   : > { %p2282_p9 = pneg %p2281_p7 }
  0x39   : > { %p2289_p2 = pnand %p2288_p1, %p2282_p9 }
  0x3b   : > { %2292 = shalt.err (!%p2289_p2)
}
  0x3c   : > { %2086 = dma.hbm_to_vmem [thread:$0]  (!%p2482_p11), %s2729_s2, 16, %s2486_s25, [#allocation7]  }
  0x3d   : > { %s2545_s5 = sadd.s32 1, %s2397_s15   ;;  %s27_s23 = sadd.s32 1, %s2393_s14 }
  0x3e   : > { %s24_s6 = ssub.s32 %s2397_s15, %s2545_s5  ;;  %p34_p13 = scmp.ne.s32.totalorder %s2393_s14, %s2389_s13 }
  0x3f   : > { %p25_p6 = scmp.eq.s32.totalorder %s24_s6, 0  ;;  %p35_p10 = scmp.eq.s32.totalorder %s2397_s15, 0 }
  0x40   : > { %p2738_p3 = scmp.eq.s32.totalorder %s2452_s16, 1  ;;  %p2097_p7 = scmp.lt.s32.totalorder %s2397_s15, 2 }
  0x41   : > { %s2561_s10 = scalar_select %p25_p6, %s2393_s14, %s27_s23  }
  0x42   : > { %p2555_p5 = por %p2738_p3, %p34_p13  ;;  %p36_p9 = por %p35_p10, %p34_p13 }
  0x43   : > { %s156_s11 = sand.u32 1, %s2393_s14   ;;  %s2066_s25 = smul.u32 384, %s2397_s15 }
  0x44   : > { %s2739_s9 = scalar_select %p2555_p5, 1, 0 }
  0x45   : > { %s2065_s17 = smul.u32 24, %s156_s11  ;;  %p2565_p11 = pnand %p2097_p7, %p36_p9 }
  0x46   : > { %s2572_s27 = scalar_lea.hbm %s2727_s0, %s2066_s25  ;;  %s2576_s29 = scalar_lea.sflag [#allocation4], %s156_s11 }
  0x47   : > { %s160_s28 = scalar_lea.vmem [#allocation3], %s2065_s17  ;;  %s2293_s30 = scalar_lea.hbm %s2572_s27, 384 }
  0x48   : > { %s167_s22 = sshll.u32 %s160_s28, 4  ;;  %p2294_p12 = scmp.ne.s32.totalorder %s2572_s27, %s2293_s30  ;;  %s2574_s22 = int_to_ptr.vmem [resolvable:$true] %s167_s22 }
  0x49   : > { %p2295_p0 = pneg %p2565_p11  ;;  %s2298_s6 = scalar_lea.hbm %s2727_s0, 768 }
  0x4a   : > { %p2299_p13 = scmp.lt.u32.totalorder %s2572_s27, %s2727_s0  ;;  %p2300_p6 = scmp.lt.u32.totalorder %s2298_s6, %s2293_s30 }
  0x4b   : > { %p2296_p1 = pnand %p2295_p0, %p2294_p12  ;;  %p2302_p3 = scmp.lt.u32.totalorder %s2293_s30, %s2572_s27 }
  0x4c   : > { %p2301_p10 = por %p2300_p6, %p2299_p13 }
  0x4d   : > { %p2297_p2 = pneg %p2296_p1 }
  0x4e   : > { %p2303_p7 = por %p2302_p3, %p2301_p10 }
  0x50   : > { %p2304_p9 = pnand %p2303_p7, %p2297_p2 }
  0x52   : > { %2307 = shalt.err (!%p2304_p9)
}
  0x53   : > { %s2308_s11 = scalar_lea.vmem %s2574_s22, 384  ;;  %s2407_s17 = smov [#allocation3]  }
  0x54   : > { %p2309_p12 = scmp.ne.s32.totalorder %s2574_s22, %s2308_s11  ;;  %s2313_s26 = sshll.u32 %s2407_s17, 4  ;;  %s2314_s26 = int_to_ptr.vmem [resolvable:$false] %s2313_s26 }
  0x55   : > { %s2315_s28 = scalar_lea.vmem %s2314_s26, 768  ;;  %p2316_p4 = scmp.lt.s32.totalorder %s2574_s22, %s2314_s26 }
  0x56   : > { %p2311_p1 = pnand %p2309_p12, %p2295_p0  ;;  %p2317_p13 = scmp.lt.s32.totalorder %s2315_s28, %s2308_s11 }
  0x58   : > { %p2312_p5 = pneg %p2311_p1  ;;  %p2318_p6 = por %p2317_p13, %p2316_p4 }
  0x5a   : > { %p2319_p10 = pnand %p2318_p6, %p2312_p5 }
  0x5c   : > { %2322 = shalt.err (!%p2319_p10)
}
  0x5d   : > { %2090 = dma.hbm_to_vmem [thread:$0]  (!%p2565_p11), %s2572_s27, 384, %s2574_s22, %s2576_s29, %s2405_s7, %s2405_s7, %s2406_s8  }
  0x5e   : > { %179 = sbr.rel (%p2471_p8) target bundleno = 515 (0x203), region = 32  ;;  %s2610_s30 = sand.u32 (!%p2471_p8), 1, %s2389_s13  }
  0x5f   : > { %s2067_s4 = smul.u32 (!%p2471_p8), 24, %s2610_s30  ;;  %s182_s23 = scalar_lea.sflag (!%p2471_p8), [#allocation4], %s2610_s30 }
  0x60   : > { %p2741_p4 = scmp.ne.s32.totalorder (!%p2471_p8), %s2734_s18, 0 }
  0x61   : > { %s2614_s6 = scalar_lea.vmem (!%p2471_p8), [#allocation3], %s2067_s4 }
  0x65   : > { %2372 = dma.done.wait (%p2741_p4), %s182_s23, 384  }
  0x66   : > { %2374 = vsyncadd (%p2741_p4), %s182_s23, 4294966912  ;;  %p2742_p5 = scmp.eq.s32.totalorder %s2452_s16, 0 }
  0x68   : > { %2376 = dma.done.wait (%p2742_p5), [#allocation7], 9232   ;;  %p2743_p8 = pmov %p2742_p5 }
  0x69   : > { %s1659_s20 = sshll.u32 %s2610_s30, 3  ;;  %v2625_v0 = vld [vmem:[#allocation8] ss:$0 sm:$0xff]  ;;  %v2149_v3 = vld [vmem:[#allocation6 + $0x8] sm:$0xff]   ;;  %v2151_v5 = vld [vmem:[#allocation6 + $0x10] sm:$0xff]   ;;  %vm533_vm2 = vcmask 1046528  }
  0x6a   : > { %2378 = vsyncadd (%p2743_p8), [#allocation7], 4294958064  ;;  %v2147_v1 = vld [vmem:[#allocation6] sm:$0xff]   ;;  %v2150_v4 = vld [vmem:[#allocation6 + $0x108] sm:$0xff]   ;;  %vm817_vm0 = vsmask.f32 4352 }
  0x6b   : > { %v2148_v2 = vld [vmem:[#allocation6 + $0x100] sm:$0xff]   ;;  %1848 = vmatprep.subr.bf16.mxu1 %v2147_v1  ;;  %v2152_v6 = vld [vmem:[#allocation6 + $0x110] sm:$0xff]   ;;  %v2153_v7 = vld [vmem:[#allocation6 + $0x18] sm:$0xff]   ;;  %vm379_vm1 = vsmask.f32 7424  ;;  %vm1108_vm3 = vcmask 1045504  }
  0x6c   : > { %1928 = vmatprep.subr.bf16.mxu0 %v2148_v2  ;;  %1849 = vmatpush3.bf16.msra.mxu1 %v2147_v1  ;;  %v2154_v8 = vld [vmem:[#allocation6 + $0x118] sm:$0xff]   ;;  %v2155_v9 = vld [vmem:[#allocation6 + $0x20] sm:$0xff]   ;;  %v2157_v11 = vld [vmem:[#allocation6 + $0x28] sm:$0xff]   ;;  %vm675_vm4 = vcmask 1044480   ;;  %vm1250_vm5 = vsmask.f32 5376 }
  0x6d   : > { %1929 = vmatpush3.bf16.msra.mxu0 %v2148_v2  ;;  %1850 = vmatprep.subr.bf16.mxu1 %v2149_v3  ;;  %v2156_v10 = vld [vmem:[#allocation6 + $0x120] sm:$0xff]   ;;  %v2163_v12 = vld [vmem:[%s2614_s6] sm:$0xff]   ;;  %v2166_v15 = vld [vmem:[%s2614_s6 + $0x8] sm:$0xff]   ;;  %s215_s18 = scalar_lea.vmem [#allocation9], %s1659_s20  ;;  %s2399_s7 = smov 0  }
  0x6e   : > { %1930 = vmatprep.subr.bf16.mxu0 %v2150_v4  ;;  %v2158_v13 = vld [vmem:[#allocation6 + $0x128] sm:$0xff]   ;;  %1864 = vmatprep.mubr.bf16.mxu1 %v2163_v12  ;;  %v2159_v16 = vld [vmem:[#allocation6 + $0x30] sm:$0xff]   ;;  %v827_v20 = vshrl.u32 %v2166_v15, 16  ;;  %v830_v21 = vshll.u32 %v2166_v15, 16  ;;  %v2161_v24 = vld [vmem:[#allocation6 + $0x38] sm:$0xff]  }
  0x6f   : > { %v2165_v14 = vld [vmem:[%s2614_s6] sm:$0xf8]   ;;  %v2162_v28 = vld [vmem:[#allocation6 + $0x138] sm:$0xff]   ;;  %v2164_v31 = vld [vmem:[#allocation6 + $0x40] sm:$0xff]  }
  0x70   : > { %1851 = vmatpush3.bf16.msra.mxu1 %v2149_v3  ;;  %v819_v17 = vshrl.u32 %v2165_v14, 16  ;;  %v822_v18 = vshll.u32 %v2165_v14, 16  ;;  %v2160_v19 = vld [vmem:[#allocation6 + $0x130] sm:$0xff]   ;;  %v829_v25 = vrot.slane %v827_v20, 3  ;;  %v832_v26 = vrot.slane %v830_v21, 4  ;;  %v2167_v32 = vld [vmem:[#allocation6 + $0x140] sm:$0xff]  }
  0x71   : > { %1931 = vmatpush3.bf16.msra.mxu0 %v2150_v4  ;;  %1852 = vmatprep.subr.bf16.mxu1 %v2151_v5  ;;  %v2168_v33 = vld [vmem:[%s2614_s6 + $0x8] ss:$0 sps:$4 sm:$0xff]   ;;  %v2169_v34 = vld [vmem:[#allocation6 + $0x48] sm:$0xff]   ;;  %v2175_v49 = vld [vmem:[#allocation6 + $0x60] sm:$0xff]  }
  0x72   : > { %1932 = vmatprep.subr.bf16.mxu0 %v2152_v6  ;;  %v821_v22 = vrot.slane %v819_v17, 3  ;;  %v824_v23 = vrot.slane %v822_v18, 4  ;;  %v833_v29 = vor.u32 %v832_v26, %v829_v25  ;;  %v2170_v35 = vld [vmem:[#allocation6 + $0x148] sm:$0xff]   ;;  %v2171_v36 = vld [vmem:[#allocation6 + $0x50] sm:$0xff]   ;;  %v2173_v44 = vld [vmem:[#allocation6 + $0x58] sm:$0xff]  }
  0x73   : > { %v2172_v37 = vld [vmem:[#allocation6 + $0x150] sm:$0xff]   ;;  %v2174_v45 = vld [vmem:[#allocation6 + $0x158] sm:$0xff]   ;;  %v2176_v50 = vld [vmem:[#allocation6 + $0x160] sm:$0xff]  }
  0x74   : > { %1853 = vmatpush3.bf16.msra.mxu1 %v2151_v5  ;;  %v825_v27 = vor.u32 %v824_v23, %v821_v22  ;;  %v2183_v38 = vld [vmem:[%s2614_s6] sm:$0xff]   ;;  %v2184_v39 = vld [vmem:[%s2614_s6 + $0x8] sm:$0x1f]   ;;  %v2185_v60 = vld [vmem:[#allocation6 + $0x80] sm:$0xff]  }
  0x75   : > { %1933 = vmatpush3.bf16.msra.mxu0 %v2152_v6  ;;  %1854 = vmatprep.subr.bf16.mxu1 %v2153_v7  ;;  %v381_v40 = vshrl.u32 %v2183_v38, 16  ;;  %v383_v41 = vshll.u32 %v2183_v38, 16  ;;  %v388_v42 = vshll.u32 %v2184_v39, 16  ;;  %v2186_v43 = vld [vmem:[%s2614_s6 + $0x4] sm:$0xff]   ;;  %v392_v58 = vshrl.u32 %v2184_v39, 16  ;;  %v2187_v62 = vld [vmem:[#allocation6 + $0x180] sm:$0xff]  }
  0x76   : > { %1934 = vmatprep.subr.bf16.mxu0 %v2154_v8  ;;  %v834_v30 = vsel %vm817_vm0, %v825_v27, %v833_v29  ;;  %v2177_v52 = vld [vmem:[#allocation6 + $0x68] sm:$0xff]   ;;  %v2179_v54 = vld [vmem:[#allocation6 + $0x70] sm:$0xff]   ;;  %v2181_v56 = vld [vmem:[#allocation6 + $0x78] sm:$0xff]  }
  0x77   : > { %1944 = vmatprep.mubr.bf16.mxu0 %v834_v30  ;;  %v385_v46 = vrot.slane %v383_v41, 1  ;;  %v390_v47 = vrot.slane %v388_v42, 1  ;;  %v2178_v53 = vld [vmem:[#allocation6 + $0x168] sm:$0xff]   ;;  %v2180_v55 = vld [vmem:[#allocation6 + $0x170] sm:$0xff]   ;;  %v2182_v57 = vld [vmem:[#allocation6 + $0x178] sm:$0xff]  }
  0x78   : > { %1855 = vmatpush3.bf16.msra.mxu1 %v2153_v7  ;;  %v2203_v59 = vld [vmem:[%s2614_s6] sm:$0xfe]   ;;  %v2637_v61 = vld [vmem:[%s2614_s6 + $0x8] sm:$0x1f]   ;;  %v2196_v17 = vld [vmem:[#allocation6 + $0x1a0] sm:$0xff]  }
  0x79   : > { %1935 = vmatpush3.bf16.msra.mxu0 %v2154_v8  ;;  %1856 = vmatprep.subr.bf16.mxu1 %v2155_v9  ;;  %v386_v48 = vor.u32 %v385_v46, %v381_v40  ;;  %v2206_v63 = vld [vmem:[%s2614_s6 + $0x4] sm:$0xfc]   ;;  %v2188_v1 = vld [vmem:[%s2614_s6 + $0xc] ss:$0 sps:$4 sm:$0xff]   ;;  %v394_v3 = vor.u32 %v392_v58, %v390_v47  ;;  %v534_v4 = vrot.slane %v2203_v59, 1  ;;  %v535_v5 = vrot.slane %v2637_v61, 1 }
  0x7a   : > { %1936 = vmatprep.subr.bf16.mxu0 %v2156_v10  ;;  %v2642_v2 = vld [vmem:[%s2614_s6 + $0xc] sm:$0x3f]   ;;  %v1109_v6 = vrot.slane %v2206_v63, 2  ;;  %v2189_v8 = vld [vmem:[#allocation6 + $0x88] sm:$0xff]  }
  0x7b   : > { %v391_v51 = vsel %vm379_vm1, %v386_v48, %v390_v47  ;;  %v1110_v7 = vrot.slane %v2642_v2, 2  ;;  %v2191_v12 = vld [vmem:[#allocation6 + $0x90] sm:$0xff]   ;;  %v2193_v14 = vld [vmem:[#allocation6 + $0x98] sm:$0xff]   ;;  %v2197_v18 = vld [vmem:[#allocation6 + $0xa8] sm:$0xff]  }
  0x7c   : > { %1857 = vmatpush3.bf16.msra.mxu1 %v2155_v9  ;;  %v2190_v9 = vld [vmem:[#allocation6 + $0x188] sm:$0xff]   ;;  %v2194_v15 = vld [vmem:[#allocation6 + $0x198] sm:$0xff]   ;;  %v2199_v22 = vld [vmem:[#allocation6 + $0xb0] sm:$0xff]  }
  0x7d   : > { %1937 = vmatpush3.bf16.msra.mxu0 %v2156_v10  ;;  %1858 = vmatprep.subr.bf16.mxu1 %v2157_v11  ;;  %v536_v10 = vsel %vm533_vm2, %v534_v4, %v535_v5  ;;  %v2225_v20 = vld [vmem:[%s2614_s6 + $0x4] sm:$0xfc]   ;;  %v2226_v21 = vld [vmem:[%s2614_s6 + $0xc] sm:$0x7f]  }
  0x7e   : > { %1938 = vmatprep.subr.bf16.mxu0 %v2158_v13  ;;  %v2200_v23 = vld [vmem:[#allocation6 + $0x1b0] sm:$0xff]   ;;  %v1255_v25 = vshll.u32 %v2225_v20, 16  ;;  %v1260_v26 = vshrl.u32 %v2226_v21, 16  ;;  %v1263_v27 = vshll.u32 %v2226_v21, 16  ;;  %v2209_v42 = vld [vmem:[#allocation6 + $0xc8] sm:$0xff]   ;;  %v2213_v48 = vld [vmem:[#allocation6 + $0xd8] sm:$0xff]  }
  0x7f   : > { %v2223_v30 = vld [vmem:[%s2614_s6] sm:$0xf8]   ;;  %v2236_v59 = vld [vmem:[%s2614_s6 + $0xc] sm:$0x7f]  }
  0x80   : > { %1859 = vmatpush3.bf16.msra.mxu1 %v2157_v11  ;;  %v1111_v11 = vsel %vm1108_vm3, %v1109_v6, %v1110_v7  ;;  %v676_v38 = vrot.slane %v2223_v30, 3  ;;  %v2211_v46 = vld [vmem:[#allocation6 + $0xd0] sm:$0xff]   ;;  %v2228_v63 = vld [vmem:[#allocation6 + $0x208] sm:$0xff]   ;;  %v2231_v4 = vld [vmem:[#allocation6 + $0x220] sm:$0xff]  }
  0x81   : > { %1939 = vmatpush3.bf16.msra.mxu0 %v2158_v13  ;;  %1860 = vmatprep.subr.bf16.mxu1 %v2159_v16  ;;  %v2192_v13 = vld [vmem:[#allocation6 + $0x190] sm:$0xff]  }
  0x82   : > { %1940 = vmatprep.subr.bf16.mxu0 %v2160_v19  ;;  %v2212_v47 = vld [vmem:[#allocation6 + $0x1d0] sm:$0xff]  }
  0x83   : > { %v2235_v58 = vld [vmem:[%s2614_s6 + $0x4] sm:$0xf8]  }
  0x84   : > { %1861 = vmatpush3.bf16.msra.mxu1 %v2159_v16  ;;  %v2195_v16 = vld [vmem:[#allocation6 + $0xa0] sm:$0xff]   ;;  %v1406_v61 = vrot.slane %v2235_v58, 3  ;;  %v2229_v2 = vld [vmem:[#allocation6 + $0x210] sm:$0xff]  }
  0x85   : > { %1941 = vmatpush3.bf16.msra.mxu0 %v2160_v19  ;;  %1862 = vmatprep.subr.bf16.mxu1 %v2161_v24  ;;  %v2198_v19 = vld [vmem:[#allocation6 + $0x1a8] sm:$0xff]   ;;  %v2233_v6 = vld [vmem:[#allocation6 + $0x230] sm:$0xff]  }
  0x86   : > { %1942 = vmatprep.subr.bf16.mxu0 %v2162_v28 }
  0x88   : > { %1863 = vmatpush3.bf16.msra.mxu1 %v2161_v24  ;;  %v1252_v24 = vshrl.u32 %v2225_v20, 16 }
  0x89   : > { %1943 = vmatpush3.bf16.msra.mxu0 %v2162_v28  ;;  %1868 = vmatprep.subr.bf16.mxu1 %v2164_v31  ;;  %v2201_v28 = vld [vmem:[#allocation6 + $0xb8] sm:$0xff]  }
  0x8a   : > { %1948 = vmatprep.subr.bf16.mxu0 %v2167_v32 }
  0x8b   : > { %1865 = vmatmul.mubr.bf16.vlgmr.msra.gmra.mrb[0].mxu1 %v2168_v33  ;;  %v1257_v33 = vrot.slane %v1255_v25, 3 }
  0x8c   : > { %1869 = vmatpush3.bf16.msra.mxu1 %v2164_v31  ;;  %1945 = vmatmul.mubr.bf16.vlgmr.msra.gmra.mrb[0].mxu0 %v833_v29  ;;  %v2202_v29 = vld [vmem:[#allocation6 + $0x1b8] sm:$0xff]  }
  0x8d   : > { %1949 = vmatpush3.bf16.msra.mxu0 %v2167_v32  ;;  %1870 = vmatprep.subr.bf16.mxu1 %v2169_v34  ;;  %v2655_v31 = vld [vmem:[%s2614_s6 + $0x8] sm:$0x7f]   ;;  %v1254_v32 = vrot.slane %v1252_v24, 2 }
  0x8e   : > { %1950 = vmatprep.subr.bf16.mxu0 %v2170_v35  ;;  %1964 = vmatprep.mubr.bf16.mxu0 %v2186_v43  ;;  %v677_v39 = vrot.slane %v2655_v31, 3  ;;  %v2210_v43 = vld [vmem:[#allocation6 + $0x1c8] sm:$0xff]  }
  0x8f   : > { %1884 = vmatprep.mubr.bf16.mxu1 %v391_v51  ;;  %v1258_v40 = vor.u32 %v1257_v33, %v1254_v32  ;;  %v2216_v51 = vld [vmem:[#allocation6 + $0x1e0] sm:$0xff]  }
  0x90   : > { %1871 = vmatpush3.bf16.msra.mxu1 %v2169_v34  ;;  %v1262_v34 = vrot.slane %v1260_v26, 2 }
  0x91   : > { %1951 = vmatpush3.bf16.msra.mxu0 %v2170_v35  ;;  %1872 = vmatprep.subr.bf16.mxu1 %v2171_v36  ;;  %v1265_v35 = vrot.slane %v1263_v27, 3 }
  0x92   : > { %1952 = vmatprep.subr.bf16.mxu0 %v2172_v37 }
  0x93   : > { %v2658_v41 = vor.u32 %v1265_v35, %v1262_v34 }
  0x94   : > { %1873 = vmatpush3.bf16.msra.mxu1 %v2171_v36  ;;  %v2205_v36 = vld [vmem:[#allocation6 + $0xc0] sm:$0xff]  }
  0x95   : > { %1953 = vmatpush3.bf16.msra.mxu0 %v2172_v37  ;;  %1874 = vmatprep.subr.bf16.mxu1 %v2173_v44  ;;  %v2208_v37 = vld [vmem:[#allocation6 + $0x1c0] sm:$0xff]  }
  0x96   : > { %1954 = vmatprep.subr.bf16.mxu0 %v2174_v45 }
  0x98   : > { %1875 = vmatpush3.bf16.msra.mxu1 %v2173_v44  ;;  %v678_v44 = vsel %vm675_vm4, %v676_v38, %v677_v39 }
  0x99   : > { %1955 = vmatpush3.bf16.msra.mxu0 %v2174_v45  ;;  %1876 = vmatprep.subr.bf16.mxu1 %v2175_v49  ;;  %v1267_v45 = vsel %vm1250_vm5, %v1258_v40, %v2658_v41 }
  0x9a   : > { %1956 = vmatprep.subr.bf16.mxu0 %v2176_v50 }
  0x9c   : > { %1877 = vmatpush3.bf16.msra.mxu1 %v2175_v49  ;;  %v2214_v49 = vld [vmem:[#allocation6 + $0x1d8] sm:$0xff]  }
  0x9d   : > { %1957 = vmatpush3.bf16.msra.mxu0 %v2176_v50  ;;  %1878 = vmatprep.subr.bf16.mxu1 %v2177_v52  ;;  %v2215_v50 = vld [vmem:[#allocation6 + $0xe0] sm:$0xff]  }
  0x9e   : > { %1958 = vmatprep.subr.bf16.mxu0 %v2178_v53 }
  0xa0   : > { %1879 = vmatpush3.bf16.msra.mxu1 %v2177_v52  ;;  %v2217_v52 = vld [vmem:[#allocation6 + $0xe8] sm:$0xff]  }
  0xa1   : > { %1959 = vmatpush3.bf16.msra.mxu0 %v2178_v53  ;;  %1880 = vmatprep.subr.bf16.mxu1 %v2179_v54  ;;  %v2218_v53 = vld [vmem:[#allocation6 + $0x1e8] sm:$0xff]  }
  0xa2   : > { %1960 = vmatprep.subr.bf16.mxu0 %v2180_v55 }
  0xa4   : > { %1881 = vmatpush3.bf16.msra.mxu1 %v2179_v54  ;;  %v2219_v54 = vld [vmem:[#allocation6 + $0xf0] sm:$0xff]  }
  0xa5   : > { %1961 = vmatpush3.bf16.msra.mxu0 %v2180_v55  ;;  %1882 = vmatprep.subr.bf16.mxu1 %v2181_v56  ;;  %v2220_v55 = vld [vmem:[#allocation6 + $0x1f0] sm:$0xff]  }
  0xa6   : > { %1962 = vmatprep.subr.bf16.mxu0 %v2182_v57 }
  0xa8   : > { %1883 = vmatpush3.bf16.msra.mxu1 %v2181_v56  ;;  %v2221_v56 = vld [vmem:[#allocation6 + $0xf8] sm:$0xff]  }
  0xa9   : > { %1963 = vmatpush3.bf16.msra.mxu0 %v2182_v57  ;;  %1888 = vmatprep.subr.bf16.mxu1 %v2185_v60  ;;  %v2222_v57 = vld [vmem:[#allocation6 + $0x1f8] sm:$0xff]  }
  0xaa   : > { %1968 = vmatprep.subr.bf16.mxu0 %v2187_v62 }
  0xab   : > { %1885 = vmatmul.mubr.bf16.vlgmr.msra.gmra.mrb[0].mxu1 %v394_v3  ;;  %v2230_v3 = vld [vmem:[#allocation6 + $0x218] sm:$0xff]  }
  0xac   : > { %1889 = vmatpush3.bf16.msra.mxu1 %v2185_v60  ;;  %1965 = vmatmul.mubr.bf16.vlgmr.msra.gmra.mrb[0].mxu0 %v2188_v1  ;;  %v2227_v60 = vld [vmem:[#allocation6 + $0x200] sm:$0xff]  }
  0xad   : > { %1969 = vmatpush3.bf16.msra.mxu0 %v2187_v62  ;;  %1890 = vmatprep.subr.bf16.mxu1 %v2189_v8  ;;  %v1407_v62 = vrot.slane %v2236_v59, 3 }
  0xae   : > { %1970 = vmatprep.subr.bf16.mxu0 %v2190_v9  ;;  %1904 = vmatprep.mubr.bf16.mxu1 %v536_v10 }
  0xaf   : > { %1984 = vmatprep.mubr.bf16.mxu0 %v1111_v11  ;;  %v1408_v1 = vsel %vm675_vm4, %v1406_v61, %v1407_v62 }
  0xb0   : > { %1891 = vmatpush3.bf16.msra.mxu1 %v2189_v8 }
  0xb1   : > { %1971 = vmatpush3.bf16.msra.mxu0 %v2190_v9  ;;  %1892 = vmatprep.subr.bf16.mxu1 %v2191_v12 }
  0xb2   : > { %1972 = vmatprep.subr.bf16.mxu0 %v2192_v13 }
  0xb4   : > { %1893 = vmatpush3.bf16.msra.mxu1 %v2191_v12 }
  0xb5   : > { %1973 = vmatpush3.bf16.msra.mxu0 %v2192_v13  ;;  %1894 = vmatprep.subr.bf16.mxu1 %v2193_v14 }
  0xb6   : > { %1974 = vmatprep.subr.bf16.mxu0 %v2194_v15 }
  0xb8   : > { %1895 = vmatpush3.bf16.msra.mxu1 %v2193_v14 }
  0xb9   : > { %1975 = vmatpush3.bf16.msra.mxu0 %v2194_v15  ;;  %1896 = vmatprep.subr.bf16.mxu1 %v2195_v16 }
  0xba   : > { %1976 = vmatprep.subr.bf16.mxu0 %v2196_v17 }
  0xbc   : > { %1897 = vmatpush3.bf16.msra.mxu1 %v2195_v16 }
  0xbd   : > { %1977 = vmatpush3.bf16.msra.mxu0 %v2196_v17  ;;  %1898 = vmatprep.subr.bf16.mxu1 %v2197_v18 }
  0xbe   : > { %1978 = vmatprep.subr.bf16.mxu0 %v2198_v19 }
  0xc0   : > { %1899 = vmatpush3.bf16.msra.mxu1 %v2197_v18 }
  0xc1   : > { %1979 = vmatpush3.bf16.msra.mxu0 %v2198_v19  ;;  %1900 = vmatprep.subr.bf16.mxu1 %v2199_v22 }
  0xc2   : > { %1980 = vmatprep.subr.bf16.mxu0 %v2200_v23 }
  0xc4   : > { %1901 = vmatpush3.bf16.msra.mxu1 %v2199_v22 }
  0xc5   : > { %1981 = vmatpush3.bf16.msra.mxu0 %v2200_v23  ;;  %1902 = vmatprep.subr.bf16.mxu1 %v2201_v28 }
  0xc6   : > { %1982 = vmatprep.subr.bf16.mxu0 %v2202_v29 }
  0xc8   : > { %1903 = vmatpush3.bf16.msra.mxu1 %v2201_v28 }
  0xc9   : > { %1983 = vmatpush3.bf16.msra.mxu0 %v2202_v29  ;;  %1908 = vmatprep.subr.bf16.mxu1 %v2205_v36 }
  0xca   : > { %1988 = vmatprep.subr.bf16.mxu0 %v2208_v37 }
  0xcb   : > { %1905 = vmatmul.mubr.bf16.vlgmr.msra.gmra.mrb[0].mxu1 %v535_v5  ;;  %v2232_v5 = vld [vmem:[#allocation6 + $0x228] sm:$0xff]  }
  0xcc   : > { %1909 = vmatpush3.bf16.msra.mxu1 %v2205_v36  ;;  %1985 = vmatmul.mubr.bf16.vlgmr.msra.gmra.mrb[0].mxu0 %v1110_v7  ;;  %v2234_v7 = vld [vmem:[#allocation6 + $0x238] sm:$0xff]  }
  0xcd   : > { %1989 = vmatpush3.bf16.msra.mxu0 %v2208_v37  ;;  %1910 = vmatprep.subr.bf16.mxu1 %v2209_v42 }
  0xce   : > { %1990 = vmatprep.subr.bf16.mxu0 %v2210_v43  ;;  %1924 = vmatprep.mubr.bf16.mxu1 %v678_v44 }
  0xcf   : > { %2004 = vmatprep.mubr.bf16.mxu0 %v1267_v45 }
  0xd0   : > { %1911 = vmatpush3.bf16.msra.mxu1 %v2209_v42 }
  0xd1   : > { %1991 = vmatpush3.bf16.msra.mxu0 %v2210_v43  ;;  %1912 = vmatprep.subr.bf16.mxu1 %v2211_v46 }
  0xd2   : > { %1992 = vmatprep.subr.bf16.mxu0 %v2212_v47 }
  0xd4   : > { %1913 = vmatpush3.bf16.msra.mxu1 %v2211_v46 }
  0xd5   : > { %1993 = vmatpush3.bf16.msra.mxu0 %v2212_v47  ;;  %1914 = vmatprep.subr.bf16.mxu1 %v2213_v48 }
  0xd6   : > { %1994 = vmatprep.subr.bf16.mxu0 %v2214_v49 }
  0xd8   : > { %1915 = vmatpush3.bf16.msra.mxu1 %v2213_v48 }
  0xd9   : > { %1995 = vmatpush3.bf16.msra.mxu0 %v2214_v49  ;;  %1916 = vmatprep.subr.bf16.mxu1 %v2215_v50 }
  0xda   : > { %1996 = vmatprep.subr.bf16.mxu0 %v2216_v51 }
  0xdc   : > { %1917 = vmatpush3.bf16.msra.mxu1 %v2215_v50 }
  0xdd   : > { %1997 = vmatpush3.bf16.msra.mxu0 %v2216_v51  ;;  %1918 = vmatprep.subr.bf16.mxu1 %v2217_v52 }
  0xde   : > { %1998 = vmatprep.subr.bf16.mxu0 %v2218_v53 }
  0xe0   : > { %1919 = vmatpush3.bf16.msra.mxu1 %v2217_v52 }
  0xe1   : > { %1999 = vmatpush3.bf16.msra.mxu0 %v2218_v53  ;;  %1920 = vmatprep.subr.bf16.mxu1 %v2219_v54 }
  0xe2   : > { %2000 = vmatprep.subr.bf16.mxu0 %v2220_v55 }
  0xe4   : > { %1921 = vmatpush3.bf16.msra.mxu1 %v2219_v54 }
  0xe5   : > { %2001 = vmatpush3.bf16.msra.mxu0 %v2220_v55  ;;  %1922 = vmatprep.subr.bf16.mxu1 %v2221_v56 }
  0xe6   : > { %2002 = vmatprep.subr.bf16.mxu0 %v2222_v57 }
  0xe8   : > { %1923 = vmatpush3.bf16.msra.mxu1 %v2221_v56 }
  0xe9   : > { %2003 = vmatpush3.bf16.msra.mxu0 %v2222_v57 }
  0xea   : > { %2008 = vmatprep.subr.bf16.mxu0 %v2227_v60 }
  0xeb   : > { %1925 = vmatmul.mubr.bf16.vlgmr.msra.gmra.mrb[0].mxu1 %v677_v39 }
  0xec   : > { %2005 = vmatmul.mubr.bf16.vlgmr.msra.gmra.mrb[0].mxu0 %v2658_v41 }
  0xed   : > { %2009 = vmatpush3.bf16.msra.mxu0 %v2227_v60  ;;  %2024 = vmatprep.mubr.bf16.mxu0 %v1408_v1 }
  0xee   : > { %2010 = vmatprep.subr.bf16.mxu0 %v2228_v63 }
  0xf1   : > { %2011 = vmatpush3.bf16.msra.mxu0 %v2228_v63 }
  0xf2   : > { %2012 = vmatprep.subr.bf16.mxu0 %v2229_v2 }
  0xf5   : > { %2013 = vmatpush3.bf16.msra.mxu0 %v2229_v2 }
  0xf6   : > { %2014 = vmatprep.subr.bf16.mxu0 %v2230_v3 }
  0xf9   : > { %2015 = vmatpush3.bf16.msra.mxu0 %v2230_v3 }
  0xfa   : > { %2016 = vmatprep.subr.bf16.mxu0 %v2231_v4 }
  0xfd   : > { %2017 = vmatpush3.bf16.msra.mxu0 %v2231_v4 }
  0xfe   : > { %2018 = vmatprep.subr.bf16.mxu0 %v2232_v5 }
 0x101   : > { %2019 = vmatpush3.bf16.msra.mxu0 %v2232_v5 }
 0x102   : > { %2020 = vmatprep.subr.bf16.mxu0 %v2233_v6 }
 0x105   : > { %2021 = vmatpush3.bf16.msra.mxu0 %v2233_v6 }
 0x106   : > { %2022 = vmatprep.subr.bf16.mxu0 %v2234_v7 }
 0x109   : > { %2023 = vmatpush3.bf16.msra.mxu0 %v2234_v7 }
 0x10c   : > { %2025 = vmatmul.mubr.bf16.vlgmr.msra.gmra.mrb[0].mxu0 %v1407_v62 }
 0x1be   : > { %v1926_v8 = vpop.f32.mrb[0].mxu1 }
 0x1bf   : > { %v763_v9 = vpop.f32.mrb[1].mxu1 }
 0x1c0   : > { %v1927_v10 = vpop.f32.mrb[2].mxu1 }
 0x1c1   : > { %v766_v11 = vpop.f32.mrb[3].mxu1 }
 0x1df   : > { %v2026_v12 = vpop.f32.mrb[0].mxu0 }
 0x1e0   : > { %v2030_v13 = vadd.f32 %v2026_v12, %v1926_v8  ;;  %v1493_v14 = vpop.f32.mrb[1].mxu0 }
 0x1e1   : > { %v2033_v15 = vadd.f32 %v1493_v14, %v763_v9  ;;  %v2027_v16 = vpop.f32.mrb[2].mxu0 }
 0x1e2   : > { %1512 = vst [vmem:[#allocation2 + $0x10] sm:$0xff] %v2030_v13  ;;  %v1496_v17 = vpop.f32.mrb[3].mxu0 }
 0x1e3   : > { %1510 = vst [vmem:[#allocation2] sm:$0xff] %v2033_v15  ;;  %v2036_v18 = vadd.f32 %v1496_v17, %v766_v11 }
 0x1e5   : > { %1511 = vst [vmem:[#allocation2 + $0x8] sm:$0xff] %v2036_v18 }
 0x1e6 LB: >> { %s1520_s8 = smul.u32 6, %s2401_s7  ;;  %s1751_s27 = sshll.u32 %s2401_s7, 1  ;;  %s2401_s7 = sphi %s2399_s7, %s1519_s7  }
 0x1e7   : >> { %s1533_s22 = scalar_lea.vmem %s215_s18, %s1751_s27 [#allocation9]  ;;  %s1519_s7 = sadd.s32 1, %s2401_s7  }
 0x1e8   : >> { %s1521_s21 = scalar_lea.vmem [#allocation2], %s1520_s8  ;;  %p1516_p11 = scmp.ge.s32.totalorder %s1519_s7, 4  }
 0x1e9   : > { %s1757_s29 = sshll.u32 (%p1516_p11), %s2452_s16, 7  ;;  %s1549_s17 = sshll.u32 (%p1516_p11), %s215_s18, 4  ;;  %s2683_s17 = int_to_ptr.vmem [resolvable:$true] %s1549_s17 }
 0x1ea   : > { %s2681_s11 = scalar_lea.hbm (%p1516_p11), %s2730_s3, %s1757_s29  ;;  %s1536_s26 = scalar_lea.sflag (%p1516_p11), [#allocation5], %s2610_s30 }
 0x1eb   : > { %s2323_s28 = scalar_lea.vmem (%p1516_p11), %s2683_s17, 128  ;;  %p2744_p2 = scmp.ne.s32.totalorder (%p1516_p11), %s2739_s9, 0 }
 0x1ec   : >> { %v1522_v19 = vld [vmem:[%s1521_s21] sm:$0xf]  ;;  %p2324_p0 = scmp.ne.s32.totalorder (%p1516_p11), %s2683_s17, %s2323_s28  ;;  %s2408_s4 = smov (%p1516_p11), [#allocation9]  }
 0x1ed   : >> { %v1529_v20 = vadd.f32 %v2625_v0, %v1522_v19  ;;  %1518 = sbr.rel (!%p1516_p11) target bundleno = 486 (0x1e6), region = 102  ;;  %s2327_s23 = sshll.u32 (%p1516_p11), %s2408_s4, 4  ;;  %s2328_s23 = int_to_ptr.vmem [resolvable:$false] %s2327_s23 }
 0x1ee   : > { %p2325_p3 = pnand (%p1516_p11), %p2324_p0, %p2744_p2  ;;  %s2329_s16 = scalar_lea.vmem (%p1516_p11), %s2328_s23, 256 }
 0x1ef   : >> { %v1530_v21 = vmax.f32 %v1529_v20, 0.0  ;;  %p2330_p9 = scmp.lt.s32.totalorder (%p1516_p11), %s2683_s17, %s2328_s23  ;;  %p2331_p12 = scmp.lt.s32.totalorder (%p1516_p11), %s2329_s16, %s2323_s28 }
 0x1f0   : > { %p2326_p7 = pneg (%p1516_p11), %p2325_p3 }
 0x1f1   : >> { %v1531_v22 = vpack.c.bf16 %v1530_v21, %v1530_v21  ;;  %p2332_p1 = por (%p1516_p11), %p2331_p12, %p2330_p9 }
 0x1f3   : >> { %1534 = vst [vmem:[%s1533_s22] sm:$0x3] %v1531_v22  ;;  %p2333_p13 = pnand (%p1516_p11), %p2332_p1, %p2326_p7 }
 0x1f5   : > { %2336 = shalt.err (!%p2333_p13)
}
 0x1f6   : > { %s2337_s6 = scalar_lea.hbm %s2681_s11, 128  ;;  %s2341_s7 = scalar_lea.hbm %s2730_s3, 256 }
 0x1f7   : > { %p2338_p6 = scmp.ne.s32.totalorder %s2681_s11, %s2337_s6  ;;  %p2342_p5 = scmp.lt.u32.totalorder %s2681_s11, %s2730_s3 }
 0x1f8   : > { %p2343_p8 = scmp.lt.u32.totalorder %s2341_s7, %s2337_s6  ;;  %p2345_p0 = scmp.lt.u32.totalorder %s2337_s6, %s2681_s11 }
 0x1f9   : > { %p2339_p10 = pnand %p2338_p6, %p2744_p2 }
 0x1fa   : > { %p2344_p11 = por %p2343_p8, %p2342_p5 }
 0x1fb   : > { %p2340_p4 = pneg %p2339_p10 }
 0x1fc   : > { %p2346_p3 = por %p2345_p0, %p2344_p11 }
 0x1fe   : > { %p2347_p7 = pnand %p2346_p3, %p2340_p4 }
 0x200   : > { %2350 = shalt.err (!%p2347_p7)
}
 0x201   : > { %s2409_s27 = smov 32   ;;  %s2410_s22 = smov 2  }
 0x202   : > { %2078 = dma.vmem_to_hbm [thread:$0]  (%p2744_p2), %s2683_s17, 128, %s2681_s11, %s1536_s26, %s2409_s27, %s2409_s27, %s2410_s22  }
 0x203 PF: > { %s1564_s29 = sand.u32 1, %s2385_s12   ;;  %p2745_p9 = scmp.ne.s32.totalorder %s2735_s19, 0 }
 0x204   : > { %p2746_p12 = scmp.ge.s32.totalorder %s2397_s15, 2  ;;  %s1565_s25 = scalar_lea.sflag [#allocation5], %s1564_s29 }
 0x206   : > { %p2092_p1 = pnand %p2746_p12, %p2745_p9 }
 0x208   : > { %2380 = dma.done.wait (!%p2092_p1), %s1565_s25, 128  }
 0x209   : > { %2382 = vsyncadd (!%p2092_p1), %s1565_s25, 4294967168  ;;  %p17_p13 = scmp.ge.s32.totalorder %s2545_s5, 4   ;;  %s2747_s12 = smov %s2389_s13 }
 0x20a   : > { %s2748_s13 = smov %s2393_s14  ;;  %s2749_s14 = smov %s2561_s10 }
 0x20b   : > { %s2750_s15 = smov %s2545_s5  ;;  %19 = sbr.rel (!%p17_p13) target bundleno = 6 (0x6), region = 113 }
 0x212   :  { %1570 = vsyncpa [#allocation4], 1 }
 0x213   :  { %1572 = vsyncpa [#allocation4 + $0x1], 1 }
 0x214   :  { %1573 = vsyncpa [#allocation7], 1 }
 0x215   :  { %1574 = vsyncpa [#allocation5], 1 }
 0x216   :  { %1576 = vsyncpa [#allocation5 + $0x1], 1 }

</bundles_post_ra>
